<compile_context>
chip_gen: v7x
topology: tpu7x:2x2x1
jax: 0.10.0
libtpu: 0.0.40
codegen_flags: <defaults>
</compile_context>

<pallas_src>
import numpy as np
import jax
import jax.numpy as jnp
from jax.experimental import pallas as pl
from jax.experimental.pallas import tpu as pltpu

IMG_HEIGHT = 16
IMG_WIDTH = 16
ENCODING_DIM = 32
BATCH = 2

H4, W4 = IMG_HEIGHT // 4, IMG_WIDTH // 4      # 4, 4
H2, W2 = IMG_HEIGHT // 2, IMG_WIDTH // 2      # 8, 8
N0 = H4 * W4                                  # 16   (4x4 pixels)
N1 = H2 * W2                                  # 64   (8x8 pixels)
N2 = IMG_HEIGHT * IMG_WIDTH                   # 256  (16x16 pixels)
C_FC = 128                                    # fc2 channel count
COUT_PAD = 128                                # final conv channels padded 3 -> 128


# ----------------------------------------------------------------------------
# Fused kernel: the whole decoder for one batch element per grid step.
# ----------------------------------------------------------------------------
def fused_decoder_kernel(vblk_ref, wfc_ref, bfc_ref,
                         l4_ref, w4_ref, b4_ref,
                         l5_ref, w5_ref, b5_ref,
                         l6_ref, w6_ref, b6_ref,
                         out_ref):
    f32 = jnp.float32

    def conv(x, l_ref, w_ref, b_ref):
        # out = sum_tap L_tap @ (x @ W_tap) + b
        #   L_tap : (N_out, N_in)   spatial shift (+ folded bicubic upsample)
        #   W_tap : (Cin, Cout)     channel mixing (ConvTranspose -> same-conv taps)
        n_out = l_ref.shape[1]
        c_out = w_ref.shape[2]
        acc = jnp.zeros((n_out, c_out), f32) + b_ref[...]
        for t in range(9):
            a = jnp.dot(x, w_ref[t], preferred_element_type=f32)          # (N_in, Cout)
            acc = acc + jnp.dot(l_ref[t], a, preferred_element_type=f32)  # (N_out, Cout)
        return acc

    # fc2 + relu -> (16, 128): rows = flattened 4x4 spatial, lanes = 128 channels.
    x0 = jnp.maximum(
        jnp.dot(vblk_ref[...], wfc_ref[...], preferred_element_type=f32) + bfc_ref[...],
        0.0)
    # convT4 + relu                                    (16, 128) -> (16, 64)
    x1 = jnp.maximum(conv(x0, l4_ref, w4_ref, b4_ref), 0.0)
    # bicubic x2 (folded into l5) + convT5 + relu      (16, 64)  -> (64, 32)
    x2 = jnp.maximum(conv(x1, l5_ref, w5_ref, b5_ref), 0.0)
    # bicubic x2 (folded into l6) + convT6 (3->128 pad)(64, 32)  -> (256, 128)
    x3 = conv(x2, l6_ref, w6_ref, b6_ref)
    # Lane-dense epilogue: aligned (256,128) -> (128,256) transpose, keep the 3 real
    # channels, sigmoid, store as (3, 256).
    x3_t = jnp.transpose(x3)
    out_ref[...] = jax.nn.sigmoid(x3_t[0:3, :])


def _fused_decoder(vblk, p):
    B = vblk.shape[0]
    c2 = lambda b: (0, 0)
    c3 = lambda b: (0, 0, 0)
    return pl.pallas_call(
        fused_decoder_kernel,
        out_shape=jax.ShapeDtypeStruct((B, 3, N2), jnp.float32),
        grid=(B,),
        in_specs=[
            pl.BlockSpec((None, N0, N0 * ENCODING_DIM), lambda b: (b, 0, 0)),
            pl.BlockSpec((N0 * ENCODING_DIM, C_FC), c2),
            pl.BlockSpec((N0, C_FC), c2),
            pl.BlockSpec((9, N0, N0), c3),
            pl.BlockSpec((9, C_FC, 64), c3),
            pl.BlockSpec((1, 64), c2),
            pl.BlockSpec((9, N1, N0), c3),
            pl.BlockSpec((9, 64, 32), c3),
            pl.BlockSpec((1, 32), c2),
            pl.BlockSpec((9, N2, N1), c3),
            pl.BlockSpec((9, 32, COUT_PAD), c3),
            pl.BlockSpec((1, COUT_PAD), c2),
        ],
        out_specs=pl.BlockSpec((None, 3, N2), lambda b: (b, 0, 0)),
        compiler_params=pltpu.CompilerParams(dimension_semantics=("parallel",)),
    )(vblk, p["w_fc"], p["b_fc"],
      p["l4"], p["w4"], p["b4"],
      p["l5"], p["w5"], p["b5"],
      p["l6"], p["w6"], p["b6"])


@jax.jit
def var_decoder_forward(v, p):
    B = v.shape[0]
    # Block-diagonal expansion of the latent so the in-kernel fc matmul directly
    # produces the (N0, 128) NHWC-flat activation (no in-kernel reshape).
    vblk = jnp.tile(v, (1, N0))[:, None, :] * p["blk_mask"][None, :, :]   # (B, 16, 512)
    out = _fused_decoder(vblk, p)                                          # (B, 3, 256)
    return out.reshape(B, 3, IMG_HEIGHT, IMG_WIDTH)                        # NCHW, metadata-only


# ----------------------------------------------------------------------------
# Host-side operator construction (plain numpy, done once at init).
# ----------------------------------------------------------------------------
def bicubic_upsample_matrix(n_in, n_out):
    """1-D bicubic interpolation matrix, PyTorch semantics, align_corners=True."""
    a = -0.75

    def cubic1(x):      # |x| <= 1
        return ((a + 2.0) * x - (a + 3.0)) * x * x + 1.0

    def cubic2(x):      # 1 < |x| < 2
        return (((x - 5.0) * x + 8.0) * x - 4.0) * a

    U = np.zeros((n_out, n_in), dtype=np.float64)
    scale = (n_in - 1) / (n_out - 1)
    for j in range(n_out):
        src = j * scale
        i0 = int(np.floor(src))
        t = src - i0
        coeffs = [cubic2(t + 1.0), cubic1(t), cubic1(1.0 - t), cubic2(2.0 - t)]
        for k in range(4):
            idx = min(max(i0 - 1 + k, 0), n_in - 1)
            U[j, idx] += coeffs[k]
    return U


def shift_operators(h, w):
    """9 zero-padded 'same'-conv shift operators G_tap[(y,x),(y+dy-1,x+dx-1)] = 1."""
    n = h * w
    ops = np.zeros((9, n, n), dtype=np.float64)
    for dy in range(3):
        for dx in range(3):
            for y in range(h):
                for x in range(w):
                    yy, xx = y + dy - 1, x + dx - 1
                    if 0 <= yy < h and 0 <= xx < w:
                        ops[dy * 3 + dx, y * w + x, yy * w + xx] = 1.0
    return ops


def convtranspose_to_taps(wt):
    """ConvTranspose2d weight (Cin, Cout, 3, 3), stride=1, padding=1 -> taps of the
    equivalent 'same' 3x3 conv, laid out (9, Cin, Cout)."""
    w = np.asarray(wt)[:, :, ::-1, ::-1]          # spatial flip
    w = np.transpose(w, (2, 3, 0, 1))             # (dy, dx, Cin, Cout)
    return np.ascontiguousarray(w).reshape(9, wt.shape[0], wt.shape[1])


def init_raw_params(key, encoding_dim):
    fc_out = 128 * H4 * W4
    ks = jax.random.split(key, 8)

    def unif(k, shape, fan_in):
        bound = 1.0 / np.sqrt(fan_in)
        return jax.random.uniform(k, shape, jnp.float32, -bound, bound)

    return {
        "fc_w": unif(ks[0], (fc_out, encoding_dim), encoding_dim),   # torch (out, in)
        "fc_b": unif(ks[1], (fc_out,), encoding_dim),
        "wt4": unif(ks[2], (128, 64, 3, 3), 64 * 9),
        "b4": unif(ks[3], (64,), 64 * 9),
        "wt5": unif(ks[4], (64, 32, 3, 3), 32 * 9),
        "b5": unif(ks[5], (32,), 32 * 9),
        "wt6": unif(ks[6], (32, 3, 3, 3), 3 * 9),
        "b6": unif(ks[7], (3,), 3 * 9),
    }


def derive_kernel_params(raw):
    e = raw["fc_w"].shape[1]

    # fc2: torch output unit o = c*N0 + p  ->  stacked weight row p*E + e_in, column c,
    # so one (N0, N0*E) @ (N0*E, C_FC) matmul yields the NHWC-flat (N0, 128) activation.
    w_fc = np.asarray(raw["fc_w"], np.float64)                 # (2048, E)
    w_fc = w_fc.reshape(C_FC, N0, e).transpose(1, 2, 0)        # (p, e, c)
    w_fc = w_fc.reshape(N0 * e, C_FC)
    b_fc = np.asarray(raw["fc_b"], np.float64).reshape(C_FC, N0).T   # (N0, 128)

    u1 = bicubic_upsample_matrix(H4, H2)                       # (8, 4)
    u2 = bicubic_upsample_matrix(H2, IMG_HEIGHT)               # (16, 8)
    m1 = np.kron(u1, u1)                                       # (64, 16)
    m2 = np.kron(u2, u2)                                       # (256, 64)

    g4 = shift_operators(H4, W4)                               # (9, 16, 16)
    g5 = shift_operators(H2, W2)                               # (9, 64, 64)
    g6 = shift_operators(IMG_HEIGHT, IMG_WIDTH)                # (9, 256, 256)

    l4 = g4                                                    # (9, 16, 16)
    l5 = np.einsum("tij,jk->tik", g5, m1)                      # (9, 64, 16)  conv5 o upsample
    l6 = np.einsum("tij,jk->tik", g6, m2)                      # (9, 256, 64) conv6 o upsample

    w4 = convtranspose_to_taps(raw["wt4"])                     # (9, 128, 64)
    w5 = convtranspose_to_taps(raw["wt5"])                     # (9, 64, 32)
    w6 = convtranspose_to_taps(raw["wt6"])                     # (9, 32, 3)
    w6p = np.zeros((9, 32, COUT_PAD), np.float64)
    w6p[:, :, :3] = w6
    b6p = np.zeros((1, COUT_PAD), np.float64)
    b6p[0, :3] = np.asarray(raw["b6"])

    blk_mask = np.kron(np.eye(N0), np.ones((1, e)))            # (16, 512)

    as32 = lambda x: jnp.asarray(np.asarray(x), dtype=jnp.float32)
    return {
        "blk_mask": as32(blk_mask),
        "w_fc": as32(w_fc), "b_fc": as32(b_fc),
        "l4": as32(l4), "w4": as32(w4), "b4": as32(np.asarray(raw["b4"]).reshape(1, 64)),
        "l5": as32(l5), "w5": as32(w5), "b5": as32(np.asarray(raw["b5"]).reshape(1, 32)),
        "l6": as32(l6), "w6": as32(w6p), "b6": as32(b6p),
    }


# ----------------------------------------------------------------------------
# Pure-JAX reference, built directly from the raw (torch-layout) parameters.
# ----------------------------------------------------------------------------
HIGHEST = jax.lax.Precision.HIGHEST


def _conv_transpose_nhwc(x, wt, b):
    # ConvTranspose2d definition: out[y,x,co] = b[co] + sum in[y+1-kh, x+1-kw, ci]*w[ci,co,kh,kw]
    Bx, h, w, _ = x.shape
    xp = jnp.pad(x, ((0, 0), (1, 1), (1, 1), (0, 0)))
    out = jnp.zeros((Bx, h, w, wt.shape[1]), jnp.float32) + b
    for kh in range(3):
        for kw in range(3):
            patch = xp[:, 2 - kh:2 - kh + h, 2 - kw:2 - kw + w, :]
            out = out + jnp.einsum("bhwc,cd->bhwd", patch, wt[:, :, kh, kw],
                                   precision=HIGHEST)
    return out


def _upsample_bicubic_nhwc(x):
    h = x.shape[1]
    u = jnp.asarray(bicubic_upsample_matrix(h, 2 * h), jnp.float32)
    y = jnp.einsum("oh,bhwc->bowc", u, x, precision=HIGHEST)
    return jnp.einsum("pw,bowc->bopc", u, y, precision=HIGHEST)


def reference_forward(v, raw):
    B = v.shape[0]
    z = jnp.maximum(jnp.dot(v, raw["fc_w"].T, precision=HIGHEST) + raw["fc_b"], 0.0)
    x = z.reshape(B, 128, H4, W4)
    x = jnp.transpose(x, (0, 2, 3, 1))                                    # NHWC
    x = jnp.maximum(_conv_transpose_nhwc(x, raw["wt4"], raw["b4"]), 0.0)
    x = _upsample_bicubic_nhwc(x)
    x = jnp.maximum(_conv_transpose_nhwc(x, raw["wt5"], raw["b5"]), 0.0)
    x = _upsample_bicubic_nhwc(x)
    x = jax.nn.sigmoid(_conv_transpose_nhwc(x, raw["wt6"], raw["b6"]))
    return jnp.transpose(x, (0, 3, 1, 2))                                  # NCHW


if __name__ == "__main__":
    key = jax.random.PRNGKey(0)
    k_param, k_in = jax.random.split(key)
    raw = init_raw_params(k_param, ENCODING_DIM)
    params = derive_kernel_params(raw)
    v = jax.random.normal(k_in, (BATCH, ENCODING_DIM), dtype=jnp.float32)

    out = var_decoder_forward(v, params)
    out = jax.block_until_ready(out)
    assert out.shape == (BATCH, 3, IMG_HEIGHT, IMG_WIDTH), out.shape

    ref = reference_forward(v, raw)
    np.testing.assert_allclose(np.asarray(out), np.asarray(ref), rtol=2e-3, atol=2e-3)
    print("KERNEL_OK")
</pallas_src>

<mosaic_0001>
module attributes {stable_mosaic.version = 11 : i64} {
  func.func @fused_decoder_kernel(%arg0: i32, %arg1: memref<1x16x512xf32, #tpu.memory_space<vmem>>, %arg2: memref<512x128xf32, #tpu.memory_space<vmem>>, %arg3: memref<16x128xf32, #tpu.memory_space<vmem>>, %arg4: memref<9x16x16xf32, #tpu.memory_space<vmem>>, %arg5: memref<9x128x64xf32, #tpu.memory_space<vmem>>, %arg6: memref<1x64xf32, #tpu.memory_space<vmem>>, %arg7: memref<9x64x16xf32, #tpu.memory_space<vmem>>, %arg8: memref<9x64x32xf32, #tpu.memory_space<vmem>>, %arg9: memref<1x32xf32, #tpu.memory_space<vmem>>, %arg10: memref<9x256x64xf32, #tpu.memory_space<vmem>>, %arg11: memref<9x32x128xf32, #tpu.memory_space<vmem>>, %arg12: memref<1x128xf32, #tpu.memory_space<vmem>>, %arg13: memref<1x3x256xf32, #tpu.memory_space<vmem>>) attributes {dimension_semantics = [#tpu.dimension_semantics<parallel>], iteration_bounds = array<i64: 2>, scalar_prefetch = 0 : i64, scratch_operands = 0 : i64, tpu.core_type = #tpu.core_type<tc>, window_params = [{transform_indices = @transform_0, window_bounds = array<i64: 1, 16, 512>}, {pipeline_mode = #tpu.pipeline_mode<synchronous>, transform_indices = @transform_1, window_bounds = array<i64: 512, 128>}, {pipeline_mode = #tpu.pipeline_mode<synchronous>, transform_indices = @transform_2, window_bounds = array<i64: 16, 128>}, {pipeline_mode = #tpu.pipeline_mode<synchronous>, transform_indices = @transform_3, window_bounds = array<i64: 9, 16, 16>}, {pipeline_mode = #tpu.pipeline_mode<synchronous>, transform_indices = @transform_4, window_bounds = array<i64: 9, 128, 64>}, {pipeline_mode = #tpu.pipeline_mode<synchronous>, transform_indices = @transform_5, window_bounds = array<i64: 1, 64>}, {pipeline_mode = #tpu.pipeline_mode<synchronous>, transform_indices = @transform_6, window_bounds = array<i64: 9, 64, 16>}, {pipeline_mode = #tpu.pipeline_mode<synchronous>, transform_indices = @transform_7, window_bounds = array<i64: 9, 64, 32>}, {pipeline_mode = #tpu.pipeline_mode<synchronous>, transform_indices = @transform_8, window_bounds = array<i64: 1, 32>}, {pipeline_mode = #tpu.pipeline_mode<synchronous>, transform_indices = @transform_9, window_bounds = array<i64: 9, 256, 64>}, {pipeline_mode = #tpu.pipeline_mode<synchronous>, transform_indices = @transform_10, window_bounds = array<i64: 9, 32, 128>}, {pipeline_mode = #tpu.pipeline_mode<synchronous>, transform_indices = @transform_11, window_bounds = array<i64: 1, 128>}, {transform_indices = @transform_12, window_bounds = array<i64: 1, 3, 256>}]} {
    %c0 = arith.constant 0 : index
    %c0_0 = arith.constant 0 : index
    %c0_1 = arith.constant 0 : index
    %0 = vector.load %arg1[%c0, %c0_0, %c0_1] : memref<1x16x512xf32, #tpu.memory_space<vmem>>, vector<1x16x512xf32>
    %1 = vector.shape_cast %0 : vector<1x16x512xf32> to vector<16x512xf32>
    %c0_2 = arith.constant 0 : index
    %c0_3 = arith.constant 0 : index
    %2 = vector.load %arg2[%c0_2, %c0_3] : memref<512x128xf32, #tpu.memory_space<vmem>>, vector<512x128xf32>
    %cst = arith.constant dense<0.000000e+00> : vector<16x128xf32>
    %3 = tpu.matmul %1, %2, %cst {dimension_numbers = #tpu.dot_dimension_numbers<[1], [0], [0], [1], [0, 0, 1, 1], [], []>} : vector<16x512xf32>, vector<512x128xf32>, vector<16x128xf32> -> vector<16x128xf32>
    %c0_4 = arith.constant 0 : index
    %c0_5 = arith.constant 0 : index
    %4 = vector.load %arg3[%c0_4, %c0_5] : memref<16x128xf32, #tpu.memory_space<vmem>>, vector<16x128xf32>
    %5 = arith.addf %3, %4 : vector<16x128xf32>
    %cst_6 = arith.constant 0.000000e+00 : f32
    %6 = vector.broadcast %cst_6 : f32 to vector<16x128xf32>
    %7 = arith.maximumf %5, %6 : vector<16x128xf32>
    %cst_7 = arith.constant 0.000000e+00 : f32
    %8 = vector.broadcast %cst_7 : f32 to vector<16x64xf32>
    %c0_8 = arith.constant 0 : index
    %c0_9 = arith.constant 0 : index
    %9 = vector.load %arg6[%c0_8, %c0_9] : memref<1x64xf32, #tpu.memory_space<vmem>>, vector<1x64xf32>
    %10 = vector.broadcast %9 : vector<1x64xf32> to vector<16x64xf32>
    %11 = arith.addf %8, %10 : vector<16x64xf32>
    %c0_10 = arith.constant 0 : index
    %c0_11 = arith.constant 0 : index
    %c0_12 = arith.constant 0 : index
    %12 = vector.load %arg5[%c0_10, %c0_11, %c0_12] : memref<9x128x64xf32, #tpu.memory_space<vmem>>, vector<1x128x64xf32>
    %13 = vector.shape_cast %12 : vector<1x128x64xf32> to vector<128x64xf32>
    %cst_13 = arith.constant dense<0.000000e+00> : vector<16x64xf32>
    %14 = tpu.matmul %7, %13, %cst_13 {dimension_numbers = #tpu.dot_dimension_numbers<[1], [0], [0], [1], [0, 0, 1, 1], [], []>} : vector<16x128xf32>, vector<128x64xf32>, vector<16x64xf32> -> vector<16x64xf32>
    %c0_14 = arith.constant 0 : index
    %c0_15 = arith.constant 0 : index
    %c0_16 = arith.constant 0 : index
    %15 = vector.load %arg4[%c0_14, %c0_15, %c0_16] : memref<9x16x16xf32, #tpu.memory_space<vmem>>, vector<1x16x16xf32>
    %16 = vector.shape_cast %15 : vector<1x16x16xf32> to vector<16x16xf32>
    %cst_17 = arith.constant dense<0.000000e+00> : vector<16x64xf32>
    %17 = tpu.matmul %16, %14, %cst_17 {dimension_numbers = #tpu.dot_dimension_numbers<[1], [0], [0], [1], [0, 0, 1, 1], [], []>} : vector<16x16xf32>, vector<16x64xf32>, vector<16x64xf32> -> vector<16x64xf32>
    %18 = arith.addf %11, %17 : vector<16x64xf32>
    %c1 = arith.constant 1 : index
    %c0_18 = arith.constant 0 : index
    %c0_19 = arith.constant 0 : index
    %19 = vector.load %arg5[%c1, %c0_18, %c0_19] : memref<9x128x64xf32, #tpu.memory_space<vmem>>, vector<1x128x64xf32>
    %20 = vector.shape_cast %19 : vector<1x128x64xf32> to vector<128x64xf32>
    %cst_20 = arith.constant dense<0.000000e+00> : vector<16x64xf32>
    %21 = tpu.matmul %7, %20, %cst_20 {dimension_numbers = #tpu.dot_dimension_numbers<[1], [0], [0], [1], [0, 0, 1, 1], [], []>} : vector<16x128xf32>, vector<128x64xf32>, vector<16x64xf32> -> vector<16x64xf32>
    %c1_21 = arith.constant 1 : index
    %c0_22 = arith.constant 0 : index
    %c0_23 = arith.constant 0 : index
    %22 = vector.load %arg4[%c1_21, %c0_22, %c0_23] : memref<9x16x16xf32, #tpu.memory_space<vmem>>, vector<1x16x16xf32>
    %23 = vector.shape_cast %22 : vector<1x16x16xf32> to vector<16x16xf32>
    %cst_24 = arith.constant dense<0.000000e+00> : vector<16x64xf32>
    %24 = tpu.matmul %23, %21, %cst_24 {dimension_numbers = #tpu.dot_dimension_numbers<[1], [0], [0], [1], [0, 0, 1, 1], [], []>} : vector<16x16xf32>, vector<16x64xf32>, vector<16x64xf32> -> vector<16x64xf32>
    %25 = arith.addf %18, %24 : vector<16x64xf32>
    %c2 = arith.constant 2 : index
    %c0_25 = arith.constant 0 : index
    %c0_26 = arith.constant 0 : index
    %26 = vector.load %arg5[%c2, %c0_25, %c0_26] : memref<9x128x64xf32, #tpu.memory_space<vmem>>, vector<1x128x64xf32>
    %27 = vector.shape_cast %26 : vector<1x128x64xf32> to vector<128x64xf32>
    %cst_27 = arith.constant dense<0.000000e+00> : vector<16x64xf32>
    %28 = tpu.matmul %7, %27, %cst_27 {dimension_numbers = #tpu.dot_dimension_numbers<[1], [0], [0], [1], [0, 0, 1, 1], [], []>} : vector<16x128xf32>, vector<128x64xf32>, vector<16x64xf32> -> vector<16x64xf32>
    %c2_28 = arith.constant 2 : index
    %c0_29 = arith.constant 0 : index
    %c0_30 = arith.constant 0 : index
    %29 = vector.load %arg4[%c2_28, %c0_29, %c0_30] : memref<9x16x16xf32, #tpu.memory_space<vmem>>, vector<1x16x16xf32>
    %30 = vector.shape_cast %29 : vector<1x16x16xf32> to vector<16x16xf32>
    %cst_31 = arith.constant dense<0.000000e+00> : vector<16x64xf32>
    %31 = tpu.matmul %30, %28, %cst_31 {dimension_numbers = #tpu.dot_dimension_numbers<[1], [0], [0], [1], [0, 0, 1, 1], [], []>} : vector<16x16xf32>, vector<16x64xf32>, vector<16x64xf32> -> vector<16x64xf32>
    %32 = arith.addf %25, %31 : vector<16x64xf32>
    %c3 = arith.constant 3 : index
    %c0_32 = arith.constant 0 : index
    %c0_33 = arith.constant 0 : index
    %33 = vector.load %arg5[%c3, %c0_32, %c0_33] : memref<9x128x64xf32, #tpu.memory_space<vmem>>, vector<1x128x64xf32>
    %34 = vector.shape_cast %33 : vector<1x128x64xf32> to vector<128x64xf32>
    %cst_34 = arith.constant dense<0.000000e+00> : vector<16x64xf32>
    %35 = tpu.matmul %7, %34, %cst_34 {dimension_numbers = #tpu.dot_dimension_numbers<[1], [0], [0], [1], [0, 0, 1, 1], [], []>} : vector<16x128xf32>, vector<128x64xf32>, vector<16x64xf32> -> vector<16x64xf32>
    %c3_35 = arith.constant 3 : index
    %c0_36 = arith.constant 0 : index
    %c0_37 = arith.constant 0 : index
    %36 = vector.load %arg4[%c3_35, %c0_36, %c0_37] : memref<9x16x16xf32, #tpu.memory_space<vmem>>, vector<1x16x16xf32>
    %37 = vector.shape_cast %36 : vector<1x16x16xf32> to vector<16x16xf32>
    %cst_38 = arith.constant dense<0.000000e+00> : vector<16x64xf32>
    %38 = tpu.matmul %37, %35, %cst_38 {dimension_numbers = #tpu.dot_dimension_numbers<[1], [0], [0], [1], [0, 0, 1, 1], [], []>} : vector<16x16xf32>, vector<16x64xf32>, vector<16x64xf32> -> vector<16x64xf32>
    %39 = arith.addf %32, %38 : vector<16x64xf32>
    %c4 = arith.constant 4 : index
    %c0_39 = arith.constant 0 : index
    %c0_40 = arith.constant 0 : index
    %40 = vector.load %arg5[%c4, %c0_39, %c0_40] : memref<9x128x64xf32, #tpu.memory_space<vmem>>, vector<1x128x64xf32>
    %41 = vector.shape_cast %40 : vector<1x128x64xf32> to vector<128x64xf32>
    %cst_41 = arith.constant dense<0.000000e+00> : vector<16x64xf32>
    %42 = tpu.matmul %7, %41, %cst_41 {dimension_numbers = #tpu.dot_dimension_numbers<[1], [0], [0], [1], [0, 0, 1, 1], [], []>} : vector<16x128xf32>, vector<128x64xf32>, vector<16x64xf32> -> vector<16x64xf32>
    %c4_42 = arith.constant 4 : index
    %c0_43 = arith.constant 0 : index
    %c0_44 = arith.constant 0 : index
    %43 = vector.load %arg4[%c4_42, %c0_43, %c0_44] : memref<9x16x16xf32, #tpu.memory_space<vmem>>, vector<1x16x16xf32>
    %44 = vector.shape_cast %43 : vector<1x16x16xf32> to vector<16x16xf32>
    %cst_45 = arith.constant dense<0.000000e+00> : vector<16x64xf32>
    %45 = tpu.matmul %44, %42, %cst_45 {dimension_numbers = #tpu.dot_dimension_numbers<[1], [0], [0], [1], [0, 0, 1, 1], [], []>} : vector<16x16xf32>, vector<16x64xf32>, vector<16x64xf32> -> vector<16x64xf32>
    %46 = arith.addf %39, %45 : vector<16x64xf32>
    %c5 = arith.constant 5 : index
    %c0_46 = arith.constant 0 : index
    %c0_47 = arith.constant 0 : index
    %47 = vector.load %arg5[%c5, %c0_46, %c0_47] : memref<9x128x64xf32, #tpu.memory_space<vmem>>, vector<1x128x64xf32>
    %48 = vector.shape_cast %47 : vector<1x128x64xf32> to vector<128x64xf32>
    %cst_48 = arith.constant dense<0.000000e+00> : vector<16x64xf32>
    %49 = tpu.matmul %7, %48, %cst_48 {dimension_numbers = #tpu.dot_dimension_numbers<[1], [0], [0], [1], [0, 0, 1, 1], [], []>} : vector<16x128xf32>, vector<128x64xf32>, vector<16x64xf32> -> vector<16x64xf32>
    %c5_49 = arith.constant 5 : index
    %c0_50 = arith.constant 0 : index
    %c0_51 = arith.constant 0 : index
    %50 = vector.load %arg4[%c5_49, %c0_50, %c0_51] : memref<9x16x16xf32, #tpu.memory_space<vmem>>, vector<1x16x16xf32>
    %51 = vector.shape_cast %50 : vector<1x16x16xf32> to vector<16x16xf32>
    %cst_52 = arith.constant dense<0.000000e+00> : vector<16x64xf32>
    %52 = tpu.matmul %51, %49, %cst_52 {dimension_numbers = #tpu.dot_dimension_numbers<[1], [0], [0], [1], [0, 0, 1, 1], [], []>} : vector<16x16xf32>, vector<16x64xf32>, vector<16x64xf32> -> vector<16x64xf32>
    %53 = arith.addf %46, %52 : vector<16x64xf32>
    %c6 = arith.constant 6 : index
    %c0_53 = arith.constant 0 : index
    %c0_54 = arith.constant 0 : index
    %54 = vector.load %arg5[%c6, %c0_53, %c0_54] : memref<9x128x64xf32, #tpu.memory_space<vmem>>, vector<1x128x64xf32>
    %55 = vector.shape_cast %54 : vector<1x128x64xf32> to vector<128x64xf32>
    %cst_55 = arith.constant dense<0.000000e+00> : vector<16x64xf32>
    %56 = tpu.matmul %7, %55, %cst_55 {dimension_numbers = #tpu.dot_dimension_numbers<[1], [0], [0], [1], [0, 0, 1, 1], [], []>} : vector<16x128xf32>, vector<128x64xf32>, vector<16x64xf32> -> vector<16x64xf32>
    %c6_56 = arith.constant 6 : index
    %c0_57 = arith.constant 0 : index
    %c0_58 = arith.constant 0 : index
    %57 = vector.load %arg4[%c6_56, %c0_57, %c0_58] : memref<9x16x16xf32, #tpu.memory_space<vmem>>, vector<1x16x16xf32>
    %58 = vector.shape_cast %57 : vector<1x16x16xf32> to vector<16x16xf32>
    %cst_59 = arith.constant dense<0.000000e+00> : vector<16x64xf32>
    %59 = tpu.matmul %58, %56, %cst_59 {dimension_numbers = #tpu.dot_dimension_numbers<[1], [0], [0], [1], [0, 0, 1, 1], [], []>} : vector<16x16xf32>, vector<16x64xf32>, vector<16x64xf32> -> vector<16x64xf32>
    %60 = arith.addf %53, %59 : vector<16x64xf32>
    %c7 = arith.constant 7 : index
    %c0_60 = arith.constant 0 : index
    %c0_61 = arith.constant 0 : index
    %61 = vector.load %arg5[%c7, %c0_60, %c0_61] : memref<9x128x64xf32, #tpu.memory_space<vmem>>, vector<1x128x64xf32>
    %62 = vector.shape_cast %61 : vector<1x128x64xf32> to vector<128x64xf32>
    %cst_62 = arith.constant dense<0.000000e+00> : vector<16x64xf32>
    %63 = tpu.matmul %7, %62, %cst_62 {dimension_numbers = #tpu.dot_dimension_numbers<[1], [0], [0], [1], [0, 0, 1, 1], [], []>} : vector<16x128xf32>, vector<128x64xf32>, vector<16x64xf32> -> vector<16x64xf32>
    %c7_63 = arith.constant 7 : index
    %c0_64 = arith.constant 0 : index
    %c0_65 = arith.constant 0 : index
    %64 = vector.load %arg4[%c7_63, %c0_64, %c0_65] : memref<9x16x16xf32, #tpu.memory_space<vmem>>, vector<1x16x16xf32>
    %65 = vector.shape_cast %64 : vector<1x16x16xf32> to vector<16x16xf32>
    %cst_66 = arith.constant dense<0.000000e+00> : vector<16x64xf32>
    %66 = tpu.matmul %65, %63, %cst_66 {dimension_numbers = #tpu.dot_dimension_numbers<[1], [0], [0], [1], [0, 0, 1, 1], [], []>} : vector<16x16xf32>, vector<16x64xf32>, vector<16x64xf32> -> vector<16x64xf32>
    %67 = arith.addf %60, %66 : vector<16x64xf32>
    %c8 = arith.constant 8 : index
    %c0_67 = arith.constant 0 : index
    %c0_68 = arith.constant 0 : index
    %68 = vector.load %arg5[%c8, %c0_67, %c0_68] : memref<9x128x64xf32, #tpu.memory_space<vmem>>, vector<1x128x64xf32>
    %69 = vector.shape_cast %68 : vector<1x128x64xf32> to vector<128x64xf32>
    %cst_69 = arith.constant dense<0.000000e+00> : vector<16x64xf32>
    %70 = tpu.matmul %7, %69, %cst_69 {dimension_numbers = #tpu.dot_dimension_numbers<[1], [0], [0], [1], [0, 0, 1, 1], [], []>} : vector<16x128xf32>, vector<128x64xf32>, vector<16x64xf32> -> vector<16x64xf32>
    %c8_70 = arith.constant 8 : index
    %c0_71 = arith.constant 0 : index
    %c0_72 = arith.constant 0 : index
    %71 = vector.load %arg4[%c8_70, %c0_71, %c0_72] : memref<9x16x16xf32, #tpu.memory_space<vmem>>, vector<1x16x16xf32>
    %72 = vector.shape_cast %71 : vector<1x16x16xf32> to vector<16x16xf32>
    %cst_73 = arith.constant dense<0.000000e+00> : vector<16x64xf32>
    %73 = tpu.matmul %72, %70, %cst_73 {dimension_numbers = #tpu.dot_dimension_numbers<[1], [0], [0], [1], [0, 0, 1, 1], [], []>} : vector<16x16xf32>, vector<16x64xf32>, vector<16x64xf32> -> vector<16x64xf32>
    %74 = arith.addf %67, %73 : vector<16x64xf32>
    %cst_74 = arith.constant 0.000000e+00 : f32
    %75 = vector.broadcast %cst_74 : f32 to vector<16x64xf32>
    %76 = arith.maximumf %74, %75 : vector<16x64xf32>
    %cst_75 = arith.constant 0.000000e+00 : f32
    %77 = vector.broadcast %cst_75 : f32 to vector<64x32xf32>
    %c0_76 = arith.constant 0 : index
    %c0_77 = arith.constant 0 : index
    %78 = vector.load %arg9[%c0_76, %c0_77] : memref<1x32xf32, #tpu.memory_space<vmem>>, vector<1x32xf32>
    %79 = vector.broadcast %78 : vector<1x32xf32> to vector<64x32xf32>
    %80 = arith.addf %77, %79 : vector<64x32xf32>
    %c0_78 = arith.constant 0 : index
    %c0_79 = arith.constant 0 : index
    %c0_80 = arith.constant 0 : index
    %81 = vector.load %arg8[%c0_78, %c0_79, %c0_80] : memref<9x64x32xf32, #tpu.memory_space<vmem>>, vector<1x64x32xf32>
    %82 = vector.shape_cast %81 : vector<1x64x32xf32> to vector<64x32xf32>
    %cst_81 = arith.constant dense<0.000000e+00> : vector<16x32xf32>
    %83 = tpu.matmul %76, %82, %cst_81 {dimension_numbers = #tpu.dot_dimension_numbers<[1], [0], [0], [1], [0, 0, 1, 1], [], []>} : vector<16x64xf32>, vector<64x32xf32>, vector<16x32xf32> -> vector<16x32xf32>
    %c0_82 = arith.constant 0 : index
    %c0_83 = arith.constant 0 : index
    %c0_84 = arith.constant 0 : index
    %84 = vector.load %arg7[%c0_82, %c0_83, %c0_84] : memref<9x64x16xf32, #tpu.memory_space<vmem>>, vector<1x64x16xf32>
    %85 = vector.shape_cast %84 : vector<1x64x16xf32> to vector<64x16xf32>
    %cst_85 = arith.constant dense<0.000000e+00> : vector<64x32xf32>
    %86 = tpu.matmul %85, %83, %cst_85 {dimension_numbers = #tpu.dot_dimension_numbers<[1], [0], [0], [1], [0, 0, 1, 1], [], []>} : vector<64x16xf32>, vector<16x32xf32>, vector<64x32xf32> -> vector<64x32xf32>
    %87 = arith.addf %80, %86 : vector<64x32xf32>
    %c1_86 = arith.constant 1 : index
    %c0_87 = arith.constant 0 : index
    %c0_88 = arith.constant 0 : index
    %88 = vector.load %arg8[%c1_86, %c0_87, %c0_88] : memref<9x64x32xf32, #tpu.memory_space<vmem>>, vector<1x64x32xf32>
    %89 = vector.shape_cast %88 : vector<1x64x32xf32> to vector<64x32xf32>
    %cst_89 = arith.constant dense<0.000000e+00> : vector<16x32xf32>
    %90 = tpu.matmul %76, %89, %cst_89 {dimension_numbers = #tpu.dot_dimension_numbers<[1], [0], [0], [1], [0, 0, 1, 1], [], []>} : vector<16x64xf32>, vector<64x32xf32>, vector<16x32xf32> -> vector<16x32xf32>
    %c1_90 = arith.constant 1 : index
    %c0_91 = arith.constant 0 : index
    %c0_92 = arith.constant 0 : index
    %91 = vector.load %arg7[%c1_90, %c0_91, %c0_92] : memref<9x64x16xf32, #tpu.memory_space<vmem>>, vector<1x64x16xf32>
    %92 = vector.shape_cast %91 : vector<1x64x16xf32> to vector<64x16xf32>
    %cst_93 = arith.constant dense<0.000000e+00> : vector<64x32xf32>
    %93 = tpu.matmul %92, %90, %cst_93 {dimension_numbers = #tpu.dot_dimension_numbers<[1], [0], [0], [1], [0, 0, 1, 1], [], []>} : vector<64x16xf32>, vector<16x32xf32>, vector<64x32xf32> -> vector<64x32xf32>
    %94 = arith.addf %87, %93 : vector<64x32xf32>
    %c2_94 = arith.constant 2 : index
    %c0_95 = arith.constant 0 : index
    %c0_96 = arith.constant 0 : index
    %95 = vector.load %arg8[%c2_94, %c0_95, %c0_96] : memref<9x64x32xf32, #tpu.memory_space<vmem>>, vector<1x64x32xf32>
    %96 = vector.shape_cast %95 : vector<1x64x32xf32> to vector<64x32xf32>
    %cst_97 = arith.constant dense<0.000000e+00> : vector<16x32xf32>
    %97 = tpu.matmul %76, %96, %cst_97 {dimension_numbers = #tpu.dot_dimension_numbers<[1], [0], [0], [1], [0, 0, 1, 1], [], []>} : vector<16x64xf32>, vector<64x32xf32>, vector<16x32xf32> -> vector<16x32xf32>
    %c2_98 = arith.constant 2 : index
    %c0_99 = arith.constant 0 : index
    %c0_100 = arith.constant 0 : index
    %98 = vector.load %arg7[%c2_98, %c0_99, %c0_100] : memref<9x64x16xf32, #tpu.memory_space<vmem>>, vector<1x64x16xf32>
    %99 = vector.shape_cast %98 : vector<1x64x16xf32> to vector<64x16xf32>
    %cst_101 = arith.constant dense<0.000000e+00> : vector<64x32xf32>
    %100 = tpu.matmul %99, %97, %cst_101 {dimension_numbers = #tpu.dot_dimension_numbers<[1], [0], [0], [1], [0, 0, 1, 1], [], []>} : vector<64x16xf32>, vector<16x32xf32>, vector<64x32xf32> -> vector<64x32xf32>
    %101 = arith.addf %94, %100 : vector<64x32xf32>
    %c3_102 = arith.constant 3 : index
    %c0_103 = arith.constant 0 : index
    %c0_104 = arith.constant 0 : index
    %102 = vector.load %arg8[%c3_102, %c0_103, %c0_104] : memref<9x64x32xf32, #tpu.memory_space<vmem>>, vector<1x64x32xf32>
    %103 = vector.shape_cast %102 : vector<1x64x32xf32> to vector<64x32xf32>
    %cst_105 = arith.constant dense<0.000000e+00> : vector<16x32xf32>
    %104 = tpu.matmul %76, %103, %cst_105 {dimension_numbers = #tpu.dot_dimension_numbers<[1], [0], [0], [1], [0, 0, 1, 1], [], []>} : vector<16x64xf32>, vector<64x32xf32>, vector<16x32xf32> -> vector<16x32xf32>
    %c3_106 = arith.constant 3 : index
    %c0_107 = arith.constant 0 : index
    %c0_108 = arith.constant 0 : index
    %105 = vector.load %arg7[%c3_106, %c0_107, %c0_108] : memref<9x64x16xf32, #tpu.memory_space<vmem>>, vector<1x64x16xf32>
    %106 = vector.shape_cast %105 : vector<1x64x16xf32> to vector<64x16xf32>
    %cst_109 = arith.constant dense<0.000000e+00> : vector<64x32xf32>
    %107 = tpu.matmul %106, %104, %cst_109 {dimension_numbers = #tpu.dot_dimension_numbers<[1], [0], [0], [1], [0, 0, 1, 1], [], []>} : vector<64x16xf32>, vector<16x32xf32>, vector<64x32xf32> -> vector<64x32xf32>
    %108 = arith.addf %101, %107 : vector<64x32xf32>
    %c4_110 = arith.constant 4 : index
    %c0_111 = arith.constant 0 : index
    %c0_112 = arith.constant 0 : index
    %109 = vector.load %arg8[%c4_110, %c0_111, %c0_112] : memref<9x64x32xf32, #tpu.memory_space<vmem>>, vector<1x64x32xf32>
    %110 = vector.shape_cast %109 : vector<1x64x32xf32> to vector<64x32xf32>
    %cst_113 = arith.constant dense<0.000000e+00> : vector<16x32xf32>
    %111 = tpu.matmul %76, %110, %cst_113 {dimension_numbers = #tpu.dot_dimension_numbers<[1], [0], [0], [1], [0, 0, 1, 1], [], []>} : vector<16x64xf32>, vector<64x32xf32>, vector<16x32xf32> -> vector<16x32xf32>
    %c4_114 = arith.constant 4 : index
    %c0_115 = arith.constant 0 : index
    %c0_116 = arith.constant 0 : index
    %112 = vector.load %arg7[%c4_114, %c0_115, %c0_116] : memref<9x64x16xf32, #tpu.memory_space<vmem>>, vector<1x64x16xf32>
    %113 = vector.shape_cast %112 : vector<1x64x16xf32> to vector<64x16xf32>
    %cst_117 = arith.constant dense<0.000000e+00> : vector<64x32xf32>
    %114 = tpu.matmul %113, %111, %cst_117 {dimension_numbers = #tpu.dot_dimension_numbers<[1], [0], [0], [1], [0, 0, 1, 1], [], []>} : vector<64x16xf32>, vector<16x32xf32>, vector<64x32xf32> -> vector<64x32xf32>
    %115 = arith.addf %108, %114 : vector<64x32xf32>
    %c5_118 = arith.constant 5 : index
    %c0_119 = arith.constant 0 : index
    %c0_120 = arith.constant 0 : index
    %116 = vector.load %arg8[%c5_118, %c0_119, %c0_120] : memref<9x64x32xf32, #tpu.memory_space<vmem>>, vector<1x64x32xf32>
    %117 = vector.shape_cast %116 : vector<1x64x32xf32> to vector<64x32xf32>
    %cst_121 = arith.constant dense<0.000000e+00> : vector<16x32xf32>
    %118 = tpu.matmul %76, %117, %cst_121 {dimension_numbers = #tpu.dot_dimension_numbers<[1], [0], [0], [1], [0, 0, 1, 1], [], []>} : vector<16x64xf32>, vector<64x32xf32>, vector<16x32xf32> -> vector<16x32xf32>
    %c5_122 = arith.constant 5 : index
    %c0_123 = arith.constant 0 : index
    %c0_124 = arith.constant 0 : index
    %119 = vector.load %arg7[%c5_122, %c0_123, %c0_124] : memref<9x64x16xf32, #tpu.memory_space<vmem>>, vector<1x64x16xf32>
    %120 = vector.shape_cast %119 : vector<1x64x16xf32> to vector<64x16xf32>
    %cst_125 = arith.constant dense<0.000000e+00> : vector<64x32xf32>
    %121 = tpu.matmul %120, %118, %cst_125 {dimension_numbers = #tpu.dot_dimension_numbers<[1], [0], [0], [1], [0, 0, 1, 1], [], []>} : vector<64x16xf32>, vector<16x32xf32>, vector<64x32xf32> -> vector<64x32xf32>
    %122 = arith.addf %115, %121 : vector<64x32xf32>
    %c6_126 = arith.constant 6 : index
    %c0_127 = arith.constant 0 : index
    %c0_128 = arith.constant 0 : index
    %123 = vector.load %arg8[%c6_126, %c0_127, %c0_128] : memref<9x64x32xf32, #tpu.memory_space<vmem>>, vector<1x64x32xf32>
    %124 = vector.shape_cast %123 : vector<1x64x32xf32> to vector<64x32xf32>
    %cst_129 = arith.constant dense<0.000000e+00> : vector<16x32xf32>
    %125 = tpu.matmul %76, %124, %cst_129 {dimension_numbers = #tpu.dot_dimension_numbers<[1], [0], [0], [1], [0, 0, 1, 1], [], []>} : vector<16x64xf32>, vector<64x32xf32>, vector<16x32xf32> -> vector<16x32xf32>
    %c6_130 = arith.constant 6 : index
    %c0_131 = arith.constant 0 : index
    %c0_132 = arith.constant 0 : index
    %126 = vector.load %arg7[%c6_130, %c0_131, %c0_132] : memref<9x64x16xf32, #tpu.memory_space<vmem>>, vector<1x64x16xf32>
    %127 = vector.shape_cast %126 : vector<1x64x16xf32> to vector<64x16xf32>
    %cst_133 = arith.constant dense<0.000000e+00> : vector<64x32xf32>
    %128 = tpu.matmul %127, %125, %cst_133 {dimension_numbers = #tpu.dot_dimension_numbers<[1], [0], [0], [1], [0, 0, 1, 1], [], []>} : vector<64x16xf32>, vector<16x32xf32>, vector<64x32xf32> -> vector<64x32xf32>
    %129 = arith.addf %122, %128 : vector<64x32xf32>
    %c7_134 = arith.constant 7 : index
    %c0_135 = arith.constant 0 : index
    %c0_136 = arith.constant 0 : index
    %130 = vector.load %arg8[%c7_134, %c0_135, %c0_136] : memref<9x64x32xf32, #tpu.memory_space<vmem>>, vector<1x64x32xf32>
    %131 = vector.shape_cast %130 : vector<1x64x32xf32> to vector<64x32xf32>
    %cst_137 = arith.constant dense<0.000000e+00> : vector<16x32xf32>
    %132 = tpu.matmul %76, %131, %cst_137 {dimension_numbers = #tpu.dot_dimension_numbers<[1], [0], [0], [1], [0, 0, 1, 1], [], []>} : vector<16x64xf32>, vector<64x32xf32>, vector<16x32xf32> -> vector<16x32xf32>
    %c7_138 = arith.constant 7 : index
    %c0_139 = arith.constant 0 : index
    %c0_140 = arith.constant 0 : index
    %133 = vector.load %arg7[%c7_138, %c0_139, %c0_140] : memref<9x64x16xf32, #tpu.memory_space<vmem>>, vector<1x64x16xf32>
    %134 = vector.shape_cast %133 : vector<1x64x16xf32> to vector<64x16xf32>
    %cst_141 = arith.constant dense<0.000000e+00> : vector<64x32xf32>
    %135 = tpu.matmul %134, %132, %cst_141 {dimension_numbers = #tpu.dot_dimension_numbers<[1], [0], [0], [1], [0, 0, 1, 1], [], []>} : vector<64x16xf32>, vector<16x32xf32>, vector<64x32xf32> -> vector<64x32xf32>
    %136 = arith.addf %129, %135 : vector<64x32xf32>
    %c8_142 = arith.constant 8 : index
    %c0_143 = arith.constant 0 : index
    %c0_144 = arith.constant 0 : index
    %137 = vector.load %arg8[%c8_142, %c0_143, %c0_144] : memref<9x64x32xf32, #tpu.memory_space<vmem>>, vector<1x64x32xf32>
    %138 = vector.shape_cast %137 : vector<1x64x32xf32> to vector<64x32xf32>
    %cst_145 = arith.constant dense<0.000000e+00> : vector<16x32xf32>
    %139 = tpu.matmul %76, %138, %cst_145 {dimension_numbers = #tpu.dot_dimension_numbers<[1], [0], [0], [1], [0, 0, 1, 1], [], []>} : vector<16x64xf32>, vector<64x32xf32>, vector<16x32xf32> -> vector<16x32xf32>
    %c8_146 = arith.constant 8 : index
    %c0_147 = arith.constant 0 : index
    %c0_148 = arith.constant 0 : index
    %140 = vector.load %arg7[%c8_146, %c0_147, %c0_148] : memref<9x64x16xf32, #tpu.memory_space<vmem>>, vector<1x64x16xf32>
    %141 = vector.shape_cast %140 : vector<1x64x16xf32> to vector<64x16xf32>
    %cst_149 = arith.constant dense<0.000000e+00> : vector<64x32xf32>
    %142 = tpu.matmul %141, %139, %cst_149 {dimension_numbers = #tpu.dot_dimension_numbers<[1], [0], [0], [1], [0, 0, 1, 1], [], []>} : vector<64x16xf32>, vector<16x32xf32>, vector<64x32xf32> -> vector<64x32xf32>
    %143 = arith.addf %136, %142 : vector<64x32xf32>
    %cst_150 = arith.constant 0.000000e+00 : f32
    %144 = vector.broadcast %cst_150 : f32 to vector<64x32xf32>
    %145 = arith.maximumf %143, %144 : vector<64x32xf32>
    %cst_151 = arith.constant 0.000000e+00 : f32
    %146 = vector.broadcast %cst_151 : f32 to vector<256x128xf32>
    %c0_152 = arith.constant 0 : index
    %c0_153 = arith.constant 0 : index
    %147 = vector.load %arg12[%c0_152, %c0_153] : memref<1x128xf32, #tpu.memory_space<vmem>>, vector<1x128xf32>
    %148 = vector.broadcast %147 : vector<1x128xf32> to vector<256x128xf32>
    %149 = arith.addf %146, %148 : vector<256x128xf32>
    %c0_154 = arith.constant 0 : index
    %c0_155 = arith.constant 0 : index
    %c0_156 = arith.constant 0 : index
    %150 = vector.load %arg11[%c0_154, %c0_155, %c0_156] : memref<9x32x128xf32, #tpu.memory_space<vmem>>, vector<1x32x128xf32>
    %151 = vector.shape_cast %150 : vector<1x32x128xf32> to vector<32x128xf32>
    %cst_157 = arith.constant dense<0.000000e+00> : vector<64x128xf32>
    %152 = tpu.matmul %145, %151, %cst_157 {dimension_numbers = #tpu.dot_dimension_numbers<[1], [0], [0], [1], [0, 0, 1, 1], [], []>} : vector<64x32xf32>, vector<32x128xf32>, vector<64x128xf32> -> vector<64x128xf32>
    %c0_158 = arith.constant 0 : index
    %c0_159 = arith.constant 0 : index
    %c0_160 = arith.constant 0 : index
    %153 = vector.load %arg10[%c0_158, %c0_159, %c0_160] : memref<9x256x64xf32, #tpu.memory_space<vmem>>, vector<1x256x64xf32>
    %154 = vector.shape_cast %153 : vector<1x256x64xf32> to vector<256x64xf32>
    %cst_161 = arith.constant dense<0.000000e+00> : vector<256x128xf32>
    %155 = tpu.matmul %154, %152, %cst_161 {dimension_numbers = #tpu.dot_dimension_numbers<[1], [0], [0], [1], [0, 0, 1, 1], [], []>} : vector<256x64xf32>, vector<64x128xf32>, vector<256x128xf32> -> vector<256x128xf32>
    %156 = arith.addf %149, %155 : vector<256x128xf32>
    %c1_162 = arith.constant 1 : index
    %c0_163 = arith.constant 0 : index
    %c0_164 = arith.constant 0 : index
    %157 = vector.load %arg11[%c1_162, %c0_163, %c0_164] : memref<9x32x128xf32, #tpu.memory_space<vmem>>, vector<1x32x128xf32>
    %158 = vector.shape_cast %157 : vector<1x32x128xf32> to vector<32x128xf32>
    %cst_165 = arith.constant dense<0.000000e+00> : vector<64x128xf32>
    %159 = tpu.matmul %145, %158, %cst_165 {dimension_numbers = #tpu.dot_dimension_numbers<[1], [0], [0], [1], [0, 0, 1, 1], [], []>} : vector<64x32xf32>, vector<32x128xf32>, vector<64x128xf32> -> vector<64x128xf32>
    %c1_166 = arith.constant 1 : index
    %c0_167 = arith.constant 0 : index
    %c0_168 = arith.constant 0 : index
    %160 = vector.load %arg10[%c1_166, %c0_167, %c0_168] : memref<9x256x64xf32, #tpu.memory_space<vmem>>, vector<1x256x64xf32>
    %161 = vector.shape_cast %160 : vector<1x256x64xf32> to vector<256x64xf32>
    %cst_169 = arith.constant dense<0.000000e+00> : vector<256x128xf32>
    %162 = tpu.matmul %161, %159, %cst_169 {dimension_numbers = #tpu.dot_dimension_numbers<[1], [0], [0], [1], [0, 0, 1, 1], [], []>} : vector<256x64xf32>, vector<64x128xf32>, vector<256x128xf32> -> vector<256x128xf32>
    %163 = arith.addf %156, %162 : vector<256x128xf32>
    %c2_170 = arith.constant 2 : index
    %c0_171 = arith.constant 0 : index
    %c0_172 = arith.constant 0 : index
    %164 = vector.load %arg11[%c2_170, %c0_171, %c0_172] : memref<9x32x128xf32, #tpu.memory_space<vmem>>, vector<1x32x128xf32>
    %165 = vector.shape_cast %164 : vector<1x32x128xf32> to vector<32x128xf32>
    %cst_173 = arith.constant dense<0.000000e+00> : vector<64x128xf32>
    %166 = tpu.matmul %145, %165, %cst_173 {dimension_numbers = #tpu.dot_dimension_numbers<[1], [0], [0], [1], [0, 0, 1, 1], [], []>} : vector<64x32xf32>, vector<32x128xf32>, vector<64x128xf32> -> vector<64x128xf32>
    %c2_174 = arith.constant 2 : index
    %c0_175 = arith.constant 0 : index
    %c0_176 = arith.constant 0 : index
    %167 = vector.load %arg10[%c2_174, %c0_175, %c0_176] : memref<9x256x64xf32, #tpu.memory_space<vmem>>, vector<1x256x64xf32>
    %168 = vector.shape_cast %167 : vector<1x256x64xf32> to vector<256x64xf32>
    %cst_177 = arith.constant dense<0.000000e+00> : vector<256x128xf32>
    %169 = tpu.matmul %168, %166, %cst_177 {dimension_numbers = #tpu.dot_dimension_numbers<[1], [0], [0], [1], [0, 0, 1, 1], [], []>} : vector<256x64xf32>, vector<64x128xf32>, vector<256x128xf32> -> vector<256x128xf32>
    %170 = arith.addf %163, %169 : vector<256x128xf32>
    %c3_178 = arith.constant 3 : index
    %c0_179 = arith.constant 0 : index
    %c0_180 = arith.constant 0 : index
    %171 = vector.load %arg11[%c3_178, %c0_179, %c0_180] : memref<9x32x128xf32, #tpu.memory_space<vmem>>, vector<1x32x128xf32>
    %172 = vector.shape_cast %171 : vector<1x32x128xf32> to vector<32x128xf32>
    %cst_181 = arith.constant dense<0.000000e+00> : vector<64x128xf32>
    %173 = tpu.matmul %145, %172, %cst_181 {dimension_numbers = #tpu.dot_dimension_numbers<[1], [0], [0], [1], [0, 0, 1, 1], [], []>} : vector<64x32xf32>, vector<32x128xf32>, vector<64x128xf32> -> vector<64x128xf32>
    %c3_182 = arith.constant 3 : index
    %c0_183 = arith.constant 0 : index
    %c0_184 = arith.constant 0 : index
    %174 = vector.load %arg10[%c3_182, %c0_183, %c0_184] : memref<9x256x64xf32, #tpu.memory_space<vmem>>, vector<1x256x64xf32>
    %175 = vector.shape_cast %174 : vector<1x256x64xf32> to vector<256x64xf32>
    %cst_185 = arith.constant dense<0.000000e+00> : vector<256x128xf32>
    %176 = tpu.matmul %175, %173, %cst_185 {dimension_numbers = #tpu.dot_dimension_numbers<[1], [0], [0], [1], [0, 0, 1, 1], [], []>} : vector<256x64xf32>, vector<64x128xf32>, vector<256x128xf32> -> vector<256x128xf32>
    %177 = arith.addf %170, %176 : vector<256x128xf32>
    %c4_186 = arith.constant 4 : index
    %c0_187 = arith.constant 0 : index
    %c0_188 = arith.constant 0 : index
    %178 = vector.load %arg11[%c4_186, %c0_187, %c0_188] : memref<9x32x128xf32, #tpu.memory_space<vmem>>, vector<1x32x128xf32>
    %179 = vector.shape_cast %178 : vector<1x32x128xf32> to vector<32x128xf32>
    %cst_189 = arith.constant dense<0.000000e+00> : vector<64x128xf32>
    %180 = tpu.matmul %145, %179, %cst_189 {dimension_numbers = #tpu.dot_dimension_numbers<[1], [0], [0], [1], [0, 0, 1, 1], [], []>} : vector<64x32xf32>, vector<32x128xf32>, vector<64x128xf32> -> vector<64x128xf32>
    %c4_190 = arith.constant 4 : index
    %c0_191 = arith.constant 0 : index
    %c0_192 = arith.constant 0 : index
    %181 = vector.load %arg10[%c4_190, %c0_191, %c0_192] : memref<9x256x64xf32, #tpu.memory_space<vmem>>, vector<1x256x64xf32>
    %182 = vector.shape_cast %181 : vector<1x256x64xf32> to vector<256x64xf32>
    %cst_193 = arith.constant dense<0.000000e+00> : vector<256x128xf32>
    %183 = tpu.matmul %182, %180, %cst_193 {dimension_numbers = #tpu.dot_dimension_numbers<[1], [0], [0], [1], [0, 0, 1, 1], [], []>} : vector<256x64xf32>, vector<64x128xf32>, vector<256x128xf32> -> vector<256x128xf32>
    %184 = arith.addf %177, %183 : vector<256x128xf32>
    %c5_194 = arith.constant 5 : index
    %c0_195 = arith.constant 0 : index
    %c0_196 = arith.constant 0 : index
    %185 = vector.load %arg11[%c5_194, %c0_195, %c0_196] : memref<9x32x128xf32, #tpu.memory_space<vmem>>, vector<1x32x128xf32>
    %186 = vector.shape_cast %185 : vector<1x32x128xf32> to vector<32x128xf32>
    %cst_197 = arith.constant dense<0.000000e+00> : vector<64x128xf32>
    %187 = tpu.matmul %145, %186, %cst_197 {dimension_numbers = #tpu.dot_dimension_numbers<[1], [0], [0], [1], [0, 0, 1, 1], [], []>} : vector<64x32xf32>, vector<32x128xf32>, vector<64x128xf32> -> vector<64x128xf32>
    %c5_198 = arith.constant 5 : index
    %c0_199 = arith.constant 0 : index
    %c0_200 = arith.constant 0 : index
    %188 = vector.load %arg10[%c5_198, %c0_199, %c0_200] : memref<9x256x64xf32, #tpu.memory_space<vmem>>, vector<1x256x64xf32>
    %189 = vector.shape_cast %188 : vector<1x256x64xf32> to vector<256x64xf32>
    %cst_201 = arith.constant dense<0.000000e+00> : vector<256x128xf32>
    %190 = tpu.matmul %189, %187, %cst_201 {dimension_numbers = #tpu.dot_dimension_numbers<[1], [0], [0], [1], [0, 0, 1, 1], [], []>} : vector<256x64xf32>, vector<64x128xf32>, vector<256x128xf32> -> vector<256x128xf32>
    %191 = arith.addf %184, %190 : vector<256x128xf32>
    %c6_202 = arith.constant 6 : index
    %c0_203 = arith.constant 0 : index
    %c0_204 = arith.constant 0 : index
    %192 = vector.load %arg11[%c6_202, %c0_203, %c0_204] : memref<9x32x128xf32, #tpu.memory_space<vmem>>, vector<1x32x128xf32>
    %193 = vector.shape_cast %192 : vector<1x32x128xf32> to vector<32x128xf32>
    %cst_205 = arith.constant dense<0.000000e+00> : vector<64x128xf32>
    %194 = tpu.matmul %145, %193, %cst_205 {dimension_numbers = #tpu.dot_dimension_numbers<[1], [0], [0], [1], [0, 0, 1, 1], [], []>} : vector<64x32xf32>, vector<32x128xf32>, vector<64x128xf32> -> vector<64x128xf32>
    %c6_206 = arith.constant 6 : index
    %c0_207 = arith.constant 0 : index
    %c0_208 = arith.constant 0 : index
    %195 = vector.load %arg10[%c6_206, %c0_207, %c0_208] : memref<9x256x64xf32, #tpu.memory_space<vmem>>, vector<1x256x64xf32>
    %196 = vector.shape_cast %195 : vector<1x256x64xf32> to vector<256x64xf32>
    %cst_209 = arith.constant dense<0.000000e+00> : vector<256x128xf32>
    %197 = tpu.matmul %196, %194, %cst_209 {dimension_numbers = #tpu.dot_dimension_numbers<[1], [0], [0], [1], [0, 0, 1, 1], [], []>} : vector<256x64xf32>, vector<64x128xf32>, vector<256x128xf32> -> vector<256x128xf32>
    %198 = arith.addf %191, %197 : vector<256x128xf32>
    %c7_210 = arith.constant 7 : index
    %c0_211 = arith.constant 0 : index
    %c0_212 = arith.constant 0 : index
    %199 = vector.load %arg11[%c7_210, %c0_211, %c0_212] : memref<9x32x128xf32, #tpu.memory_space<vmem>>, vector<1x32x128xf32>
    %200 = vector.shape_cast %199 : vector<1x32x128xf32> to vector<32x128xf32>
    %cst_213 = arith.constant dense<0.000000e+00> : vector<64x128xf32>
    %201 = tpu.matmul %145, %200, %cst_213 {dimension_numbers = #tpu.dot_dimension_numbers<[1], [0], [0], [1], [0, 0, 1, 1], [], []>} : vector<64x32xf32>, vector<32x128xf32>, vector<64x128xf32> -> vector<64x128xf32>
    %c7_214 = arith.constant 7 : index
    %c0_215 = arith.constant 0 : index
    %c0_216 = arith.constant 0 : index
    %202 = vector.load %arg10[%c7_214, %c0_215, %c0_216] : memref<9x256x64xf32, #tpu.memory_space<vmem>>, vector<1x256x64xf32>
    %203 = vector.shape_cast %202 : vector<1x256x64xf32> to vector<256x64xf32>
    %cst_217 = arith.constant dense<0.000000e+00> : vector<256x128xf32>
    %204 = tpu.matmul %203, %201, %cst_217 {dimension_numbers = #tpu.dot_dimension_numbers<[1], [0], [0], [1], [0, 0, 1, 1], [], []>} : vector<256x64xf32>, vector<64x128xf32>, vector<256x128xf32> -> vector<256x128xf32>
    %205 = arith.addf %198, %204 : vector<256x128xf32>
    %c8_218 = arith.constant 8 : index
    %c0_219 = arith.constant 0 : index
    %c0_220 = arith.constant 0 : index
    %206 = vector.load %arg11[%c8_218, %c0_219, %c0_220] : memref<9x32x128xf32, #tpu.memory_space<vmem>>, vector<1x32x128xf32>
    %207 = vector.shape_cast %206 : vector<1x32x128xf32> to vector<32x128xf32>
    %cst_221 = arith.constant dense<0.000000e+00> : vector<64x128xf32>
    %208 = tpu.matmul %145, %207, %cst_221 {dimension_numbers = #tpu.dot_dimension_numbers<[1], [0], [0], [1], [0, 0, 1, 1], [], []>} : vector<64x32xf32>, vector<32x128xf32>, vector<64x128xf32> -> vector<64x128xf32>
    %c8_222 = arith.constant 8 : index
    %c0_223 = arith.constant 0 : index
    %c0_224 = arith.constant 0 : index
    %209 = vector.load %arg10[%c8_222, %c0_223, %c0_224] : memref<9x256x64xf32, #tpu.memory_space<vmem>>, vector<1x256x64xf32>
    %210 = vector.shape_cast %209 : vector<1x256x64xf32> to vector<256x64xf32>
    %cst_225 = arith.constant dense<0.000000e+00> : vector<256x128xf32>
    %211 = tpu.matmul %210, %208, %cst_225 {dimension_numbers = #tpu.dot_dimension_numbers<[1], [0], [0], [1], [0, 0, 1, 1], [], []>} : vector<256x64xf32>, vector<64x128xf32>, vector<256x128xf32> -> vector<256x128xf32>
    %212 = arith.addf %205, %211 : vector<256x128xf32>
    %213 = tpu.transpose %212, [1, 0] : vector<256x128xf32> -> vector<128x256xf32>
    %214 = vector.extract_strided_slice %213 {offsets = [0, 0], sizes = [3, 256], strides = [1, 1]} : vector<128x256xf32> to vector<3x256xf32>
    %215 = arith.negf %214 : vector<3x256xf32>
    %216 = math.exp %215 : vector<3x256xf32>
    %cst_226 = arith.constant 1.000000e+00 : f32
    %217 = vector.broadcast %cst_226 : f32 to vector<3x256xf32>
    %218 = arith.addf %217, %216 : vector<3x256xf32>
    %219 = arith.divf %217, %218 : vector<3x256xf32>
    %c0_227 = arith.constant 0 : index
    %c0_228 = arith.constant 0 : index
    %c0_229 = arith.constant 0 : index
    %220 = vector.load %arg13[%c0_227, %c0_228, %c0_229] : memref<1x3x256xf32, #tpu.memory_space<vmem>>, vector<1x3x256xf32>
    %221 = vector.shape_cast %220 : vector<1x3x256xf32> to vector<3x256xf32>
    %222 = vector.shape_cast %219 : vector<3x256xf32> to vector<1x3x256xf32>
    tpu.vector_store %arg13[%c0_227, %c0_228, %c0_229], %222 {strides = array<i32>} : memref<1x3x256xf32, #tpu.memory_space<vmem>>, vector<1x3x256xf32>,
    return
  }
  func.func @transform_0(%arg0: i32) -> (i32, i32, i32) {
    %c0_i32 = arith.constant 0 : i32
    %c0_i32_0 = arith.constant 0 : i32
    %c0_i32_1 = arith.constant 0 : i32
    return %arg0, %c0_i32, %c0_i32_0 : i32, i32, i32
  }
  func.func @transform_1(%arg0: i32) -> (i32, i32) {
    %c0_i32 = arith.constant 0 : i32
    %c0_i32_0 = arith.constant 0 : i32
    %c0_i32_1 = arith.constant 0 : i32
    return %c0_i32, %c0_i32_0 : i32, i32
  }
  func.func @transform_2(%arg0: i32) -> (i32, i32) {
    %c0_i32 = arith.constant 0 : i32
    %c0_i32_0 = arith.constant 0 : i32
    %c0_i32_1 = arith.constant 0 : i32
    return %c0_i32, %c0_i32_0 : i32, i32
  }
  func.func @transform_3(%arg0: i32) -> (i32, i32, i32) {
    %c0_i32 = arith.constant 0 : i32
    %c0_i32_0 = arith.constant 0 : i32
    %c0_i32_1 = arith.constant 0 : i32
    %c0_i32_2 = arith.constant 0 : i32
    return %c0_i32, %c0_i32_0, %c0_i32_1 : i32, i32, i32
  }
  func.func @transform_4(%arg0: i32) -> (i32, i32, i32) {
    %c0_i32 = arith.constant 0 : i32
    %c0_i32_0 = arith.constant 0 : i32
    %c0_i32_1 = arith.constant 0 : i32
    %c0_i32_2 = arith.constant 0 : i32
    return %c0_i32, %c0_i32_0, %c0_i32_1 : i32, i32, i32
  }
  func.func @transform_5(%arg0: i32) -> (i32, i32) {
    %c0_i32 = arith.constant 0 : i32
    %c0_i32_0 = arith.constant 0 : i32
    %c0_i32_1 = arith.constant 0 : i32
    return %c0_i32, %c0_i32_0 : i32, i32
  }
  func.func @transform_6(%arg0: i32) -> (i32, i32, i32) {
    %c0_i32 = arith.constant 0 : i32
    %c0_i32_0 = arith.constant 0 : i32
    %c0_i32_1 = arith.constant 0 : i32
    %c0_i32_2 = arith.constant 0 : i32
    return %c0_i32, %c0_i32_0, %c0_i32_1 : i32, i32, i32
  }
  func.func @transform_7(%arg0: i32) -> (i32, i32, i32) {
    %c0_i32 = arith.constant 0 : i32
    %c0_i32_0 = arith.constant 0 : i32
    %c0_i32_1 = arith.constant 0 : i32
    %c0_i32_2 = arith.constant 0 : i32
    return %c0_i32, %c0_i32_0, %c0_i32_1 : i32, i32, i32
  }
  func.func @transform_8(%arg0: i32) -> (i32, i32) {
    %c0_i32 = arith.constant 0 : i32
    %c0_i32_0 = arith.constant 0 : i32
    %c0_i32_1 = arith.constant 0 : i32
    return %c0_i32, %c0_i32_0 : i32, i32
  }
  func.func @transform_9(%arg0: i32) -> (i32, i32, i32) {
    %c0_i32 = arith.constant 0 : i32
    %c0_i32_0 = arith.constant 0 : i32
    %c0_i32_1 = arith.constant 0 : i32
    %c0_i32_2 = arith.constant 0 : i32
    return %c0_i32, %c0_i32_0, %c0_i32_1 : i32, i32, i32
  }
  func.func @transform_10(%arg0: i32) -> (i32, i32, i32) {
    %c0_i32 = arith.constant 0 : i32
    %c0_i32_0 = arith.constant 0 : i32
    %c0_i32_1 = arith.constant 0 : i32
    %c0_i32_2 = arith.constant 0 : i32
    return %c0_i32, %c0_i32_0, %c0_i32_1 : i32, i32, i32
  }
  func.func @transform_11(%arg0: i32) -> (i32, i32) {
    %c0_i32 = arith.constant 0 : i32
    %c0_i32_0 = arith.constant 0 : i32
    %c0_i32_1 = arith.constant 0 : i32
    return %c0_i32, %c0_i32_0 : i32, i32
  }
  func.func @transform_12(%arg0: i32) -> (i32, i32, i32) {
    %c0_i32 = arith.constant 0 : i32
    %c0_i32_0 = arith.constant 0 : i32
    %c0_i32_1 = arith.constant 0 : i32
    return %arg0, %c0_i32, %c0_i32_0 : i32, i32, i32
  }
}

</mosaic_0001>

<bundles_post_ra>
// kernel: var_decoder_forward.1
= control target key start
LH: loop header
LB: loop body
LE: loop exit
PB: predicated region body
PF: predicated region fallthrough
CT: control target
= control target key end

     0   :  { %s13642_s21 = smov 0   ;;  %s16609_s0 = inlined_call_operand.vmem [shape: f32[2,16,512], index: 0, kind: input, shape index: {}]   ;;  %s16610_s1 = inlined_call_operand.vmem [shape: f32[512,128], index: 1, kind: input, shape index: {}]   ;;  %s16611_s2 = inlined_call_operand.vmem [shape: f32[16,128], index: 2, kind: input, shape index: {}]   ;;  %s16612_s3 = inlined_call_operand.vmem [shape: f32[9,16,16], index: 3, kind: input, shape index: {}]   ;;  %s16613_s4 = inlined_call_operand.vmem [shape: f32[9,128,64], index: 4, kind: input, shape index: {}]   ;;  %s16614_s5 = inlined_call_operand.vmem [shape: f32[1,64], index: 5, kind: input, shape index: {}]   ;;  %s16615_s6 = inlined_call_operand.vmem [shape: f32[9,64,16], index: 6, kind: input, shape index: {}]   ;;  %s16616_s7 = inlined_call_operand.vmem [shape: f32[9,64,32], index: 7, kind: input, shape index: {}]   ;;  %s16617_s8 = inlined_call_operand.vmem [shape: f32[1,32], index: 8, kind: input, shape index: {}]   ;;  %s16618_s9 = inlined_call_operand.vmem [shape: f32[9,256,64], index: 9, kind: input, shape index: {}]   ;;  %s16619_s10 = inlined_call_operand.vmem [shape: f32[9,32,128], index: 10, kind: input, shape index: {}]   ;;  %s16620_s11 = inlined_call_operand.vmem [shape: f32[1,128], index: 11, kind: input, shape index: {}]   ;;  %s16621_s12 = inlined_call_operand.vmem [shape: f32[2,3,256], index: 12, kind: output, shape index: {}]  }
   0x1 LB: > { %s8973_s22 = sadd.s32 4294967295, %s13575_s21   ;;  %p8977_p0 = scmp.ge.s32.totalorder %s13575_s21, 1  ;;  %s13575_s21 = sphi %s13642_s21, %s22_s21  }
   0x2   : > { %p362_p1 = scmp.lt.s32.totalorder %s13575_s21, 3 }
   0x4   : > { %p363_p2 = pnand %p8977_p0, %p362_p1 }
   0x5   : > { %v438_v0 = vld [vmem:[%s16610_s1 + $0x80] sm:$0xff] (!%p363_p2)  ;;  %v439_v1 = vld [vmem:[%s16610_s1 + $0x88] sm:$0xff] (!%p363_p2)  ;;  %v440_v11 = vld [vmem:[%s16610_s1 + $0x90] sm:$0xff] (!%p363_p2)  ;;  %p13724_p3 = scmp.lt.s32.totalorder (!%p363_p2), %s8973_s22, 1  ;;  %vm741_vm0 = vcmask (!%p363_p2), 130048   ;;  %vm2267_vm1 = vcmask (!%p363_p2), 523264  }
   0x6   : > { %366 = sbr.rel (%p363_p2) target bundleno = 4363 (0x110b), region = 68  ;;  %v422_v2 = vld [vmem:[%s16610_s1] sm:$0xff] (!%p363_p2)  ;;  %v12390_v3 = vpack.c.bf16 (!%p363_p2), %v439_v1, %v438_v0  ;;  %v423_v4 = vld [vmem:[%s16610_s1 + $0x8] sm:$0xff] (!%p363_p2)  ;;  %v441_v13 = vld [vmem:[%s16610_s1 + $0x98] sm:$0xff] (!%p363_p2)  ;;  %vm4354_vm2 = vcmask (!%p363_p2), 261120  }
   0x7   : > { %v470_v5 = vld [vmem:[%s16610_s1 + $0x180] sm:$0xff] (!%p363_p2)  ;;  %v471_v6 = vld [vmem:[%s16610_s1 + $0x188] sm:$0xff] (!%p363_p2)  ;;  %v12392_v7 = vpack.c.bf16 (!%p363_p2), %v423_v4, %v422_v2  ;;  %v424_v14 = vld [vmem:[%s16610_s1 + $0x10] sm:$0xff] (!%p363_p2)  ;;  %v12394_v16 = vpack.c.bf16 (!%p363_p2), %v441_v13, %v440_v11 }
   0x8   : > { %v12422_v8 = vpack.c.bf16 (!%p363_p2), %v471_v6, %v470_v5  ;;  %v454_v9 = vld [vmem:[%s16610_s1 + $0x100] sm:$0xff] (!%p363_p2)  ;;  %v455_v10 = vld [vmem:[%s16610_s1 + $0x108] sm:$0xff] (!%p363_p2)  ;;  %12391 = vmatprep.subr.bf16.mxu0 (!%p363_p2), %v12390_v3  ;;  %v425_v15 = vld [vmem:[%s16610_s1 + $0x18] sm:$0xff] (!%p363_p2) }
   0x9   : > { %v12424_v12 = vpack.c.bf16 (!%p363_p2), %v455_v10, %v454_v9  ;;  %12393 = vmatpush3.bf16.msra.mxu0 (!%p363_p2), %v12392_v7  ;;  %v12396_v17 = vpack.c.bf16 (!%p363_p2), %v425_v15, %v424_v14  ;;  %v472_v18 = vld [vmem:[%s16610_s1 + $0x190] sm:$0xff] (!%p363_p2)  ;;  %v473_v19 = vld [vmem:[%s16610_s1 + $0x198] sm:$0xff] (!%p363_p2)  ;;  %v442_v23 = vld [vmem:[%s16610_s1 + $0xa0] sm:$0xff] (!%p363_p2) }
   0xa   : > { %12423 = vmatprep.subr.bf16.mxu1 (!%p363_p2), %v12422_v8  ;;  %v456_v20 = vld [vmem:[%s16610_s1 + $0x110] sm:$0xff] (!%p363_p2)  ;;  %v12426_v21 = vpack.c.bf16 (!%p363_p2), %v473_v19, %v472_v18  ;;  %v457_v22 = vld [vmem:[%s16610_s1 + $0x118] sm:$0xff] (!%p363_p2)  ;;  %v443_v24 = vld [vmem:[%s16610_s1 + $0xa8] sm:$0xff] (!%p363_p2)  ;;  %12395 = vmatprep.subr.bf16.mxu0 (!%p363_p2), %v12394_v16 }
   0xb   : > { %12425 = vmatpush3.bf16.msra.mxu1 (!%p363_p2), %v12424_v12  ;;  %v12428_v25 = vpack.c.bf16 (!%p363_p2), %v457_v22, %v456_v20  ;;  %v12398_v26 = vpack.c.bf16 (!%p363_p2), %v443_v24, %v442_v23  ;;  %v426_v27 = vld [vmem:[%s16610_s1 + $0x20] sm:$0xff] (!%p363_p2)  ;;  %v427_v28 = vld [vmem:[%s16610_s1 + $0x28] sm:$0xff] (!%p363_p2)  ;;  %v444_v35 = vld [vmem:[%s16610_s1 + $0xb0] sm:$0xff] (!%p363_p2) }
   0xc   : > { %v474_v29 = vld [vmem:[%s16610_s1 + $0x1a0] sm:$0xff] (!%p363_p2)  ;;  %12427 = vmatprep.subr.bf16.mxu1 (!%p363_p2), %v12426_v21  ;;  %v475_v30 = vld [vmem:[%s16610_s1 + $0x1a8] sm:$0xff] (!%p363_p2)  ;;  %v12400_v33 = vpack.c.bf16 (!%p363_p2), %v427_v28, %v426_v27  ;;  %v445_v36 = vld [vmem:[%s16610_s1 + $0xb8] sm:$0xff] (!%p363_p2) }
   0xd   : > { %v458_v31 = vld [vmem:[%s16610_s1 + $0x120] sm:$0xff]  ;;  %v459_v32 = vld [vmem:[%s16610_s1 + $0x128] sm:$0xff]  ;;  %12397 = vmatpush3.bf16.msra.mxu0 %v12396_v17  ;;  %v12430_v34 = vpack.c.bf16 %v475_v30, %v474_v29  ;;  %v428_v37 = vld [vmem:[%s16610_s1 + $0x30] sm:$0xff]  ;;  %v12402_v39 = vpack.c.bf16 %v445_v36, %v444_v35  ;;  %s16624_s22 = smov (!%p13724_p3, %s8973_s22), 1 }
   0xe   : > { %12399 = vmatprep.subr.bf16.mxu0 %v12398_v26  ;;  %v12432_v38 = vpack.c.bf16 %v459_v32, %v458_v31  ;;  %v429_v40 = vld [vmem:[%s16610_s1 + $0x38] sm:$0xff]  ;;  %v476_v41 = vld [vmem:[%s16610_s1 + $0x1b0] sm:$0xff]  ;;  %v446_v46 = vld [vmem:[%s16610_s1 + $0xc0] sm:$0xff]  ;;  %s10017_s15 = sshll.u32 %s16624_s22, 6  ;;  %s10018_s25 = sshll.u32 %s16624_s22, 3 }
   0xf   : > { %12429 = vmatpush3.bf16.msra.mxu1 %v12428_v25  ;;  %v477_v42 = vld [vmem:[%s16610_s1 + $0x1b8] sm:$0xff]  ;;  %v460_v44 = vld [vmem:[%s16610_s1 + $0x130] sm:$0xff]  ;;  %v447_v47 = vld [vmem:[%s16610_s1 + $0xc8] sm:$0xff]  ;;  %v12404_v48 = vpack.c.bf16 %v429_v40, %v428_v37  ;;  %s13816_s14 = scalar_lea.vmem %s16609_s0, %s10017_s15  ;;  %s413_s27 = scalar_lea.vmem %s16621_s12, %s10018_s25 }
  0x10   : > { %12431 = vmatprep.subr.bf16.mxu1 %v12430_v34  ;;  %v12434_v43 = vpack.c.bf16 %v477_v42, %v476_v41  ;;  %v461_v45 = vld [vmem:[%s16610_s1 + $0x138] sm:$0xff]  ;;  %v478_v49 = vld [vmem:[%s16610_s1 + $0x1c0] sm:$0xff]  ;;  %v479_v50 = vld [vmem:[%s16610_s1 + $0x1c8] sm:$0xff]  ;;  %v12406_v52 = vpack.c.bf16 %v447_v47, %v446_v46 }
  0x11   : > { %12401 = vmatpush3.bf16.msra.mxu0 %v12400_v33  ;;  %v12436_v51 = vpack.c.bf16 %v461_v45, %v460_v44  ;;  %v430_v53 = vld [vmem:[%s16610_s1 + $0x40] sm:$0xff]  ;;  %v431_v54 = vld [vmem:[%s16610_s1 + $0x48] sm:$0xff]  ;;  %v12438_v56 = vpack.c.bf16 %v479_v50, %v478_v49  ;;  %v448_v58 = vld [vmem:[%s16610_s1 + $0xd0] sm:$0xff] }
  0x12   : > { %12403 = vmatprep.subr.bf16.mxu0 %v12402_v39  ;;  %v462_v55 = vld [vmem:[%s16610_s1 + $0x140] sm:$0xff]  ;;  %v463_v57 = vld [vmem:[%s16610_s1 + $0x148] sm:$0xff]  ;;  %v449_v59 = vld [vmem:[%s16610_s1 + $0xd8] sm:$0xff]  ;;  %v12408_v62 = vpack.c.bf16 %v431_v54, %v430_v53 }
  0x13   : > { %12433 = vmatpush3.bf16.msra.mxu1 %v12432_v38  ;;  %v480_v60 = vld [vmem:[%s16610_s1 + $0x1d0] sm:$0xff]  ;;  %v481_v61 = vld [vmem:[%s16610_s1 + $0x1d8] sm:$0xff]  ;;  %v12440_v63 = vpack.c.bf16 %v463_v57, %v462_v55  ;;  %v12410_v0 = vpack.c.bf16 %v449_v59, %v448_v58  ;;  %v450_v6 = vld [vmem:[%s16610_s1 + $0xe0] sm:$0xff] }
  0x14   : > { %12435 = vmatprep.subr.bf16.mxu1 %v12434_v43  ;;  %v432_v1 = vld [vmem:[%s16610_s1 + $0x50] sm:$0xff]  ;;  %v433_v2 = vld [vmem:[%s16610_s1 + $0x58] sm:$0xff]  ;;  %v12442_v4 = vpack.c.bf16 %v481_v61, %v480_v60  ;;  %v451_v7 = vld [vmem:[%s16610_s1 + $0xe8] sm:$0xff] }
  0x15   : > { %12405 = vmatpush3.bf16.msra.mxu0 %v12404_v48  ;;  %v464_v3 = vld [vmem:[%s16610_s1 + $0x150] sm:$0xff]  ;;  %v465_v5 = vld [vmem:[%s16610_s1 + $0x158] sm:$0xff]  ;;  %v482_v8 = vld [vmem:[%s16610_s1 + $0x1e0] sm:$0xff]  ;;  %v12412_v10 = vpack.c.bf16 %v433_v2, %v432_v1  ;;  %v12414_v14 = vpack.c.bf16 %v451_v7, %v450_v6 }
  0x16   : > { %12407 = vmatprep.subr.bf16.mxu0 %v12406_v52  ;;  %v483_v9 = vld [vmem:[%s16610_s1 + $0x1e8] sm:$0xff]  ;;  %v434_v11 = vld [vmem:[%s16610_s1 + $0x60] sm:$0xff]  ;;  %v12444_v13 = vpack.c.bf16 %v465_v5, %v464_v3  ;;  %v452_v19 = vld [vmem:[%s16610_s1 + $0xf0] sm:$0xff] }
  0x17   : > { %12437 = vmatpush3.bf16.msra.mxu1 %v12436_v51  ;;  %v435_v12 = vld [vmem:[%s16610_s1 + $0x68] sm:$0xff]  ;;  %v466_v15 = vld [vmem:[%s16610_s1 + $0x160] sm:$0xff]  ;;  %v12446_v18 = vpack.c.bf16 %v483_v9, %v482_v8  ;;  %v453_v20 = vld [vmem:[%s16610_s1 + $0xf8] sm:$0xff] }
  0x18   : > { %12439 = vmatprep.subr.bf16.mxu1 %v12438_v56  ;;  %v467_v16 = vld [vmem:[%s16610_s1 + $0x168] sm:$0xff]  ;;  %v417_v21 = vld [vmem:[%s13816_s14 + $0x18] sm:$0xff]  ;;  %v484_v22 = vld [vmem:[%s16610_s1 + $0x1f0] sm:$0xff]  ;;  %v12416_v24 = vpack.c.bf16 %v435_v12, %v434_v11  ;;  %v12418_v26 = vpack.c.bf16 %v453_v20, %v452_v19 }
  0x19   : > { %12409 = vmatpush3.bf16.msra.mxu0 %v12408_v62  ;;  %v415_v17 = vld [vmem:[%s13816_s14 + $0x8] sm:$0xff]  ;;  %v485_v23 = vld [vmem:[%s16610_s1 + $0x1f8] sm:$0xff]  ;;  %627 = vmatprep.mubr.f32.mxu1 %v417_v21  ;;  %v12448_v25 = vpack.c.bf16 %v467_v16, %v466_v15  ;;  %v436_v27 = vld [vmem:[%s16610_s1 + $0x70] sm:$0xff] }
  0x1a   : > { %12411 = vmatprep.subr.bf16.mxu0 %v12410_v0  ;;  %552 = vmatprep.mubr.f32.mxu0 %v415_v17  ;;  %v437_v28 = vld [vmem:[%s16610_s1 + $0x78] sm:$0xff]  ;;  %v468_v29 = vld [vmem:[%s16610_s1 + $0x170] sm:$0xff]  ;;  %v12450_v30 = vpack.c.bf16 %v485_v23, %v484_v22  ;;  %v9005_v32 = vld [vmem:[%s16613_s4 + $0x100] sm:$0xff] }
  0x1b   : > { %12441 = vmatpush3.bf16.msra.mxu1 %v12440_v63  ;;  %v469_v31 = vld [vmem:[%s16610_s1 + $0x178] sm:$0xff]  ;;  %v9006_v33 = vld [vmem:[%s16613_s4 + $0x108] sm:$0xff]  ;;  %v648_v34 = vld [vmem:[%s16613_s4] sm:$0xff]  ;;  %v12420_v36 = vpack.c.bf16 %v437_v28, %v436_v27 }
  0x1c   : > { %12443 = vmatprep.subr.bf16.mxu1 %v12442_v4  ;;  %v649_v35 = vld [vmem:[%s16613_s4 + $0x8] sm:$0xff]  ;;  %v12452_v37 = vpack.c.bf16 %v469_v31, %v468_v29  ;;  %v12526_v38 = vpack.c.bf16 %v9006_v33, %v9005_v32  ;;  %v9007_v40 = vld [vmem:[%s16613_s4 + $0x110] sm:$0xff]  ;;  %v9008_v41 = vld [vmem:[%s16613_s4 + $0x118] sm:$0xff] }
  0x1d   : > { %12413 = vmatpush3.bf16.msra.mxu0 %v12412_v10  ;;  %v12454_v39 = vpack.c.bf16 %v649_v35, %v648_v34  ;;  %v414_v42 = vld [vmem:[%s13816_s14] sm:$0xff]  ;;  %v650_v43 = vld [vmem:[%s16613_s4 + $0x10] sm:$0xff]  ;;  %v651_v44 = vld [vmem:[%s16613_s4 + $0x18] sm:$0xff]  ;;  %v12530_v48 = vpack.c.bf16 %v9008_v41, %v9007_v40 }
  0x1e   : > { %12415 = vmatprep.subr.bf16.mxu0 %v12414_v14  ;;  %v416_v45 = vld [vmem:[%s13816_s14 + $0x10] sm:$0xff]  ;;  %v419_v46 = vld [vmem:[%s13816_s14 + $0x28] sm:$0xff]  ;;  %v421_v47 = vld [vmem:[%s13816_s14 + $0x38] sm:$0xff]  ;;  %v12458_v49 = vpack.c.bf16 %v651_v44, %v650_v43 }
  0x1f   : > { %12445 = vmatpush3.bf16.msra.mxu1 %v12444_v13  ;;  %v9009_v50 = vld [vmem:[%s16613_s4 + $0x120] sm:$0xff]  ;;  %v9010_v51 = vld [vmem:[%s16613_s4 + $0x128] sm:$0xff]  ;;  %v420_v55 = vld [vmem:[%s13816_s14 + $0x30] sm:$0xff] }
  0x20   : > { %12447 = vmatprep.subr.bf16.mxu1 %v12446_v18  ;;  %v418_v52 = vld [vmem:[%s13816_s14 + $0x20] sm:$0xff]  ;;  %v653_v54 = vld [vmem:[%s16613_s4 + $0x28] sm:$0xff]  ;;  %v12534_v56 = vpack.c.bf16 %v9010_v51, %v9009_v50  ;;  %v9011_v58 = vld [vmem:[%s16613_s4 + $0x130] sm:$0xff] }
  0x21   : > { %12417 = vmatpush3.bf16.msra.mxu0 %v12416_v24  ;;  %v652_v53 = vld [vmem:[%s16613_s4 + $0x20] sm:$0xff]  ;;  %v9012_v59 = vld [vmem:[%s16613_s4 + $0x138] sm:$0xff]  ;;  %v654_v60 = vld [vmem:[%s16613_s4 + $0x30] sm:$0xff] }
  0x22   : > { %12419 = vmatprep.subr.bf16.mxu0 %v12418_v26  ;;  %v12462_v57 = vpack.c.bf16 %v653_v54, %v652_v53  ;;  %v655_v61 = vld [vmem:[%s16613_s4 + $0x38] sm:$0xff]  ;;  %v12538_v62 = vpack.c.bf16 %v9012_v59, %v9011_v58  ;;  %v9013_v0 = vld [vmem:[%s16613_s4 + $0x140] sm:$0xff]  ;;  %v9014_v1 = vld [vmem:[%s16613_s4 + $0x148] sm:$0xff] }
  0x23   : > { %12449 = vmatpush3.bf16.msra.mxu1 %v12448_v25  ;;  %v12466_v63 = vpack.c.bf16 %v655_v61, %v654_v60  ;;  %v656_v2 = vld [vmem:[%s16613_s4 + $0x40] sm:$0xff]  ;;  %v657_v3 = vld [vmem:[%s16613_s4 + $0x48] sm:$0xff]  ;;  %v12542_v4 = vpack.c.bf16 %v9014_v1, %v9013_v0  ;;  %v9015_v6 = vld [vmem:[%s16613_s4 + $0x150] sm:$0xff] }
  0x24   : > { %12451 = vmatprep.subr.bf16.mxu1 %v12450_v30  ;;  %v12470_v5 = vpack.c.bf16 %v657_v3, %v656_v2  ;;  %v9016_v7 = vld [vmem:[%s16613_s4 + $0x158] sm:$0xff]  ;;  %v658_v9 = vld [vmem:[%s16613_s4 + $0x50] sm:$0xff]  ;;  %v9017_v12 = vld [vmem:[%s16613_s4 + $0x160] sm:$0xff] }
  0x25   : > { %12421 = vmatpush3.bf16.msra.mxu0 %v12420_v36  ;;  %v12546_v8 = vpack.c.bf16 %v9016_v7, %v9015_v6  ;;  %v659_v10 = vld [vmem:[%s16613_s4 + $0x58] sm:$0xff]  ;;  %v9018_v13 = vld [vmem:[%s16613_s4 + $0x168] sm:$0xff]  ;;  %v660_v15 = vld [vmem:[%s16613_s4 + $0x60] sm:$0xff] }
  0x26   : > { %12527 = vmatprep.subr.bf16.mxu0 %v12526_v38  ;;  %v12474_v11 = vpack.c.bf16 %v659_v10, %v658_v9  ;;  %v12550_v14 = vpack.c.bf16 %v9018_v13, %v9017_v12  ;;  %v661_v16 = vld [vmem:[%s16613_s4 + $0x68] sm:$0xff]  ;;  %v9019_v18 = vld [vmem:[%s16613_s4 + $0x170] sm:$0xff]  ;;  %v9020_v19 = vld [vmem:[%s16613_s4 + $0x178] sm:$0xff] }
  0x27   : > { %12453 = vmatpush3.bf16.msra.mxu1 %v12452_v37  ;;  %v12478_v17 = vpack.c.bf16 %v661_v16, %v660_v15  ;;  %v12554_v20 = vpack.c.bf16 %v9020_v19, %v9019_v18  ;;  %v662_v21 = vld [vmem:[%s16613_s4 + $0x70] sm:$0xff]  ;;  %v663_v22 = vld [vmem:[%s16613_s4 + $0x78] sm:$0xff]  ;;  %v9045_v24 = vld [vmem:[%s16613_s4 + $0x200] sm:$0xff] }
  0x28   : > { %12455 = vmatprep.subr.bf16.mxu1 %v12454_v39  ;;  %553 = vmatmul.mubr.f32.vlgmr.msra.gmra.mrb[0].mxu0 %v414_v42  ;;  %v12482_v23 = vpack.c.bf16 %v663_v22, %v662_v21  ;;  %v9046_v25 = vld [vmem:[%s16613_s4 + $0x208] sm:$0xff]  ;;  %v486_v28 = vld [vmem:[%s16611_s2] sm:$0xff]  ;;  %v9051_v53 = vld [vmem:[%s16613_s4 + $0x230] sm:$0xff] }
  0x29   : > { %557 = vmatprep.mubr.f32.mxu0 %v419_v46  ;;  %12529 = vmatpush3.bf16.msra.mxu0 %v12526_v38  ;;  %v12598_v26 = vpack.c.bf16 %v9046_v25, %v9045_v24  ;;  %v487_v36 = vld [vmem:[%s16611_s2 + $0x8] sm:$0xff]  ;;  %v9048_v46 = vld [vmem:[%s16613_s4 + $0x218] sm:$0xff]  ;;  %v9049_v50 = vld [vmem:[%s16613_s4 + $0x220] sm:$0xff] }
  0x2a   : > { %628 = vmatmul.mubr.f32.vlgmr.msra.gmra.mrb[0].mxu1 %v416_v45  ;;  %12531 = vmatprep.subr.bf16.mxu0 %v12530_v48  ;;  %v9047_v45 = vld [vmem:[%s16613_s4 + $0x210] sm:$0xff]  ;;  %v9050_v51 = vld [vmem:[%s16613_s4 + $0x228] sm:$0xff]  ;;  %v9052_v54 = vld [vmem:[%s16613_s4 + $0x238] sm:$0xff] }
  0x2b   : > { %632 = vmatprep.mubr.f32.mxu1 %v421_v47  ;;  %12457 = vmatpush3.bf16.msra.mxu1 %v12454_v39  ;;  %v9055_v59 = vld [vmem:[%s16613_s4 + $0x250] sm:$0xff]  ;;  %v9056_v60 = vld [vmem:[%s16613_s4 + $0x258] sm:$0xff]  ;;  %v9089_v10 = vld [vmem:[%s16613_s4 + $0x320] sm:$0xff] }
  0x2c   : > { %558 = vmatmul.mubr.f32.gmra.mrb[2].mxu0 %v418_v52  ;;  %12459 = vmatprep.subr.bf16.mxu1 %v12458_v49  ;;  %v12606_v52 = vpack.c.bf16 %v9050_v51, %v9049_v50  ;;  %v12618_v61 = vpack.c.bf16 %v9056_v60, %v9055_v59  ;;  %v9059_v1 = vld [vmem:[%s16613_s4 + $0x270] sm:$0xff]  ;;  %v9060_v2 = vld [vmem:[%s16613_s4 + $0x278] sm:$0xff]  ;;  %v9093_v16 = vld [vmem:[%s16613_s4 + $0x340] sm:$0xff] }
  0x2d   : > { %12533 = vmatpush3.bf16.msra.mxu0 %v12530_v48  ;;  %v12626_v3 = vpack.c.bf16 %v9060_v2, %v9059_v1  ;;  %v9087_v7 = vld [vmem:[%s16613_s4 + $0x310] sm:$0xff]  ;;  %v9097_v22 = vld [vmem:[%s16613_s4 + $0x360] sm:$0xff]  ;;  %v8988_v1 = vld [vmem:[%s16613_s4 + $0x98] sm:$0xff] }
  0x2e   : > { %633 = vmatmul.mubr.f32.gmra.mrb[2].mxu1 %v420_v55  ;;  %12535 = vmatprep.subr.bf16.mxu0 %v12534_v56  ;;  %v12610_v55 = vpack.c.bf16 %v9052_v54, %v9051_v53  ;;  %v9091_v13 = vld [vmem:[%s16613_s4 + $0x330] sm:$0xff]  ;;  %v739_v54 = vld [vmem:[%s16612_s3] sm:$0xff]  ;;  %v740_v2 = vld [vmem:[%s16612_s3 + $0x8] sm:$0xff] }
  0x2f   : > { %12461 = vmatpush3.bf16.msra.mxu1 %v12458_v49  ;;  %v12602_v49 = vpack.c.bf16 %v9048_v46, %v9047_v45  ;;  %v9095_v19 = vld [vmem:[%s16613_s4 + $0x350] sm:$0xff]  ;;  %v9116_v45 = vld [vmem:[%s16613_s4 + $0x3d8] sm:$0xff] }
  0x30   : > { %12463 = vmatprep.subr.bf16.mxu1 %v12462_v57  ;;  %v9099_v25 = vld [vmem:[%s16613_s4 + $0x370] sm:$0xff] }
  0x31   : > { %12537 = vmatpush3.bf16.msra.mxu0 %v12534_v56  ;;  %v9053_v56 = vld [vmem:[%s16613_s4 + $0x240] sm:$0xff]  ;;  %v9119_v51 = vld [vmem:[%s16613_s4 + $0x3f0] sm:$0xff] }
  0x32   : > { %12539 = vmatprep.subr.bf16.mxu0 %v12538_v62 }
  0x33   : > { %12465 = vmatpush3.bf16.msra.mxu1 %v12462_v57  ;;  %v9054_v57 = vld [vmem:[%s16613_s4 + $0x248] sm:$0xff] }
  0x34   : > { %12467 = vmatprep.subr.bf16.mxu1 %v12466_v63  ;;  %v12614_v58 = vpack.c.bf16 %v9054_v57, %v9053_v56  ;;  %v8986_v56 = vld [vmem:[%s16613_s4 + $0x88] sm:$0xff] }
  0x35   : > { %12541 = vmatpush3.bf16.msra.mxu0 %v12538_v62  ;;  %v9057_v62 = vld [vmem:[%s16613_s4 + $0x260] sm:$0xff] }
  0x36   : > { %12543 = vmatprep.subr.bf16.mxu0 %v12542_v4 }
  0x37   : > { %12469 = vmatpush3.bf16.msra.mxu1 %v12466_v63  ;;  %v9058_v63 = vld [vmem:[%s16613_s4 + $0x268] sm:$0xff] }
  0x38   : > { %12471 = vmatprep.subr.bf16.mxu1 %v12470_v5  ;;  %v12622_v0 = vpack.c.bf16 %v9058_v63, %v9057_v62 }
  0x39   : > { %12545 = vmatpush3.bf16.msra.mxu0 %v12542_v4  ;;  %v9085_v4 = vld [vmem:[%s16613_s4 + $0x300] sm:$0xff] }
  0x3a   : > { %12547 = vmatprep.subr.bf16.mxu0 %v12546_v8 }
  0x3b   : > { %12473 = vmatpush3.bf16.msra.mxu1 %v12470_v5  ;;  %v9086_v5 = vld [vmem:[%s16613_s4 + $0x308] sm:$0xff] }
  0x3c   : > { %12475 = vmatprep.subr.bf16.mxu1 %v12474_v11  ;;  %v12670_v6 = vpack.c.bf16 %v9086_v5, %v9085_v4  ;;  %v8989_v4 = vld [vmem:[%s16613_s4 + $0xa0] sm:$0xff]  ;;  %v8990_v5 = vld [vmem:[%s16613_s4 + $0xa8] sm:$0xff] }
  0x3d   : > { %12549 = vmatpush3.bf16.msra.mxu0 %v12546_v8  ;;  %v9088_v8 = vld [vmem:[%s16613_s4 + $0x318] sm:$0xff] }
  0x3e   : > { %12551 = vmatprep.subr.bf16.mxu0 %v12550_v14  ;;  %v12674_v9 = vpack.c.bf16 %v9088_v8, %v9087_v7  ;;  %v8991_v7 = vld [vmem:[%s16613_s4 + $0xb0] sm:$0xff]  ;;  %v8992_v8 = vld [vmem:[%s16613_s4 + $0xb8] sm:$0xff] }
  0x3f   : > { %12477 = vmatpush3.bf16.msra.mxu1 %v12474_v11  ;;  %v9090_v11 = vld [vmem:[%s16613_s4 + $0x328] sm:$0xff] }
  0x40   : > { %12479 = vmatprep.subr.bf16.mxu1 %v12478_v17  ;;  %v12678_v12 = vpack.c.bf16 %v9090_v11, %v9089_v10  ;;  %v8993_v10 = vld [vmem:[%s16613_s4 + $0xc0] sm:$0xff]  ;;  %v8994_v11 = vld [vmem:[%s16613_s4 + $0xc8] sm:$0xff] }
  0x41   : > { %12553 = vmatpush3.bf16.msra.mxu0 %v12550_v14  ;;  %v9092_v14 = vld [vmem:[%s16613_s4 + $0x338] sm:$0xff] }
  0x42   : > { %12555 = vmatprep.subr.bf16.mxu0 %v12554_v20  ;;  %v12682_v15 = vpack.c.bf16 %v9092_v14, %v9091_v13  ;;  %v8995_v13 = vld [vmem:[%s16613_s4 + $0xd0] sm:$0xff]  ;;  %v8996_v14 = vld [vmem:[%s16613_s4 + $0xd8] sm:$0xff] }
  0x43   : > { %12481 = vmatpush3.bf16.msra.mxu1 %v12478_v17  ;;  %v9094_v17 = vld [vmem:[%s16613_s4 + $0x348] sm:$0xff] }
  0x44   : > { %12483 = vmatprep.subr.bf16.mxu1 %v12482_v23  ;;  %v12686_v18 = vpack.c.bf16 %v9094_v17, %v9093_v16  ;;  %v8997_v16 = vld [vmem:[%s16613_s4 + $0xe0] sm:$0xff]  ;;  %v8998_v17 = vld [vmem:[%s16613_s4 + $0xe8] sm:$0xff] }
  0x45   : > { %12557 = vmatpush3.bf16.msra.mxu0 %v12554_v20  ;;  %v9096_v20 = vld [vmem:[%s16613_s4 + $0x358] sm:$0xff] }
  0x46   : > { %12599 = vmatprep.subr.bf16.mxu0 %v12598_v26  ;;  %v12690_v21 = vpack.c.bf16 %v9096_v20, %v9095_v19  ;;  %v8999_v19 = vld [vmem:[%s16613_s4 + $0xf0] sm:$0xff]  ;;  %v9000_v20 = vld [vmem:[%s16613_s4 + $0xf8] sm:$0xff] }
  0x47   : > { %12485 = vmatpush3.bf16.msra.mxu1 %v12482_v23  ;;  %v9098_v23 = vld [vmem:[%s16613_s4 + $0x368] sm:$0xff] }
  0x48   : > { %v12694_v24 = vpack.c.bf16 %v9098_v23, %v9097_v22 }
  0xfb   : > { %v10051_v27 = vpop.f32.mrb[0].mxu0 }
  0xfc   : > { %v10052_v29 = vpop.f32.mrb[1].mxu0 }
  0xfd   : > { %v10089_v30 = vpop.f32.mrb[0].mxu1  ;;  %v10053_v31 = vadd.f32 %v10052_v29, %v10051_v27  ;;  %v9106_v29 = vld [vmem:[%s16613_s4 + $0x388] sm:$0xff] }
  0xfe   : > { %v10090_v32 = vpop.f32.mrb[1].mxu1 }
  0xff   : > { %v10091_v33 = vadd.f32 %v10090_v32, %v10089_v30  ;;  %v555_v34 = vadd.f32 %v10053_v31, %v486_v28  ;;  %v10054_v35 = vpop.f32.mrb[2].mxu0  ;;  %v9105_v28 = vld [vmem:[%s16613_s4 + $0x380] sm:$0xff]  ;;  %v9107_v31 = vld [vmem:[%s16613_s4 + $0x390] sm:$0xff]  ;;  %v9108_v32 = vld [vmem:[%s16613_s4 + $0x398] sm:$0xff] }
 0x100   : > { %v10055_v37 = vpop.f32.mrb[3].mxu0  ;;  %v12706_v30 = vpack.c.bf16 %v9106_v29, %v9105_v28 }
 0x101   : > { %v10092_v38 = vpop.f32.mrb[2].mxu1  ;;  %v630_v39 = vadd.f32 %v10091_v33, %v555_v34  ;;  %v10056_v40 = vadd.f32 %v10055_v37, %v10054_v35  ;;  %v12710_v33 = vpack.c.bf16 %v9108_v32, %v9107_v31  ;;  %v9109_v34 = vld [vmem:[%s16613_s4 + $0x3a0] sm:$0xff]  ;;  %v9110_v35 = vld [vmem:[%s16613_s4 + $0x3a8] sm:$0xff]  ;;  %v9111_v37 = vld [vmem:[%s16613_s4 + $0x3b0] sm:$0xff] }
 0x102   : > { %v10093_v41 = vpop.f32.mrb[3].mxu1  ;;  %v9001_v31 = vld [vmem:[%s16612_s3 + $0x10] sm:$0xff] }
 0x103   : > { %v10094_v42 = vadd.f32 %v10093_v41, %v10092_v38  ;;  %v13976_v43 = vmax.f32 %v630_v39, 0.0  ;;  %v560_v44 = vadd.f32 %v10056_v40, %v487_v36  ;;  %v12714_v36 = vpack.c.bf16 %v9110_v35, %v9109_v34  ;;  %v9112_v38 = vld [vmem:[%s16613_s4 + $0x3b8] sm:$0xff]  ;;  %v9113_v40 = vld [vmem:[%s16613_s4 + $0x3c0] sm:$0xff]  ;;  %v9114_v41 = vld [vmem:[%s16613_s4 + $0x3c8] sm:$0xff] }
 0x104   : > { %v12718_v39 = vpack.c.bf16 %v9112_v38, %v9111_v37  ;;  %v9025_v35 = vld [vmem:[%s16613_s4 + $0x180] sm:$0xff]  ;;  %v9002_v37 = vld [vmem:[%s16612_s3 + $0x18] sm:$0xff] }
 0x105   : > { %v635_v47 = vadd.f32 %v10094_v42, %v560_v44  ;;  %10973 = vmatprep.mubr.f32.mxu1 %v13976_v43  ;;  %11057 = vmatprep.mubr.f32.mxu0 %v13976_v43  ;;  %v12722_v42 = vpack.c.bf16 %v9114_v41, %v9113_v40  ;;  %v9115_v44 = vld [vmem:[%s16613_s4 + $0x3d0] sm:$0xff]  ;;  %v9021_v38 = vld [vmem:[%s16612_s3 + $0x20] sm:$0xff]  ;;  %v9028_v41 = vld [vmem:[%s16613_s4 + $0x198] sm:$0xff] }
 0x106   : > { %v12726_v46 = vpack.c.bf16 %v9116_v45, %v9115_v44  ;;  %v9027_v40 = vld [vmem:[%s16613_s4 + $0x190] sm:$0xff]  ;;  %v9029_v45 = vld [vmem:[%s16613_s4 + $0x1a0] sm:$0xff] }
 0x107   : > { %v13986_v48 = vmax.f32 %v635_v47, 0.0  ;;  %v9117_v47 = vld [vmem:[%s16613_s4 + $0x3e0] sm:$0xff]  ;;  %v12566_v44 = vpack.c.bf16 %v9028_v41, %v9027_v40  ;;  %v9126_v40 = vld [vmem:[%s16613_s4 + $0x408] sm:$0xff] }
 0x108   : > { %v9102_v41 = vld [vmem:[%s16612_s3 + $0x68] sm:$0xff] }
 0x109   : > { %10974 = vmatmul.mubr.f32.vlgmr.msra.gmra.mrb[4].mxu1 %v13986_v48  ;;  %11058 = vmatmul.mubr.f32.vlgmr.msra.gmra.mrb[4].mxu0 %v13986_v48 }
 0x10a   : > { %12601 = vmatpush3.bf16.msra.mxu0 %v12598_v26  ;;  %11141 = vmatprep.mubr.f32.mxu0 %v13976_v43  ;;  %v9100_v26 = vld [vmem:[%s16613_s4 + $0x378] sm:$0xff] }
 0x10b   : > { %12603 = vmatprep.subr.bf16.mxu0 %v12602_v49  ;;  %v12698_v27 = vpack.c.bf16 %v9100_v26, %v9099_v25  ;;  %10980 = vmatprep.mubr.msk.f32.mxu1 %vm741_vm0, %v739_v54 }
 0x10e   : > { %12605 = vmatpush3.bf16.msra.mxu0 %v12602_v49  ;;  %v9118_v49 = vld [vmem:[%s16613_s4 + $0x3e8] sm:$0xff] }
 0x10f   : > { %12607 = vmatprep.subr.bf16.mxu0 %v12606_v52  ;;  %v12730_v50 = vpack.c.bf16 %v9118_v49, %v9117_v47  ;;  %v9031_v49 = vld [vmem:[%s16613_s4 + $0x1b0] sm:$0xff] }
 0x112   : > { %12609 = vmatpush3.bf16.msra.mxu0 %v12606_v52  ;;  %v9120_v52 = vld [vmem:[%s16613_s4 + $0x3f8] sm:$0xff] }
 0x113   : > { %12611 = vmatprep.subr.bf16.mxu0 %v12610_v55  ;;  %v12734_v53 = vpack.c.bf16 %v9120_v52, %v9119_v51  ;;  %v9033_v52 = vld [vmem:[%s16613_s4 + $0x1c0] sm:$0xff] }
 0x116   : > { %12613 = vmatpush3.bf16.msra.mxu0 %v12610_v55  ;;  %v8985_v55 = vld [vmem:[%s16613_s4 + $0x80] sm:$0xff] }
 0x117   : > { %12615 = vmatprep.subr.bf16.mxu0 %v12614_v58  ;;  %v12490_v63 = vpack.c.bf16 %v8986_v56, %v8985_v55  ;;  %v9035_v55 = vld [vmem:[%s16613_s4 + $0x1d0] sm:$0xff]  ;;  %v9036_v56 = vld [vmem:[%s16613_s4 + $0x1d8] sm:$0xff] }
 0x11a   : > { %12617 = vmatpush3.bf16.msra.mxu0 %v12614_v58 }
 0x11b   : > { %12619 = vmatprep.subr.bf16.mxu0 %v12618_v61 }
 0x11e   : > { %12621 = vmatpush3.bf16.msra.mxu0 %v12618_v61 }
 0x11f   : > { %12623 = vmatprep.subr.bf16.mxu0 %v12622_v0 }
 0x122   : > { %12625 = vmatpush3.bf16.msra.mxu0 %v12622_v0  ;;  %v8987_v0 = vld [vmem:[%s16613_s4 + $0x90] sm:$0xff] }
 0x123   : > { %12627 = vmatprep.subr.bf16.mxu0 %v12626_v3 }
 0x126   : > { %12629 = vmatpush3.bf16.msra.mxu0 %v12626_v3  ;;  %v12494_v3 = vpack.c.bf16 %v8988_v1, %v8987_v0  ;;  %v9041_v0 = vld [vmem:[%s16612_s3 + $0x30] sm:$0xff] }
 0x127   : > { %12671 = vmatprep.subr.bf16.mxu0 %v12670_v6 }
 0x129   : > { %11142 = vmatmul.mubr.f32.vlgmr.msra.gmra.mrb[6].mxu0 %v13986_v48 }
 0x12a   : > { %12673 = vmatpush3.bf16.msra.mxu0 %v12670_v6  ;;  %11225 = vmatprep.mubr.f32.mxu0 %v13976_v43  ;;  %v12498_v6 = vpack.c.bf16 %v8990_v5, %v8989_v4  ;;  %v9065_v4 = vld [vmem:[%s16613_s4 + $0x280] sm:$0xff]  ;;  %v9066_v5 = vld [vmem:[%s16613_s4 + $0x288] sm:$0xff] }
 0x12b   : > { %12675 = vmatprep.subr.bf16.mxu0 %v12674_v9 }
 0x12e   : > { %12677 = vmatpush3.bf16.msra.mxu0 %v12674_v9  ;;  %v12502_v9 = vpack.c.bf16 %v8992_v8, %v8991_v7  ;;  %v9061_v7 = vld [vmem:[%s16612_s3 + $0x40] sm:$0xff]  ;;  %v12634_v8 = vpack.c.bf16 %v9066_v5, %v9065_v4  ;;  %v2261_v4 = vld [vmem:[%s16616_s7 + $0x10] sm:$0xff] }
 0x12f   : > { %12679 = vmatprep.subr.bf16.mxu0 %v12678_v12 }
 0x132   : > { %12681 = vmatpush3.bf16.msra.mxu0 %v12678_v12  ;;  %v12506_v12 = vpack.c.bf16 %v8994_v11, %v8993_v10  ;;  %v9068_v10 = vld [vmem:[%s16613_s4 + $0x298] sm:$0xff]  ;;  %v9062_v11 = vld [vmem:[%s16612_s3 + $0x48] sm:$0xff] }
 0x133   : > { %12683 = vmatprep.subr.bf16.mxu0 %v12682_v15 }
 0x136   : > { %12685 = vmatpush3.bf16.msra.mxu0 %v12682_v15  ;;  %v12510_v15 = vpack.c.bf16 %v8996_v14, %v8995_v13  ;;  %v9069_v13 = vld [vmem:[%s16613_s4 + $0x2a0] sm:$0xff]  ;;  %v9070_v14 = vld [vmem:[%s16613_s4 + $0x2a8] sm:$0xff] }
 0x137   : > { %12687 = vmatprep.subr.bf16.mxu0 %v12686_v18 }
 0x13a   : > { %12689 = vmatpush3.bf16.msra.mxu0 %v12686_v18  ;;  %v12514_v18 = vpack.c.bf16 %v8998_v17, %v8997_v16  ;;  %v9071_v16 = vld [vmem:[%s16613_s4 + $0x2b0] sm:$0xff]  ;;  %v9072_v17 = vld [vmem:[%s16613_s4 + $0x2b8] sm:$0xff] }
 0x13b   : > { %12691 = vmatprep.subr.bf16.mxu0 %v12690_v21 }
 0x13e   : > { %12693 = vmatpush3.bf16.msra.mxu0 %v12690_v21  ;;  %v12518_v21 = vpack.c.bf16 %v9000_v20, %v8999_v19  ;;  %v9073_v19 = vld [vmem:[%s16613_s4 + $0x2c0] sm:$0xff]  ;;  %v9074_v20 = vld [vmem:[%s16613_s4 + $0x2c8] sm:$0xff] }
 0x13f   : > { %12695 = vmatprep.subr.bf16.mxu0 %v12694_v24 }
 0x142   : > { %12697 = vmatpush3.bf16.msra.mxu0 %v12694_v24 }
 0x143   : > { %12699 = vmatprep.subr.bf16.mxu0 %v12698_v27 }
 0x146   : > { %12701 = vmatpush3.bf16.msra.mxu0 %v12698_v27 }
 0x147   : > { %12707 = vmatprep.subr.bf16.mxu0 %v12706_v30 }
 0x149   : > { %11226 = vmatmul.mubr.f32.vlgmr.msra.gmra.mrb[8].mxu0 %v13986_v48 }
 0x14a   : > { %12709 = vmatpush3.bf16.msra.mxu0 %v12706_v30  ;;  %11267 = vmatprep.mubr.f32.mxu0 %v13976_v43 }
 0x14b   : > { %12711 = vmatprep.subr.bf16.mxu0 %v12710_v33 }
 0x14e   : > { %12713 = vmatpush3.bf16.msra.mxu0 %v12710_v33 }
 0x14f   : > { %12715 = vmatprep.subr.bf16.mxu0 %v12714_v36 }
 0x152   : > { %12717 = vmatpush3.bf16.msra.mxu0 %v12714_v36  ;;  %v9026_v36 = vld [vmem:[%s16613_s4 + $0x188] sm:$0xff] }
 0x153   : > { %12719 = vmatprep.subr.bf16.mxu0 %v12718_v39 }
 0x156   : > { %12721 = vmatpush3.bf16.msra.mxu0 %v12718_v39  ;;  %v12562_v39 = vpack.c.bf16 %v9026_v36, %v9025_v35 }
 0x157   : > { %12723 = vmatprep.subr.bf16.mxu0 %v12722_v42 }
 0x15a   : > { %12725 = vmatpush3.bf16.msra.mxu0 %v12722_v42  ;;  %v9022_v42 = vld [vmem:[%s16612_s3 + $0x28] sm:$0xff] }
 0x15b   : > { %12727 = vmatprep.subr.bf16.mxu0 %v12726_v46 }
 0x15e   : > { %12729 = vmatpush3.bf16.msra.mxu0 %v12726_v46  ;;  %v9030_v46 = vld [vmem:[%s16613_s4 + $0x1a8] sm:$0xff] }
 0x15f   : > { %12731 = vmatprep.subr.bf16.mxu0 %v12730_v50  ;;  %v12570_v47 = vpack.c.bf16 %v9030_v46, %v9029_v45  ;;  %v9128_v45 = vld [vmem:[%s16613_s4 + $0x418] sm:$0xff] }
 0x160   : > { %v9122_v46 = vld [vmem:[%s16612_s3 + $0x78] sm:$0xff] }
 0x162   : > { %12733 = vmatpush3.bf16.msra.mxu0 %v12730_v50  ;;  %v9032_v50 = vld [vmem:[%s16613_s4 + $0x1b8] sm:$0xff] }
 0x163   : > { %12735 = vmatprep.subr.bf16.mxu0 %v12734_v53  ;;  %v12574_v51 = vpack.c.bf16 %v9032_v50, %v9031_v49  ;;  %v9130_v49 = vld [vmem:[%s16613_s4 + $0x428] sm:$0xff] }
 0x166   : > { %12737 = vmatpush3.bf16.msra.mxu0 %v12734_v53  ;;  %v9034_v53 = vld [vmem:[%s16613_s4 + $0x1c8] sm:$0xff] }
 0x167   : > { %v12578_v54 = vpack.c.bf16 %v9034_v53, %v9033_v52  ;;  %v9132_v52 = vld [vmem:[%s16613_s4 + $0x438] sm:$0xff] }
 0x169   : > { %11268 = vmatmul.mubr.f32.vlgmr.msra.gmra.mrb[10].mxu0 %v13986_v48 }
 0x1dc   : > { %v10975_v57 = vpop.f32.mrb[4].mxu1  ;;  %v11059_v58 = vpop.f32.mrb[4].mxu0 }
 0x1dd   : > { %v730_v59 = vpop.f32.mrb[5].mxu1  ;;  %v1086_v60 = vpop.f32.mrb[5].mxu0 }
 0x1de   : > { %v12486_v61 = vpack.c.bf16 %v10975_v57, %v730_v59  ;;  %v14138_v62 = vpack.c.bf16 %v11059_v58, %v1086_v60  ;;  %v12582_v57 = vpack.c.bf16 %v9036_v56, %v9035_v55  ;;  %v9037_v58 = vld [vmem:[%s16613_s4 + $0x1e0] sm:$0xff]  ;;  %v9038_v59 = vld [vmem:[%s16613_s4 + $0x1e8] sm:$0xff]  ;;  %v9135_v56 = vld [vmem:[%s16613_s4 + $0x450] sm:$0xff] }
 0x1df   : > { %v12586_v60 = vpack.c.bf16 %v9038_v59, %v9037_v58  ;;  %v9137_v59 = vld [vmem:[%s16613_s4 + $0x460] sm:$0xff] }
 0x1e0   : > { %12487 = vmatprep.subr.bf16.mxu1 %v12486_v61 }
 0x1e1   : > { %12489 = vmatpush3.bf16.msra.mxu1 %v12486_v61  ;;  %v9039_v61 = vld [vmem:[%s16613_s4 + $0x1f0] sm:$0xff] }
 0x1e2   : > { %12491 = vmatprep.subr.bf16.mxu1 %v12490_v63 }
 0x1e4   : > { %10981 = vmatmul.mubr.msk.f32.vlgmr.msra.gmra.mrb[6].mxu1 %vm741_vm0, %v740_v2 }
 0x1e5   : > { %12493 = vmatpush3.bf16.msra.mxu1 %v12490_v63  ;;  %11015 = vmatprep.mubr.f32.mxu1 %v13976_v43 }
 0x1e6   : > { %12495 = vmatprep.subr.bf16.mxu1 %v12494_v3 }
 0x1e9   : > { %12497 = vmatpush3.bf16.msra.mxu1 %v12494_v3 }
 0x1ea   : > { %12499 = vmatprep.subr.bf16.mxu1 %v12498_v6 }
 0x1ed   : > { %12501 = vmatpush3.bf16.msra.mxu1 %v12498_v6  ;;  %v9042_v6 = vld [vmem:[%s16612_s3 + $0x38] sm:$0xff] }
 0x1ee   : > { %12503 = vmatprep.subr.bf16.mxu1 %v12502_v9 }
 0x1f1   : > { %12505 = vmatpush3.bf16.msra.mxu1 %v12502_v9  ;;  %v9067_v9 = vld [vmem:[%s16613_s4 + $0x290] sm:$0xff] }
 0x1f2   : > { %12507 = vmatprep.subr.bf16.mxu1 %v12506_v12 }
 0x1f5   : > { %12509 = vmatpush3.bf16.msra.mxu1 %v12506_v12  ;;  %v12638_v12 = vpack.c.bf16 %v9068_v10, %v9067_v9 }
 0x1f6   : > { %12511 = vmatprep.subr.bf16.mxu1 %v12510_v15 }
 0x1f9   : > { %12513 = vmatpush3.bf16.msra.mxu1 %v12510_v15  ;;  %v12642_v15 = vpack.c.bf16 %v9070_v14, %v9069_v13  ;;  %v9142_v13 = vld [vmem:[%s16612_s3 + $0x88] sm:$0xff]  ;;  %v2265_v14 = vld [vmem:[%s16616_s7 + $0x30] sm:$0xff] }
 0x1fa   : > { %12515 = vmatprep.subr.bf16.mxu1 %v12514_v18 }
 0x1fc   : > { %v11143_v22 = vpop.f32.mrb[6].mxu0 }
 0x1fd   : > { %v1442_v23 = vpop.f32.mrb[7].mxu0  ;;  %12517 = vmatpush3.bf16.msra.mxu1 %v12514_v18  ;;  %v12646_v18 = vpack.c.bf16 %v9072_v17, %v9071_v16  ;;  %v9182_v17 = vld [vmem:[%s16616_s7 + $0x80] sm:$0xff] }
 0x1fe   : > { %v14187_v24 = vpack.c.bf16 %v11143_v22, %v1442_v23  ;;  %12519 = vmatprep.subr.bf16.mxu1 %v12518_v21  ;;  %v9075_v22 = vld [vmem:[%s16613_s4 + $0x2d0] sm:$0xff]  ;;  %v9076_v23 = vld [vmem:[%s16613_s4 + $0x2d8] sm:$0xff] }
 0x201   : > { %12521 = vmatpush3.bf16.msra.mxu1 %v12518_v21  ;;  %v12650_v21 = vpack.c.bf16 %v9074_v20, %v9073_v19  ;;  %v8982_v20 = vld [vmem:[%s16614_s5] ss:$0 sm:$0xff] }
 0x204   : > { %11016 = vmatmul.mubr.f32.vlgmr.msra.gmra.mrb[8].mxu1 %v13986_v48 }
 0x205   : > { %11022 = vmatprep.mubr.msk.f32.mxu1 %vm741_vm0, %v9001_v31  ;;  %v9080_v31 = vld [vmem:[%s16613_s4 + $0x2f8] sm:$0xff] }
 0x21c   : > { %v11227_v25 = vpop.f32.mrb[8].mxu0 }
 0x21d   : > { %v1798_v26 = vpop.f32.mrb[9].mxu0 }
 0x21e   : > { %v14190_v27 = vpack.c.bf16 %v11227_v25, %v1798_v26  ;;  %v9077_v25 = vld [vmem:[%s16613_s4 + $0x2e0] sm:$0xff]  ;;  %v9078_v26 = vld [vmem:[%s16613_s4 + $0x2e8] sm:$0xff] }
 0x23c   : > { %v11269_v28 = vpop.f32.mrb[10].mxu0 }
 0x23d   : > { %v1976_v29 = vpop.f32.mrb[11].mxu0 }
 0x23e   : > { %v14192_v30 = vpack.c.bf16 %v11269_v28, %v1976_v29  ;;  %v12658_v28 = vpack.c.bf16 %v9078_v26, %v9077_v25  ;;  %v9079_v29 = vld [vmem:[%s16613_s4 + $0x2f0] sm:$0xff]  ;;  %v9185_v26 = vld [vmem:[%s16616_s7 + $0x98] sm:$0xff] }
 0x23f   : > { %v9184_v25 = vld [vmem:[%s16616_s7 + $0x90] sm:$0xff] }
 0x2d7   : > { %v11017_v32 = vpop.f32.mrb[8].mxu1 }
 0x2d8   : > { %v908_v33 = vpop.f32.mrb[9].mxu1 }
 0x2d9   : > { %v12522_v34 = vpack.c.bf16 %v11017_v32, %v908_v33  ;;  %v12662_v32 = vpack.c.bf16 %v9080_v31, %v9079_v29  ;;  %v9081_v33 = vld [vmem:[%s16612_s3 + $0x50] sm:$0xff]  ;;  %v12822_v31 = vpack.c.bf16 %v9185_v26, %v9184_v25  ;;  %v9316_v26 = vld [vmem:[%s16616_s7 + $0x1e0] sm:$0xff] }
 0x2db   : > { %12523 = vmatprep.subr.bf16.mxu1 %v12522_v34 }
 0x2dc   : > { %12525 = vmatpush3.bf16.msra.mxu1 %v12522_v34 }
 0x2dd   : > { %12559 = vmatprep.subr.bf16.mxu1 %v14138_v62 }
 0x2df   : > { %11023 = vmatmul.mubr.msk.f32.vlgmr.msra.gmra.mrb[6].mxu1 %vm741_vm0, %v9002_v37  ;;  %v9082_v37 = vld [vmem:[%s16612_s3 + $0x58] sm:$0xff] }
 0x2e0   : > { %12561 = vmatpush3.bf16.msra.mxu1 %v14138_v62  ;;  %11064 = vmatprep.mubr.msk.f32.mxu1 %vm741_vm0, %v9021_v38  ;;  %v9040_v62 = vld [vmem:[%s16613_s4 + $0x1f8] sm:$0xff]  ;;  %v9101_v38 = vld [vmem:[%s16612_s3 + $0x60] sm:$0xff] }
 0x2e1   : > { %12563 = vmatprep.subr.bf16.mxu1 %v12562_v39  ;;  %v12590_v63 = vpack.c.bf16 %v9040_v62, %v9039_v61  ;;  %v9139_v62 = vld [vmem:[%s16613_s4 + $0x470] sm:$0xff] }
 0x2e7   : > { %11065 = vmatmul.mubr.msk.f32.vlgmr.msra.gmra.mrb[6].mxu1 %vm741_vm0, %v9022_v42 }
 0x2e8   : > { %12565 = vmatpush3.bf16.msra.mxu1 %v12562_v39  ;;  %11099 = vmatprep.mubr.f32.mxu1 %v13976_v43  ;;  %v9125_v39 = vld [vmem:[%s16613_s4 + $0x400] sm:$0xff] }
 0x2e9   : > { %12567 = vmatprep.subr.bf16.mxu1 %v12566_v44  ;;  %v12742_v42 = vpack.c.bf16 %v9126_v40, %v9125_v39  ;;  %v9209_v39 = vld [vmem:[%s16616_s7 + $0xc8] sm:$0xff] }
 0x2ec   : > { %12569 = vmatpush3.bf16.msra.mxu1 %v12566_v44  ;;  %v9127_v44 = vld [vmem:[%s16613_s4 + $0x410] sm:$0xff] }
 0x2ed   : > { %12571 = vmatprep.subr.bf16.mxu1 %v12570_v47 }
 0x2f0   : > { %12573 = vmatpush3.bf16.msra.mxu1 %v12570_v47  ;;  %v12746_v47 = vpack.c.bf16 %v9128_v45, %v9127_v44  ;;  %v9212_v44 = vld [vmem:[%s16616_s7 + $0xe0] sm:$0xff]  ;;  %v9213_v45 = vld [vmem:[%s16616_s7 + $0xe8] sm:$0xff] }
 0x2f1   : > { %12575 = vmatprep.subr.bf16.mxu1 %v12574_v51 }
 0x2f4   : > { %12577 = vmatpush3.bf16.msra.mxu1 %v12574_v51  ;;  %v9131_v51 = vld [vmem:[%s16613_s4 + $0x430] sm:$0xff] }
 0x2f5   : > { %12579 = vmatprep.subr.bf16.mxu1 %v12578_v54  ;;  %v12754_v53 = vpack.c.bf16 %v9132_v52, %v9131_v51  ;;  %v9235_v51 = vld [vmem:[%s16616_s7 + $0x108] sm:$0xff] }
 0x2f8   : > { %12581 = vmatpush3.bf16.msra.mxu1 %v12578_v54  ;;  %v9133_v54 = vld [vmem:[%s16613_s4 + $0x440] sm:$0xff] }
 0x2f9   : > { %12583 = vmatprep.subr.bf16.mxu1 %v12582_v57 }
 0x2fc   : > { %12585 = vmatpush3.bf16.msra.mxu1 %v12582_v57  ;;  %v9136_v57 = vld [vmem:[%s16613_s4 + $0x458] sm:$0xff] }
 0x2fd   : > { %12587 = vmatprep.subr.bf16.mxu1 %v12586_v60  ;;  %v12762_v58 = vpack.c.bf16 %v9136_v57, %v9135_v56  ;;  %v9239_v56 = vld [vmem:[%s16616_s7 + $0x128] sm:$0xff] }
 0x300   : > { %12589 = vmatpush3.bf16.msra.mxu1 %v12586_v60  ;;  %v9138_v60 = vld [vmem:[%s16613_s4 + $0x468] sm:$0xff] }
 0x301   : > { %12591 = vmatprep.subr.bf16.mxu1 %v12590_v63  ;;  %v12766_v61 = vpack.c.bf16 %v9138_v60, %v9137_v59  ;;  %v9241_v59 = vld [vmem:[%s16616_s7 + $0x138] sm:$0xff] }
 0x304   : > { %12593 = vmatpush3.bf16.msra.mxu1 %v12590_v63  ;;  %v9140_v63 = vld [vmem:[%s16613_s4 + $0x478] sm:$0xff] }
 0x307   : > { %11100 = vmatmul.mubr.f32.vlgmr.msra.gmra.mrb[10].mxu1 %v13986_v48 }
 0x308   : > { %11106 = vmatprep.mubr.msk.f32.mxu1 %vm741_vm0, %v9041_v0  ;;  %v12770_v0 = vpack.c.bf16 %v9140_v63, %v9139_v62  ;;  %v9261_v62 = vld [vmem:[%s16616_s7 + $0x148] sm:$0xff] }
 0x3da   : > { %v11101_v1 = vpop.f32.mrb[10].mxu1 }
 0x3db   : > { %v1264_v2 = vpop.f32.mrb[11].mxu1 }
 0x3dc   : > { %v12594_v3 = vpack.c.bf16 %v11101_v1, %v1264_v2  ;;  %v9141_v1 = vld [vmem:[%s16612_s3 + $0x80] sm:$0xff] }
 0x3dd   : > { %v2259_v2 = vld [vmem:[%s16616_s7] sm:$0xff] }
 0x3de   : > { %12595 = vmatprep.subr.bf16.mxu1 %v12594_v3 }
 0x3df   : > { %12597 = vmatpush3.bf16.msra.mxu1 %v12594_v3  ;;  %v2260_v3 = vld [vmem:[%s16616_s7 + $0x8] sm:$0xff] }
 0x3e0   : > { %12631 = vmatprep.subr.bf16.mxu1 %v14187_v24  ;;  %v12778_v5 = vpack.c.bf16 %v2260_v3, %v2259_v2  ;;  %v9264_v3 = vld [vmem:[%s16616_s7 + $0x160] sm:$0xff] }
 0x3e2   : > { %11107 = vmatmul.mubr.msk.f32.vlgmr.msra.gmra.mrb[6].mxu1 %vm741_vm0, %v9042_v6  ;;  %12779 = vmatprep.subr.bf16.mxu0 %v12778_v5 }
 0x3e3   : > { %12633 = vmatpush3.bf16.msra.mxu1 %v14187_v24  ;;  %11148 = vmatprep.mubr.msk.f32.mxu1 %vm741_vm0, %v9061_v7  ;;  %v12654_v24 = vpack.c.bf16 %v9076_v23, %v9075_v22  ;;  %v2263_v7 = vld [vmem:[%s16616_s7 + $0x20] sm:$0xff] }
 0x3e4   : > { %12635 = vmatprep.subr.bf16.mxu1 %v12634_v8  ;;  %12781 = vmatpush3.bf16.msra.mxu0 %v12778_v5 }
 0x3ea   : > { %11149 = vmatmul.mubr.msk.f32.vlgmr.msra.gmra.mrb[6].mxu1 %vm741_vm0, %v9062_v11 }
 0x3eb   : > { %12637 = vmatpush3.bf16.msra.mxu1 %v12634_v8  ;;  %11183 = vmatprep.mubr.f32.mxu1 %v13976_v43  ;;  %v2264_v8 = vld [vmem:[%s16616_s7 + $0x28] sm:$0xff] }
 0x3ec   : > { %12639 = vmatprep.subr.bf16.mxu1 %v12638_v12  ;;  %v12786_v9 = vpack.c.bf16 %v2264_v8, %v2263_v7  ;;  %v9286_v8 = vld [vmem:[%s16616_s7 + $0x180] sm:$0xff] }
 0x3ef   : > { %12641 = vmatpush3.bf16.msra.mxu1 %v12638_v12 }
 0x3f0   : > { %12643 = vmatprep.subr.bf16.mxu1 %v12642_v15 }
 0x3f3   : > { %12645 = vmatpush3.bf16.msra.mxu1 %v12642_v15  ;;  %v2266_v15 = vld [vmem:[%s16616_s7 + $0x38] sm:$0xff] }
 0x3f4   : > { %12647 = vmatprep.subr.bf16.mxu1 %v12646_v18  ;;  %v12790_v16 = vpack.c.bf16 %v2266_v15, %v2265_v14  ;;  %v9290_v14 = vld [vmem:[%s16616_s7 + $0x1a0] sm:$0xff]  ;;  %v9291_v15 = vld [vmem:[%s16616_s7 + $0x1a8] sm:$0xff] }
 0x3f7   : > { %12649 = vmatpush3.bf16.msra.mxu1 %v12646_v18  ;;  %v9183_v18 = vld [vmem:[%s16616_s7 + $0x88] sm:$0xff] }
 0x3f8   : > { %12651 = vmatprep.subr.bf16.mxu1 %v12650_v21  ;;  %v12818_v19 = vpack.c.bf16 %v9183_v18, %v9182_v17  ;;  %v9292_v17 = vld [vmem:[%s16616_s7 + $0x1b0] sm:$0xff]  ;;  %v9293_v18 = vld [vmem:[%s16616_s7 + $0x1b8] sm:$0xff] }
 0x3fb   : > { %12653 = vmatpush3.bf16.msra.mxu1 %v12650_v21 }
 0x3fc   : > { %12655 = vmatprep.subr.bf16.mxu1 %v12654_v24 }
 0x3ff   : > { %12657 = vmatpush3.bf16.msra.mxu1 %v12654_v24 }
 0x400   : > { %12659 = vmatprep.subr.bf16.mxu1 %v12658_v28 }
 0x403   : > { %12661 = vmatpush3.bf16.msra.mxu1 %v12658_v28 }
 0x404   : > { %12663 = vmatprep.subr.bf16.mxu1 %v12662_v32 }
 0x407   : > { %12665 = vmatpush3.bf16.msra.mxu1 %v12662_v32  ;;  %v9186_v32 = vld [vmem:[%s16616_s7 + $0xa0] sm:$0xff] }
 0x40a   : > { %11184 = vmatmul.mubr.f32.vlgmr.msra.gmra.mrb[12].mxu1 %v13986_v48 }
 0x40b   : > { %11190 = vmatprep.mubr.msk.f32.mxu1 %vm741_vm0, %v9081_v33  ;;  %v9187_v33 = vld [vmem:[%s16616_s7 + $0xa8] sm:$0xff] }
 0x4dd   : > { %v11185_v34 = vpop.f32.mrb[12].mxu1 }
 0x4de   : > { %v1620_v35 = vpop.f32.mrb[13].mxu1 }
 0x4df   : > { %v12666_v36 = vpack.c.bf16 %v11185_v34, %v1620_v35  ;;  %v12826_v34 = vpack.c.bf16 %v9187_v33, %v9186_v32  ;;  %v9188_v35 = vld [vmem:[%s16616_s7 + $0xb0] sm:$0xff] }
 0x4e0   : > { %v9318_v33 = vld [vmem:[%s16616_s7 + $0x1f0] sm:$0xff] }
 0x4e1   : > { %12667 = vmatprep.subr.bf16.mxu1 %v12666_v36 }
 0x4e2   : > { %12669 = vmatpush3.bf16.msra.mxu1 %v12666_v36  ;;  %v9189_v36 = vld [vmem:[%s16616_s7 + $0xb8] sm:$0xff] }
 0x4e3   : > { %12703 = vmatprep.subr.bf16.mxu1 %v14190_v27 }
 0x4e5   : > { %11191 = vmatmul.mubr.msk.f32.vlgmr.msra.gmra.mrb[6].mxu1 %vm741_vm0, %v9082_v37  ;;  %v12830_v37 = vpack.c.bf16 %v9189_v36, %v9188_v35  ;;  %v9338_v36 = vld [vmem:[%s16616_s7 + $0x200] sm:$0xff] }
 0x4e6   : > { %12705 = vmatpush3.bf16.msra.mxu1 %v14190_v27  ;;  %11232 = vmatprep.mubr.msk.f32.mxu1 %vm741_vm0, %v9101_v38  ;;  %v9121_v27 = vld [vmem:[%s16612_s3 + $0x70] sm:$0xff]  ;;  %v9208_v38 = vld [vmem:[%s16616_s7 + $0xc0] sm:$0xff] }
 0x4e7   : > { %12739 = vmatprep.subr.bf16.mxu1 %v14192_v30  ;;  %v12838_v40 = vpack.c.bf16 %v9209_v39, %v9208_v38  ;;  %v2349_v38 = vld [vmem:[%s16615_s6] sm:$0xff] }
 0x4ed   : > { %11233 = vmatmul.mubr.msk.f32.vlgmr.msra.gmra.mrb[6].mxu1 %vm741_vm0, %v9102_v41  ;;  %v9210_v41 = vld [vmem:[%s16616_s7 + $0xd0] sm:$0xff] }
 0x4ee   : > { %12741 = vmatpush3.bf16.msra.mxu1 %v14192_v30  ;;  %11274 = vmatprep.mubr.msk.f32.mxu1 %vm741_vm0, %v9121_v27  ;;  %v9129_v30 = vld [vmem:[%s16613_s4 + $0x420] sm:$0xff]  ;;  %v9211_v27 = vld [vmem:[%s16616_s7 + $0xd8] sm:$0xff] }
 0x4ef   : > { %12743 = vmatprep.subr.bf16.mxu1 %v12742_v42  ;;  %v12750_v50 = vpack.c.bf16 %v9130_v49, %v9129_v30  ;;  %v9215_v30 = vld [vmem:[%s16616_s7 + $0xf8] sm:$0xff] }
 0x4f5   : > { %11275 = vmatmul.mubr.msk.f32.vlgmr.msra.gmra.mrb[6].mxu1 %vm741_vm0, %v9122_v46  ;;  %v12846_v46 = vpack.c.bf16 %v9213_v45, %v9212_v44  ;;  %v9343_v44 = vld [vmem:[%s16616_s7 + $0x228] sm:$0xff] }
 0x4f6   : > { %12745 = vmatpush3.bf16.msra.mxu1 %v12742_v42  ;;  %11309 = vmatprep.mubr.f32.mxu1 %v13976_v43  ;;  %v9134_v43 = vld [vmem:[%s16613_s4 + $0x448] sm:$0xff]  ;;  %v12842_v42 = vpack.c.bf16 %v9211_v27, %v9210_v41  ;;  %v9341_v41 = vld [vmem:[%s16616_s7 + $0x218] sm:$0xff] }
 0x4f7   : > { %12747 = vmatprep.subr.bf16.mxu1 %v12746_v47  ;;  %v12758_v55 = vpack.c.bf16 %v9134_v43, %v9133_v54  ;;  %v9237_v54 = vld [vmem:[%s16616_s7 + $0x118] sm:$0xff] }
 0x4fa   : > { %12749 = vmatpush3.bf16.msra.mxu1 %v12746_v47  ;;  %v9214_v47 = vld [vmem:[%s16616_s7 + $0xf0] sm:$0xff] }
 0x4fb   : > { %12751 = vmatprep.subr.bf16.mxu1 %v12750_v50  ;;  %v12850_v49 = vpack.c.bf16 %v9215_v30, %v9214_v47  ;;  %v9345_v47 = vld [vmem:[%s16616_s7 + $0x238] sm:$0xff] }
 0x4fe   : > { %12753 = vmatpush3.bf16.msra.mxu1 %v12750_v50  ;;  %v9234_v50 = vld [vmem:[%s16616_s7 + $0x100] sm:$0xff] }
 0x4ff   : > { %12755 = vmatprep.subr.bf16.mxu1 %v12754_v53  ;;  %v12858_v52 = vpack.c.bf16 %v9235_v51, %v9234_v50  ;;  %v9157_v50 = vld [vmem:[%s16616_s7 + $0x48] sm:$0xff] }
 0x502   : > { %12757 = vmatpush3.bf16.msra.mxu1 %v12754_v53  ;;  %v9236_v53 = vld [vmem:[%s16616_s7 + $0x110] sm:$0xff] }
 0x503   : > { %12759 = vmatprep.subr.bf16.mxu1 %v12758_v55  ;;  %v12862_v43 = vpack.c.bf16 %v9237_v54, %v9236_v53 }
 0x506   : > { %12761 = vmatpush3.bf16.msra.mxu1 %v12758_v55  ;;  %v9238_v55 = vld [vmem:[%s16616_s7 + $0x120] sm:$0xff] }
 0x507   : > { %12763 = vmatprep.subr.bf16.mxu1 %v12762_v58  ;;  %v12866_v57 = vpack.c.bf16 %v9239_v56, %v9238_v55  ;;  %v9159_v55 = vld [vmem:[%s16616_s7 + $0x58] sm:$0xff]  ;;  %v2350_v56 = vld [vmem:[%s16615_s6 + $0x8] sm:$0xff] }
 0x50a   : > { %12765 = vmatpush3.bf16.msra.mxu1 %v12762_v58  ;;  %v9240_v58 = vld [vmem:[%s16616_s7 + $0x130] sm:$0xff] }
 0x50b   : > { %12767 = vmatprep.subr.bf16.mxu1 %v12766_v61  ;;  %v12870_v60 = vpack.c.bf16 %v9241_v59, %v9240_v58  ;;  %v9160_v59 = vld [vmem:[%s16616_s7 + $0x60] sm:$0xff] }
 0x50e   : > { %12769 = vmatpush3.bf16.msra.mxu1 %v12766_v61  ;;  %v9260_v61 = vld [vmem:[%s16616_s7 + $0x140] sm:$0xff] }
 0x50f   : > { %12771 = vmatprep.subr.bf16.mxu1 %v12770_v0  ;;  %v12878_v63 = vpack.c.bf16 %v9261_v62, %v9260_v61  ;;  %v2352_v61 = vld [vmem:[%s16615_s6 + $0x18] sm:$0xff]  ;;  %v2353_v62 = vld [vmem:[%s16615_s6 + $0x20] sm:$0xff] }
 0x512   : > { %12773 = vmatpush3.bf16.msra.mxu1 %v12770_v0  ;;  %v9262_v0 = vld [vmem:[%s16616_s7 + $0x150] sm:$0xff] }
 0x515   : > { %11310 = vmatmul.mubr.f32.vlgmr.msra.gmra.mrb[14].mxu1 %v13986_v48  ;;  %v2262_v48 = vld [vmem:[%s16616_s7 + $0x18] sm:$0xff] }
 0x516   : > { %11316 = vmatprep.mubr.msk.f32.mxu1 %vm741_vm0, %v9141_v1  ;;  %v12782_v6 = vpack.c.bf16 %v2262_v48, %v2261_v4  ;;  %v9263_v1 = vld [vmem:[%s16616_s7 + $0x158] sm:$0xff]  ;;  %v9265_v4 = vld [vmem:[%s16616_s7 + $0x168] sm:$0xff]  ;;  %v9266_v48 = vld [vmem:[%s16616_s7 + $0x170] sm:$0xff] }
 0x517   : > { %v12882_v2 = vpack.c.bf16 %v9263_v1, %v9262_v0  ;;  %v12886_v5 = vpack.c.bf16 %v9265_v4, %v9264_v3  ;;  %v9162_v0 = vld [vmem:[%s16616_s7 + $0x70] sm:$0xff]  ;;  %v9163_v1 = vld [vmem:[%s16616_s7 + $0x78] sm:$0xff] }
 0x518   : > { %12783 = vmatprep.subr.bf16.mxu0 %v12782_v6  ;;  %v2355_v3 = vld [vmem:[%s16615_s6 + $0x30] sm:$0xff]  ;;  %v12810_v4 = vpack.c.bf16 %v9163_v1, %v9162_v0  ;;  %v9251_v0 = vld [vmem:[%s16615_s6 + $0x138] sm:$0xff]  ;;  %v9270_v1 = vld [vmem:[%s16615_s6 + $0x140] sm:$0xff] }
 0x519   : > { %12785 = vmatpush3.bf16.msra.mxu0 %v12782_v6  ;;  %v9267_v6 = vld [vmem:[%s16616_s7 + $0x178] sm:$0xff] }
 0x51a   : > { %12787 = vmatprep.subr.bf16.mxu0 %v12786_v9  ;;  %v12890_v7 = vpack.c.bf16 %v9267_v6, %v9266_v48  ;;  %v2356_v6 = vld [vmem:[%s16615_s6 + $0x38] sm:$0xff] }
 0x51d   : > { %12789 = vmatpush3.bf16.msra.mxu0 %v12786_v9  ;;  %v9287_v9 = vld [vmem:[%s16616_s7 + $0x188] sm:$0xff] }
 0x51e   : > { %12791 = vmatprep.subr.bf16.mxu0 %v12790_v16 }
 0x521   : > { %12793 = vmatpush3.bf16.msra.mxu0 %v12790_v16  ;;  %v12906_v16 = vpack.c.bf16 %v9291_v15, %v9290_v14 }
 0x522   : > { %12819 = vmatprep.subr.bf16.mxu0 %v12818_v19 }
 0x5e8   : > { %v11311_v10 = vpop.f32.mrb[14].mxu1 }
 0x5e9   : > { %v2154_v11 = vpop.f32.mrb[15].mxu1 }
 0x5ea   : > { %v12774_v12 = vpack.c.bf16 %v11311_v10, %v2154_v11  ;;  %v12898_v10 = vpack.c.bf16 %v9287_v9, %v9286_v8  ;;  %v9288_v11 = vld [vmem:[%s16616_s7 + $0x190] sm:$0xff] }
 0x5ec   : > { %12775 = vmatprep.subr.bf16.mxu1 %v12774_v12 }
 0x5ed   : > { %12777 = vmatpush3.bf16.msra.mxu1 %v12774_v12  ;;  %v9289_v12 = vld [vmem:[%s16616_s7 + $0x198] sm:$0xff] }
 0x5f0   : > { %11317 = vmatmul.mubr.msk.f32.vlgmr.msra.gmra.mrb[6].mxu1 %vm741_vm0, %v9142_v13  ;;  %v12902_v13 = vpack.c.bf16 %v9289_v12, %v9288_v11 }
 0x5f1   : > { %11342 = vmatprep.mubr.msk.f32.mxu1 %vm741_vm0, %v2349_v38  ;;  %v9170_v38 = vld [vmem:[%s16615_s6 + $0x60] sm:$0xff] }
 0x6c3   : > { %v11318_v21 = vpop.f32.mrb[6].mxu1 }
 0x6c4   : > { %v13174_v22 = vadd.f32 %v11318_v21, %v8982_v20  ;;  %v2238_v23 = vpop.f32.mrb[7].mxu1  ;;  %v9313_v21 = vld [vmem:[%s16616_s7 + $0x1c8] sm:$0xff] }
 0x6c5   : > { %v13175_v24 = vadd.f32 %v8982_v20, %v2238_v23  ;;  %v9312_v20 = vld [vmem:[%s16616_s7 + $0x1c0] sm:$0xff]  ;;  %v9314_v23 = vld [vmem:[%s16616_s7 + $0x1d0] sm:$0xff] }
 0x6c6   : > { %v14457_v29 = vmax.f32 %v13174_v22, 0.0  ;;  %v12918_v22 = vpack.c.bf16 %v9313_v21, %v9312_v20 }
 0x6c7   : > { %v14455_v28 = vmax.f32 %v13175_v24, 0.0  ;;  %v9315_v24 = vld [vmem:[%s16616_s7 + $0x1d8] sm:$0xff] }
 0x6c8   : > { %v12922_v25 = vpack.c.bf16 %v9315_v24, %v9314_v23  ;;  %v9166_v23 = vld [vmem:[%s16615_s6 + $0x40] sm:$0xff] }
 0x6c9   : > { %11335 = vmatprep.mubr.msk.f32.mxu0 %vm2267_vm1, %v14455_v28 }
 0x6ca   : > { %11336 = vmatmul.mubr.msk.f32.vlgmr.msra.gmra.mrb[12].mxu0 %vm2267_vm1, %v14457_v29 }
 0x6cb   : > { %12821 = vmatpush3.bf16.msra.mxu0 %v12818_v19  ;;  %11405 = vmatprep.mubr.msk.f32.mxu0 %vm2267_vm1, %v14455_v28  ;;  %v12910_v19 = vpack.c.bf16 %v9293_v18, %v9292_v17 }
 0x6cc   : > { %12823 = vmatprep.subr.bf16.mxu0 %v12822_v31 }
 0x6cf   : > { %12825 = vmatpush3.bf16.msra.mxu0 %v12822_v31  ;;  %v9317_v31 = vld [vmem:[%s16616_s7 + $0x1e8] sm:$0xff] }
 0x6d0   : > { %12827 = vmatprep.subr.bf16.mxu0 %v12826_v34  ;;  %v12926_v32 = vpack.c.bf16 %v9317_v31, %v9316_v26 }
 0x6d3   : > { %12829 = vmatpush3.bf16.msra.mxu0 %v12826_v34  ;;  %v9319_v34 = vld [vmem:[%s16616_s7 + $0x1f8] sm:$0xff] }
 0x6d4   : > { %12831 = vmatprep.subr.bf16.mxu0 %v12830_v37  ;;  %v12930_v35 = vpack.c.bf16 %v9319_v34, %v9318_v33  ;;  %v4351_v33 = vld [vmem:[%s16619_s10 + $0x8] sm:$0xff] }
 0x6d5   : > { %v9167_v34 = vld [vmem:[%s16615_s6 + $0x48] sm:$0xff] }
 0x6d7   : > { %12833 = vmatpush3.bf16.msra.mxu0 %v12830_v37  ;;  %v9339_v37 = vld [vmem:[%s16616_s7 + $0x208] sm:$0xff] }
 0x6d8   : > { %12839 = vmatprep.subr.bf16.mxu0 %v12838_v40  ;;  %v12938_v39 = vpack.c.bf16 %v9339_v37, %v9338_v36  ;;  %v9168_v36 = vld [vmem:[%s16615_s6 + $0x50] sm:$0xff]  ;;  %v9169_v37 = vld [vmem:[%s16615_s6 + $0x58] sm:$0xff] }
 0x6da   : > { %11406 = vmatmul.mubr.msk.f32.vlgmr.msra.gmra.mrb[14].mxu0 %vm2267_vm1, %v14457_v29 }
 0x6db   : > { %12841 = vmatpush3.bf16.msra.mxu0 %v12838_v40  ;;  %11440 = vmatprep.mubr.msk.f32.mxu0 %vm2267_vm1, %v14455_v28  ;;  %v9340_v40 = vld [vmem:[%s16616_s7 + $0x210] sm:$0xff] }
 0x6dc   : > { %12843 = vmatprep.subr.bf16.mxu0 %v12842_v42  ;;  %v12942_v27 = vpack.c.bf16 %v9341_v41, %v9340_v40  ;;  %v9172_v40 = vld [vmem:[%s16615_s6 + $0x70] sm:$0xff]  ;;  %v9173_v41 = vld [vmem:[%s16615_s6 + $0x78] sm:$0xff] }
 0x6df   : > { %12845 = vmatpush3.bf16.msra.mxu0 %v12842_v42  ;;  %v9342_v42 = vld [vmem:[%s16616_s7 + $0x220] sm:$0xff] }
 0x6e0   : > { %12847 = vmatprep.subr.bf16.mxu0 %v12846_v46  ;;  %v12946_v45 = vpack.c.bf16 %v9343_v44, %v9342_v42  ;;  %v9193_v42 = vld [vmem:[%s16615_s6 + $0x88] sm:$0xff]  ;;  %v9194_v44 = vld [vmem:[%s16615_s6 + $0x90] sm:$0xff] }
 0x6e3   : > { %12849 = vmatpush3.bf16.msra.mxu0 %v12846_v46  ;;  %v9344_v46 = vld [vmem:[%s16616_s7 + $0x230] sm:$0xff] }
 0x6e4   : > { %12851 = vmatprep.subr.bf16.mxu0 %v12850_v49  ;;  %v12950_v30 = vpack.c.bf16 %v9345_v47, %v9344_v46  ;;  %v9196_v46 = vld [vmem:[%s16615_s6 + $0xa0] sm:$0xff]  ;;  %v9197_v47 = vld [vmem:[%s16615_s6 + $0xa8] sm:$0xff] }
 0x6e7   : > { %12853 = vmatpush3.bf16.msra.mxu0 %v12850_v49  ;;  %v9156_v49 = vld [vmem:[%s16616_s7 + $0x40] sm:$0xff] }
 0x6e8   : > { %12859 = vmatprep.subr.bf16.mxu0 %v12858_v52  ;;  %v12798_v54 = vpack.c.bf16 %v9157_v50, %v9156_v49  ;;  %v9199_v49 = vld [vmem:[%s16615_s6 + $0xb8] sm:$0xff]  ;;  %v9218_v50 = vld [vmem:[%s16615_s6 + $0xc0] sm:$0xff] }
 0x6ea   : > { %11441 = vmatmul.mubr.msk.f32.vlgmr.msra.gmra.mrb[16].mxu0 %vm2267_vm1, %v14457_v29 }
 0x6eb   : > { %12861 = vmatpush3.bf16.msra.mxu0 %v12858_v52  ;;  %11475 = vmatprep.mubr.msk.f32.mxu0 %vm2267_vm1, %v14455_v28 }
 0x6ec   : > { %12863 = vmatprep.subr.bf16.mxu0 %v12862_v43 }
 0x6ef   : > { %12865 = vmatpush3.bf16.msra.mxu0 %v12862_v43  ;;  %v9158_v43 = vld [vmem:[%s16616_s7 + $0x50] sm:$0xff] }
 0x6f0   : > { %12867 = vmatprep.subr.bf16.mxu0 %v12866_v57  ;;  %v12802_v58 = vpack.c.bf16 %v9159_v55, %v9158_v43  ;;  %v9223_v43 = vld [vmem:[%s16615_s6 + $0xe8] sm:$0xff]  ;;  %v9224_v55 = vld [vmem:[%s16615_s6 + $0xf0] sm:$0xff] }
 0x6f3   : > { %12869 = vmatpush3.bf16.msra.mxu0 %v12866_v57  ;;  %v2351_v57 = vld [vmem:[%s16615_s6 + $0x10] sm:$0xff] }
 0x6f4   : > { %12871 = vmatprep.subr.bf16.mxu0 %v12870_v60 }
 0x6f7   : > { %12873 = vmatpush3.bf16.msra.mxu0 %v12870_v60  ;;  %v9161_v60 = vld [vmem:[%s16616_s7 + $0x68] sm:$0xff] }
 0x6f8   : > { %12879 = vmatprep.subr.bf16.mxu0 %v12878_v63 }
 0x6fa   : > { %11476 = vmatmul.mubr.msk.f32.vlgmr.msra.gmra.mrb[18].mxu0 %vm2267_vm1, %v14457_v29 }
 0x6fb   : > { %12881 = vmatpush3.bf16.msra.mxu0 %v12878_v63  ;;  %11510 = vmatprep.mubr.msk.f32.mxu0 %vm2267_vm1, %v14455_v28  ;;  %v12806_v63 = vpack.c.bf16 %v9161_v60, %v9160_v59  ;;  %v9246_v59 = vld [vmem:[%s16615_s6 + $0x110] sm:$0xff]  ;;  %v9247_v60 = vld [vmem:[%s16615_s6 + $0x118] sm:$0xff] }
 0x6fc   : > { %12883 = vmatprep.subr.bf16.mxu0 %v12882_v2 }
 0x6ff   : > { %12885 = vmatpush3.bf16.msra.mxu0 %v12882_v2  ;;  %v2354_v2 = vld [vmem:[%s16615_s6 + $0x28] sm:$0xff] }
 0x700   : > { %12887 = vmatprep.subr.bf16.mxu0 %v12886_v5 }
 0x703   : > { %12889 = vmatpush3.bf16.msra.mxu0 %v12886_v5 }
 0x704   : > { %12891 = vmatprep.subr.bf16.mxu0 %v12890_v7 }
 0x707   : > { %12893 = vmatpush3.bf16.msra.mxu0 %v12890_v7 }
 0x708   : > { %12899 = vmatprep.subr.bf16.mxu0 %v12898_v10 }
 0x70a   : > { %11511 = vmatmul.mubr.msk.f32.vlgmr.msra.gmra.mrb[20].mxu0 %vm2267_vm1, %v14457_v29 }
 0x70b   : > { %12901 = vmatpush3.bf16.msra.mxu0 %v12898_v10  ;;  %11545 = vmatprep.mubr.msk.f32.mxu0 %vm2267_vm1, %v14455_v28 }
 0x70c   : > { %12903 = vmatprep.subr.bf16.mxu0 %v12902_v13 }
 0x70f   : > { %12905 = vmatpush3.bf16.msra.mxu0 %v12902_v13 }
 0x710   : > { %12907 = vmatprep.subr.bf16.mxu0 %v12906_v16 }
 0x713   : > { %12909 = vmatpush3.bf16.msra.mxu0 %v12906_v16 }
 0x714   : > { %12911 = vmatprep.subr.bf16.mxu0 %v12910_v19 }
 0x717   : > { %12913 = vmatpush3.bf16.msra.mxu0 %v12910_v19 }
 0x718   : > { %12919 = vmatprep.subr.bf16.mxu0 %v12918_v22 }
 0x71a   : > { %11546 = vmatmul.mubr.msk.f32.vlgmr.msra.gmra.mrb[22].mxu0 %vm2267_vm1, %v14457_v29 }
 0x71b   : > { %12921 = vmatpush3.bf16.msra.mxu0 %v12918_v22  ;;  %11580 = vmatprep.mubr.msk.f32.mxu0 %vm2267_vm1, %v14455_v28 }
 0x71c   : > { %12923 = vmatprep.subr.bf16.mxu0 %v12922_v25 }
 0x71f   : > { %12925 = vmatpush3.bf16.msra.mxu0 %v12922_v25 }
 0x720   : > { %12927 = vmatprep.subr.bf16.mxu0 %v12926_v32 }
 0x723   : > { %12929 = vmatpush3.bf16.msra.mxu0 %v12926_v32  ;;  %v4350_v32 = vld [vmem:[%s16619_s10] sm:$0xff] }
 0x724   : > { %12931 = vmatprep.subr.bf16.mxu0 %v12930_v35 }
 0x727   : > { %12933 = vmatpush3.bf16.msra.mxu0 %v12930_v35  ;;  %v12958_v35 = vpack.c.bf16 %v4351_v33, %v4350_v32  ;;  %v9354_v32 = vld [vmem:[%s16615_s6 + $0x230] sm:$0xff]  ;;  %v9355_v33 = vld [vmem:[%s16615_s6 + $0x238] sm:$0xff] }
 0x728   : > { %12939 = vmatprep.subr.bf16.mxu0 %v12938_v39 }
 0x72a   : > { %11581 = vmatmul.mubr.msk.f32.vlgmr.msra.gmra.mrb[24].mxu0 %vm2267_vm1, %v14457_v29 }
 0x72b   : > { %12941 = vmatpush3.bf16.msra.mxu0 %v12938_v39  ;;  %11615 = vmatprep.mubr.msk.f32.mxu0 %vm2267_vm1, %v14455_v28  ;;  %v9171_v39 = vld [vmem:[%s16615_s6 + $0x68] sm:$0xff] }
 0x72c   : > { %12943 = vmatprep.subr.bf16.mxu0 %v12942_v27 }
 0x72f   : > { %12945 = vmatpush3.bf16.msra.mxu0 %v12942_v27  ;;  %v9192_v27 = vld [vmem:[%s16615_s6 + $0x80] sm:$0xff] }
 0x730   : > { %12947 = vmatprep.subr.bf16.mxu0 %v12946_v45 }
 0x733   : > { %12949 = vmatpush3.bf16.msra.mxu0 %v12946_v45  ;;  %v9195_v45 = vld [vmem:[%s16615_s6 + $0x98] sm:$0xff] }
 0x734   : > { %12951 = vmatprep.subr.bf16.mxu0 %v12950_v30 }
 0x737   : > { %12953 = vmatpush3.bf16.msra.mxu0 %v12950_v30  ;;  %v9198_v30 = vld [vmem:[%s16615_s6 + $0xb0] sm:$0xff] }
 0x738   : > { %12959 = vmatprep.subr.bf16.mxu0 %v12958_v35 }
 0x73a   : > { %11616 = vmatmul.mubr.msk.f32.vlgmr.msra.gmra.mrb[26].mxu0 %vm2267_vm1, %v14457_v29 }
 0x73b   : > { %12961 = vmatpush3.bf16.msra.mxu0 %v12958_v35  ;;  %v4353_v35 = vld [vmem:[%s16619_s10 + $0x18] sm:$0xff] }
 0x79d   : > { %v11337_v51 = vpop.f32.mrb[12].mxu0 }
 0x79e   : > { %v2340_v52 = vpop.f32.mrb[13].mxu0 }
 0x79f   : > { %v12794_v53 = vpack.c.bf16 %v11337_v51, %v2340_v52  ;;  %v9219_v51 = vld [vmem:[%s16615_s6 + $0xc8] sm:$0xff]  ;;  %v9220_v52 = vld [vmem:[%s16615_s6 + $0xd0] sm:$0xff] }
 0x7a1   : > { %12795 = vmatprep.subr.bf16.mxu1 %v12794_v53 }
 0x7a2   : > { %12797 = vmatpush3.bf16.msra.mxu1 %v12794_v53  ;;  %v9221_v53 = vld [vmem:[%s16615_s6 + $0xd8] sm:$0xff] }
 0x7a3   : > { %12799 = vmatprep.subr.bf16.mxu1 %v12798_v54 }
 0x7a5   : > { %11343 = vmatmul.mubr.msk.f32.vlgmr.msra.gmra.mrb[16].mxu1 %vm741_vm0, %v2350_v56  ;;  %v9225_v56 = vld [vmem:[%s16615_s6 + $0xf8] sm:$0xff] }
 0x7a6   : > { %12801 = vmatpush3.bf16.msra.mxu1 %v12798_v54  ;;  %11345 = vmatprep.mubr.msk.f32.mxu1 %vm741_vm0, %v2351_v57  ;;  %v9222_v54 = vld [vmem:[%s16615_s6 + $0xe0] sm:$0xff] }
 0x7a7   : > { %12803 = vmatprep.subr.bf16.mxu1 %v12802_v58  ;;  %v9244_v57 = vld [vmem:[%s16615_s6 + $0x100] sm:$0xff] }
 0x7a9   : > { %11346 = vmatmul.mubr.msk.f32.gmra.mrb[18].mxu1 %vm741_vm0, %v2352_v61  ;;  %v9248_v61 = vld [vmem:[%s16615_s6 + $0x120] sm:$0xff] }
 0x7aa   : > { %12805 = vmatpush3.bf16.msra.mxu1 %v12802_v58  ;;  %11348 = vmatprep.mubr.msk.f32.mxu1 %vm741_vm0, %v2353_v62  ;;  %v9245_v58 = vld [vmem:[%s16615_s6 + $0x108] sm:$0xff] }
 0x7ab   : > { %12807 = vmatprep.subr.bf16.mxu1 %v12806_v63  ;;  %v9249_v62 = vld [vmem:[%s16615_s6 + $0x128] sm:$0xff] }
 0x7ad   : > { %v11407_v5 = vpop.f32.mrb[14].mxu0  ;;  %11349 = vmatmul.mubr.msk.f32.gmra.mrb[20].mxu1 %vm741_vm0, %v2354_v2  ;;  %v9271_v2 = vld [vmem:[%s16615_s6 + $0x148] sm:$0xff] }
 0x7ae   : > { %v2799_v48 = vpop.f32.mrb[15].mxu0  ;;  %12809 = vmatpush3.bf16.msra.mxu1 %v12806_v63  ;;  %11351 = vmatprep.mubr.msk.f32.mxu1 %vm741_vm0, %v2355_v3  ;;  %v9250_v63 = vld [vmem:[%s16615_s6 + $0x130] sm:$0xff] }
 0x7af   : > { %v12834_v7 = vpack.c.bf16 %v11407_v5, %v2799_v48  ;;  %12811 = vmatprep.subr.bf16.mxu1 %v12810_v4  ;;  %v9272_v3 = vld [vmem:[%s16615_s6 + $0x150] sm:$0xff]  ;;  %v9274_v5 = vld [vmem:[%s16615_s6 + $0x160] sm:$0xff]  ;;  %v9275_v48 = vld [vmem:[%s16615_s6 + $0x168] sm:$0xff] }
 0x7b1   : > { %11352 = vmatmul.mubr.msk.f32.gmra.mrb[22].mxu1 %vm741_vm0, %v2356_v6  ;;  %v9276_v6 = vld [vmem:[%s16615_s6 + $0x170] sm:$0xff] }
 0x7b2   : > { %12813 = vmatpush3.bf16.msra.mxu1 %v12810_v4  ;;  %11370 = vmatprep.mubr.msk.f32.mxu1 %vm2267_vm1, %v14455_v28  ;;  %v9273_v4 = vld [vmem:[%s16615_s6 + $0x158] sm:$0xff] }
 0x7b5   : > { %11371 = vmatmul.mubr.msk.f32.vlgmr.msra.gmra.mrb[24].mxu1 %vm2267_vm1, %v14457_v29 }
 0x7b6   : > { %11377 = vmatprep.mubr.msk.f32.mxu1 %vm741_vm0, %v9166_v23  ;;  %v9349_v23 = vld [vmem:[%s16615_s6 + $0x208] sm:$0xff] }
 0x7bd   : > { %v11442_v8 = vpop.f32.mrb[16].mxu0 }
 0x7be   : > { %v3029_v9 = vpop.f32.mrb[17].mxu0 }
 0x7bf   : > { %v12854_v10 = vpack.c.bf16 %v11442_v8, %v3029_v9  ;;  %v9296_v8 = vld [vmem:[%s16615_s6 + $0x180] sm:$0xff]  ;;  %v9297_v9 = vld [vmem:[%s16615_s6 + $0x188] sm:$0xff] }
 0x7cd   : > { %v11477_v11 = vpop.f32.mrb[18].mxu0 }
 0x7ce   : > { %v3259_v12 = vpop.f32.mrb[19].mxu0 }
 0x7cf   : > { %v14707_v13 = vpack.c.bf16 %v11477_v11, %v3259_v12  ;;  %v9299_v11 = vld [vmem:[%s16615_s6 + $0x198] sm:$0xff]  ;;  %v9300_v12 = vld [vmem:[%s16615_s6 + $0x1a0] sm:$0xff] }
 0x7dd   : > { %v11512_v14 = vpop.f32.mrb[20].mxu0 }
 0x7de   : > { %v3489_v15 = vpop.f32.mrb[21].mxu0 }
 0x7df   : > { %v14709_v16 = vpack.c.bf16 %v11512_v14, %v3489_v15  ;;  %v9302_v14 = vld [vmem:[%s16615_s6 + $0x1b0] sm:$0xff]  ;;  %v9303_v15 = vld [vmem:[%s16615_s6 + $0x1b8] sm:$0xff] }
 0x7ed   : > { %v11547_v17 = vpop.f32.mrb[22].mxu0 }
 0x7ee   : > { %v3719_v18 = vpop.f32.mrb[23].mxu0 }
 0x7ef   : > { %v14711_v19 = vpack.c.bf16 %v11547_v17, %v3719_v18  ;;  %v9323_v17 = vld [vmem:[%s16615_s6 + $0x1c8] sm:$0xff]  ;;  %v9324_v18 = vld [vmem:[%s16615_s6 + $0x1d0] sm:$0xff] }
 0x7fd   : > { %v11582_v20 = vpop.f32.mrb[24].mxu0 }
 0x7fe   : > { %v3949_v28 = vpop.f32.mrb[25].mxu0 }
 0x7ff   : > { %v14713_v21 = vpack.c.bf16 %v11582_v20, %v3949_v28  ;;  %v9326_v20 = vld [vmem:[%s16615_s6 + $0x1e0] sm:$0xff]  ;;  %v9327_v28 = vld [vmem:[%s16615_s6 + $0x1e8] sm:$0xff] }
 0x80d   : > { %v11617_v29 = vpop.f32.mrb[26].mxu0 }
 0x80e   : > { %v4179_v22 = vpop.f32.mrb[27].mxu0 }
 0x80f   : > { %v14718_v24 = vpack.c.bf16 %v11617_v29, %v4179_v22  ;;  %v9329_v29 = vld [vmem:[%s16615_s6 + $0x1f8] sm:$0xff]  ;;  %v9348_v22 = vld [vmem:[%s16615_s6 + $0x200] sm:$0xff] }
 0x888   : > { %v11372_v25 = vpop.f32.mrb[24].mxu1 }
 0x889   : > { %v2569_v26 = vpop.f32.mrb[25].mxu1 }
 0x88a   : > { %v12814_v31 = vpack.c.bf16 %v11372_v25, %v2569_v26  ;;  %v9351_v25 = vld [vmem:[%s16615_s6 + $0x218] sm:$0xff]  ;;  %v9352_v26 = vld [vmem:[%s16615_s6 + $0x220] sm:$0xff] }
 0x88c   : > { %12815 = vmatprep.subr.bf16.mxu1 %v12814_v31 }
 0x88d   : > { %12817 = vmatpush3.bf16.msra.mxu1 %v12814_v31  ;;  %v9353_v31 = vld [vmem:[%s16615_s6 + $0x228] sm:$0xff] }
 0x88e   : > { %12835 = vmatprep.subr.bf16.mxu1 %v12834_v7 }
 0x890   : > { %11378 = vmatmul.mubr.msk.f32.vlgmr.msra.gmra.mrb[16].mxu1 %vm741_vm0, %v9167_v34  ;;  %v4352_v34 = vld [vmem:[%s16619_s10 + $0x10] sm:$0xff] }
 0x891   : > { %12837 = vmatpush3.bf16.msra.mxu1 %v12834_v7  ;;  %11380 = vmatprep.mubr.msk.f32.mxu1 %vm741_vm0, %v9168_v36  ;;  %v9277_v7 = vld [vmem:[%s16615_s6 + $0x178] sm:$0xff]  ;;  %v12962_v36 = vpack.c.bf16 %v4353_v35, %v4352_v34  ;;  %v4502_v34 = vld [vmem:[%s16618_s9 + $0x90] sm:$0xff] }
 0x892   : > { %12855 = vmatprep.subr.bf16.mxu1 %v12854_v10  ;;  %v4503_v35 = vld [vmem:[%s16618_s9 + $0x98] sm:$0xff] }
 0x893   : > { %12963 = vmatprep.subr.bf16.mxu0 %v12962_v36 }
 0x894   : > { %11381 = vmatmul.mubr.msk.f32.gmra.mrb[18].mxu1 %vm741_vm0, %v9169_v37  ;;  %12965 = vmatpush3.bf16.msra.mxu0 %v12962_v36  ;;  %v9145_v37 = vld [vmem:[%s16617_s8] ss:$0 sm:$0xff] }
 0x895   : > { %11383 = vmatprep.mubr.msk.f32.mxu1 %vm741_vm0, %v9170_v38  ;;  %v4504_v36 = vld [vmem:[%s16618_s9 + $0xa0] sm:$0xff] }
 0x898   : > { %11384 = vmatmul.mubr.msk.f32.gmra.mrb[20].mxu1 %vm741_vm0, %v9171_v39 }
 0x899   : > { %11386 = vmatprep.mubr.msk.f32.mxu1 %vm741_vm0, %v9172_v40 }
 0x89c   : > { %11387 = vmatmul.mubr.msk.f32.gmra.mrb[22].mxu1 %vm741_vm0, %v9173_v41 }
 0x89d   : > { %11412 = vmatprep.mubr.msk.f32.mxu1 %vm741_vm0, %v9192_v27 }
 0x8a0   : > { %11413 = vmatmul.mubr.msk.f32.vlgmr.msra.gmra.mrb[16].mxu1 %vm741_vm0, %v9193_v42 }
 0x8a1   : > { %12857 = vmatpush3.bf16.msra.mxu1 %v12854_v10  ;;  %11415 = vmatprep.mubr.msk.f32.mxu1 %vm741_vm0, %v9194_v44  ;;  %v9298_v10 = vld [vmem:[%s16615_s6 + $0x190] sm:$0xff] }
 0x8a2   : > { %12875 = vmatprep.subr.bf16.mxu1 %v14707_v13 }
 0x8a4   : > { %11416 = vmatmul.mubr.msk.f32.gmra.mrb[18].mxu1 %vm741_vm0, %v9195_v45 }
 0x8a5   : > { %11418 = vmatprep.mubr.msk.f32.mxu1 %vm741_vm0, %v9196_v46 }
 0x8a8   : > { %11419 = vmatmul.mubr.msk.f32.gmra.mrb[20].mxu1 %vm741_vm0, %v9197_v47 }
 0x8a9   : > { %11421 = vmatprep.mubr.msk.f32.mxu1 %vm741_vm0, %v9198_v30 }
 0x8ac   : > { %11422 = vmatmul.mubr.msk.f32.gmra.mrb[22].mxu1 %vm741_vm0, %v9199_v49 }
 0x8ad   : > { %11447 = vmatprep.mubr.msk.f32.mxu1 %vm741_vm0, %v9218_v50 }
 0x8b0   : > { %11448 = vmatmul.mubr.msk.f32.vlgmr.msra.gmra.mrb[16].mxu1 %vm741_vm0, %v9219_v51 }
 0x8b1   : > { %12877 = vmatpush3.bf16.msra.mxu1 %v14707_v13  ;;  %11450 = vmatprep.mubr.msk.f32.mxu1 %vm741_vm0, %v9220_v52  ;;  %v9301_v13 = vld [vmem:[%s16615_s6 + $0x1a8] sm:$0xff] }
 0x8b2   : > { %12895 = vmatprep.subr.bf16.mxu1 %v14709_v16 }
 0x8b4   : > { %11451 = vmatmul.mubr.msk.f32.gmra.mrb[18].mxu1 %vm741_vm0, %v9221_v53 }
 0x8b5   : > { %11453 = vmatprep.mubr.msk.f32.mxu1 %vm741_vm0, %v9222_v54 }
 0x8b8   : > { %11454 = vmatmul.mubr.msk.f32.gmra.mrb[20].mxu1 %vm741_vm0, %v9223_v43 }
 0x8b9   : > { %11456 = vmatprep.mubr.msk.f32.mxu1 %vm741_vm0, %v9224_v55 }
 0x8bc   : > { %11457 = vmatmul.mubr.msk.f32.gmra.mrb[22].mxu1 %vm741_vm0, %v9225_v56 }
 0x8bd   : > { %11482 = vmatprep.mubr.msk.f32.mxu1 %vm741_vm0, %v9244_v57 }
 0x8c0   : > { %11483 = vmatmul.mubr.msk.f32.vlgmr.msra.gmra.mrb[16].mxu1 %vm741_vm0, %v9245_v58 }
 0x8c1   : > { %12897 = vmatpush3.bf16.msra.mxu1 %v14709_v16  ;;  %11485 = vmatprep.mubr.msk.f32.mxu1 %vm741_vm0, %v9246_v59  ;;  %v9322_v16 = vld [vmem:[%s16615_s6 + $0x1c0] sm:$0xff] }
 0x8c2   : > { %12915 = vmatprep.subr.bf16.mxu1 %v14711_v19 }
 0x8c4   : > { %11486 = vmatmul.mubr.msk.f32.gmra.mrb[18].mxu1 %vm741_vm0, %v9247_v60 }
 0x8c5   : > { %11488 = vmatprep.mubr.msk.f32.mxu1 %vm741_vm0, %v9248_v61  ;;  %v4484_v61 = vld [vmem:[%s16618_s9] sm:$0xff] }
 0x8c8   : > { %11489 = vmatmul.mubr.msk.f32.gmra.mrb[20].mxu1 %vm741_vm0, %v9249_v62 }
 0x8c9   : > { %11491 = vmatprep.mubr.msk.f32.mxu1 %vm741_vm0, %v9250_v63 }
 0x8cc   : > { %11492 = vmatmul.mubr.msk.f32.gmra.mrb[22].mxu1 %vm741_vm0, %v9251_v0 }
 0x8cd   : > { %11517 = vmatprep.mubr.msk.f32.mxu1 %vm741_vm0, %v9270_v1 }
 0x8d0   : > { %11518 = vmatmul.mubr.msk.f32.vlgmr.msra.gmra.mrb[16].mxu1 %vm741_vm0, %v9271_v2 }
 0x8d1   : > { %12917 = vmatpush3.bf16.msra.mxu1 %v14711_v19  ;;  %11520 = vmatprep.mubr.msk.f32.mxu1 %vm741_vm0, %v9272_v3  ;;  %v9325_v19 = vld [vmem:[%s16615_s6 + $0x1d8] sm:$0xff] }
 0x8d2   : > { %12935 = vmatprep.subr.bf16.mxu1 %v14713_v21 }
 0x8d4   : > { %11521 = vmatmul.mubr.msk.f32.gmra.mrb[18].mxu1 %vm741_vm0, %v9273_v4 }
 0x8d5   : > { %11523 = vmatprep.mubr.msk.f32.mxu1 %vm741_vm0, %v9274_v5 }
 0x8d8   : > { %11524 = vmatmul.mubr.msk.f32.gmra.mrb[20].mxu1 %vm741_vm0, %v9275_v48 }
 0x8d9   : > { %11526 = vmatprep.mubr.msk.f32.mxu1 %vm741_vm0, %v9276_v6  ;;  %v9405_v6 = vld [vmem:[%s16619_s10 + $0x20] sm:$0xff] }
 0x8dc   : > { %11527 = vmatmul.mubr.msk.f32.gmra.mrb[22].mxu1 %vm741_vm0, %v9277_v7  ;;  %v9406_v7 = vld [vmem:[%s16619_s10 + $0x28] sm:$0xff] }
 0x8dd   : > { %11552 = vmatprep.mubr.msk.f32.mxu1 %vm741_vm0, %v9296_v8 }
 0x8e0   : > { %11553 = vmatmul.mubr.msk.f32.vlgmr.msra.gmra.mrb[16].mxu1 %vm741_vm0, %v9297_v9 }
 0x8e1   : > { %12937 = vmatpush3.bf16.msra.mxu1 %v14713_v21  ;;  %11555 = vmatprep.mubr.msk.f32.mxu1 %vm741_vm0, %v9298_v10  ;;  %v9328_v21 = vld [vmem:[%s16615_s6 + $0x1f0] sm:$0xff] }
 0x8e2   : > { %12955 = vmatprep.subr.bf16.mxu1 %v14718_v24 }
 0x8e4   : > { %11556 = vmatmul.mubr.msk.f32.gmra.mrb[18].mxu1 %vm741_vm0, %v9299_v11  ;;  %v12982_v11 = vpack.c.bf16 %v9406_v7, %v9405_v6  ;;  %v9483_v6 = vld [vmem:[%s16619_s10 + $0x50] sm:$0xff]  ;;  %v9484_v7 = vld [vmem:[%s16619_s10 + $0x58] sm:$0xff] }
 0x8e5   : > { %11558 = vmatprep.mubr.msk.f32.mxu1 %vm741_vm0, %v9300_v12  ;;  %v9407_v12 = vld [vmem:[%s16619_s10 + $0x30] sm:$0xff] }
 0x8e8   : > { %11559 = vmatmul.mubr.msk.f32.gmra.mrb[20].mxu1 %vm741_vm0, %v9301_v13  ;;  %v9408_v13 = vld [vmem:[%s16619_s10 + $0x38] sm:$0xff] }
 0x8e9   : > { %11561 = vmatprep.mubr.msk.f32.mxu1 %vm741_vm0, %v9302_v14  ;;  %v4485_v14 = vld [vmem:[%s16618_s9 + $0x8] sm:$0xff] }
 0x8ec   : > { %11562 = vmatmul.mubr.msk.f32.gmra.mrb[22].mxu1 %vm741_vm0, %v9303_v15  ;;  %v4486_v15 = vld [vmem:[%s16618_s9 + $0x10] sm:$0xff] }
 0x8ed   : > { %11587 = vmatprep.mubr.msk.f32.mxu1 %vm741_vm0, %v9322_v16  ;;  %v12986_v16 = vpack.c.bf16 %v9408_v13, %v9407_v12  ;;  %v9421_v12 = vld [vmem:[%s16618_s9 + $0x120] sm:$0xff]  ;;  %v9422_v13 = vld [vmem:[%s16618_s9 + $0x128] sm:$0xff] }
 0x8f0   : > { %11588 = vmatmul.mubr.msk.f32.vlgmr.msra.gmra.mrb[16].mxu1 %vm741_vm0, %v9323_v17  ;;  %v4487_v17 = vld [vmem:[%s16618_s9 + $0x18] sm:$0xff] }
 0x8f1   : > { %12957 = vmatpush3.bf16.msra.mxu1 %v14718_v24  ;;  %11590 = vmatprep.mubr.msk.f32.mxu1 %vm741_vm0, %v9324_v18  ;;  %v9350_v24 = vld [vmem:[%s16615_s6 + $0x210] sm:$0xff]  ;;  %v4488_v18 = vld [vmem:[%s16618_s9 + $0x20] sm:$0xff] }
 0x8f4   : > { %11591 = vmatmul.mubr.msk.f32.gmra.mrb[18].mxu1 %vm741_vm0, %v9325_v19  ;;  %v4489_v19 = vld [vmem:[%s16618_s9 + $0x28] sm:$0xff] }
 0x8f5   : > { %11593 = vmatprep.mubr.msk.f32.mxu1 %vm741_vm0, %v9326_v20  ;;  %v4490_v20 = vld [vmem:[%s16618_s9 + $0x30] sm:$0xff] }
 0x8f8   : > { %11594 = vmatmul.mubr.msk.f32.gmra.mrb[20].mxu1 %vm741_vm0, %v9327_v28  ;;  %v4491_v28 = vld [vmem:[%s16618_s9 + $0x38] sm:$0xff] }
 0x8f9   : > { %11596 = vmatprep.mubr.msk.f32.mxu1 %vm741_vm0, %v9328_v21  ;;  %v4492_v21 = vld [vmem:[%s16618_s9 + $0x40] sm:$0xff] }
 0x8fc   : > { %11597 = vmatmul.mubr.msk.f32.gmra.mrb[22].mxu1 %vm741_vm0, %v9329_v29  ;;  %v4493_v29 = vld [vmem:[%s16618_s9 + $0x48] sm:$0xff] }
 0x8fd   : > { %11622 = vmatprep.mubr.msk.f32.mxu1 %vm741_vm0, %v9348_v22  ;;  %v4494_v22 = vld [vmem:[%s16618_s9 + $0x50] sm:$0xff] }
 0x900   : > { %11623 = vmatmul.mubr.msk.f32.vlgmr.msra.gmra.mrb[16].mxu1 %vm741_vm0, %v9349_v23  ;;  %v4495_v23 = vld [vmem:[%s16618_s9 + $0x58] sm:$0xff] }
 0x901   : > { %11625 = vmatprep.mubr.msk.f32.mxu1 %vm741_vm0, %v9350_v24  ;;  %v4496_v24 = vld [vmem:[%s16618_s9 + $0x60] sm:$0xff] }
 0x904   : > { %11626 = vmatmul.mubr.msk.f32.gmra.mrb[18].mxu1 %vm741_vm0, %v9351_v25  ;;  %v4497_v25 = vld [vmem:[%s16618_s9 + $0x68] sm:$0xff] }
 0x905   : > { %11628 = vmatprep.mubr.msk.f32.mxu1 %vm741_vm0, %v9352_v26  ;;  %v4498_v26 = vld [vmem:[%s16618_s9 + $0x70] sm:$0xff] }
 0x908   : > { %11629 = vmatmul.mubr.msk.f32.gmra.mrb[20].mxu1 %vm741_vm0, %v9353_v31  ;;  %v4499_v31 = vld [vmem:[%s16618_s9 + $0x78] sm:$0xff] }
 0x909   : > { %11631 = vmatprep.mubr.msk.f32.mxu1 %vm741_vm0, %v9354_v32  ;;  %v4500_v32 = vld [vmem:[%s16618_s9 + $0x80] sm:$0xff] }
 0x90c   : > { %11632 = vmatmul.mubr.msk.f32.gmra.mrb[22].mxu1 %vm741_vm0, %v9355_v33  ;;  %v4501_v33 = vld [vmem:[%s16618_s9 + $0x88] sm:$0xff] }
 0x90d   : > { %11670 = vmatprep.mubr.msk.f32.mxu1 %vm2267_vm1, %v4484_v61 }
 0x9d3   : > { %v11624_v38 = vpop.f32.mrb[16].mxu1 }
 0x9d4   : > { %v13176_v39 = vadd.f32 %v11624_v38, %v9145_v37  ;;  %v4287_v40 = vpop.f32.mrb[17].mxu1  ;;  %v4506_v38 = vld [vmem:[%s16618_s9 + $0xb0] sm:$0xff] }
 0x9d5   : > { %v13177_v41 = vadd.f32 %v9145_v37, %v4287_v40  ;;  %v4508_v40 = vld [vmem:[%s16618_s9 + $0xc0] sm:$0xff] }
 0x9d6   : > { %v15000_v44 = vmax.f32 %v13176_v39, 0.0  ;;  %v4507_v39 = vld [vmem:[%s16618_s9 + $0xb8] sm:$0xff] }
 0x9d7   : > { %v14998_v27 = vmax.f32 %v13177_v41, 0.0  ;;  %v11627_v42 = vpop.f32.mrb[18].mxu1  ;;  %v4509_v41 = vld [vmem:[%s16618_s9 + $0xc8] sm:$0xff] }
 0x9d8   : > { %v13178_v45 = vadd.f32 %v11627_v42, %v9145_v37  ;;  %v4297_v46 = vpop.f32.mrb[19].mxu1  ;;  %v4510_v42 = vld [vmem:[%s16618_s9 + $0xd0] sm:$0xff] }
 0x9d9   : > { %v13179_v47 = vadd.f32 %v9145_v37, %v4297_v46  ;;  %11642 = vmatprep.mubr.msk.f32.mxu0 %vm4354_vm2, %v14998_v27  ;;  %v4512_v46 = vld [vmem:[%s16618_s9 + $0xe0] sm:$0xff] }
 0x9da   : > { %11643 = vmatmul.mubr.msk.f32.vlgmr.msra.gmra.mrb[28].mxu0 %vm4354_vm2, %v15000_v44  ;;  %v15008_v50 = vmax.f32 %v13178_v45, 0.0  ;;  %v4511_v45 = vld [vmem:[%s16618_s9 + $0xd8] sm:$0xff] }
 0x9db   : > { %v15006_v30 = vmax.f32 %v13179_v47, 0.0  ;;  %v11630_v49 = vpop.f32.mrb[20].mxu1  ;;  %v4513_v47 = vld [vmem:[%s16618_s9 + $0xe8] sm:$0xff] }
 0x9dc   : > { %v13180_v51 = vadd.f32 %v11630_v49, %v9145_v37  ;;  %v4307_v52 = vpop.f32.mrb[21].mxu1  ;;  %v4514_v49 = vld [vmem:[%s16618_s9 + $0xf0] sm:$0xff] }
 0x9dd   : > { %v13181_v53 = vadd.f32 %v9145_v37, %v4307_v52  ;;  %11645 = vmatprep.mubr.msk.f32.mxu0 %vm4354_vm2, %v15006_v30  ;;  %v9417_v52 = vld [vmem:[%s16618_s9 + $0x100] sm:$0xff] }
 0x9de   : > { %11646 = vmatmul.mubr.msk.f32.gmra.mrb[30].mxu0 %vm4354_vm2, %v15008_v50  ;;  %v15016_v55 = vmax.f32 %v13180_v51, 0.0  ;;  %v4515_v51 = vld [vmem:[%s16618_s9 + $0xf8] sm:$0xff] }
 0x9df   : > { %v15014_v54 = vmax.f32 %v13181_v53, 0.0  ;;  %v11633_v43 = vpop.f32.mrb[22].mxu1 }
 0x9e0   : > { %v13182_v56 = vadd.f32 %v11633_v43, %v9145_v37  ;;  %v4317_v57 = vpop.f32.mrb[23].mxu1 }
 0x9e1   : > { %v13183_v58 = vadd.f32 %v9145_v37, %v4317_v57  ;;  %11648 = vmatprep.mubr.msk.f32.mxu0 %vm4354_vm2, %v15014_v54  ;;  %v4505_v37 = vld [vmem:[%s16618_s9 + $0xa8] sm:$0xff] }
 0x9e2   : > { %11649 = vmatmul.mubr.msk.f32.gmra.mrb[32].mxu0 %vm4354_vm2, %v15016_v55  ;;  %v15024_v60 = vmax.f32 %v13182_v56, 0.0 }
 0x9e3   : > { %v15022_v59 = vmax.f32 %v13183_v58, 0.0 }
 0x9e5   : > { %11651 = vmatprep.mubr.msk.f32.mxu0 %vm4354_vm2, %v15022_v59 }
 0x9e6   : > { %11652 = vmatmul.mubr.msk.f32.gmra.mrb[34].mxu0 %vm4354_vm2, %v15024_v60 }
 0xaad   : > { %v11644_v62 = vpop.f32.mrb[28].mxu0 }
 0xaae   : > { %v4445_v63 = vpop.f32.mrb[29].mxu0 }
 0xaaf   : > { %v12966_v0 = vpack.c.bf16 %v11644_v62, %v4445_v63 }
 0xab1   : > { %v11647_v1 = vpop.f32.mrb[30].mxu0  ;;  %12967 = vmatprep.subr.bf16.mxu1 %v12966_v0 }
 0xab2   : > { %v4455_v2 = vpop.f32.mrb[31].mxu0  ;;  %12969 = vmatpush3.bf16.msra.mxu1 %v12966_v0 }
 0xab3   : > { %v12970_v3 = vpack.c.bf16 %v11647_v1, %v4455_v2  ;;  %v9481_v1 = vld [vmem:[%s16619_s10 + $0x40] sm:$0xff]  ;;  %v9482_v2 = vld [vmem:[%s16619_s10 + $0x48] sm:$0xff] }
 0xab5   : > { %v11650_v4 = vpop.f32.mrb[32].mxu0  ;;  %12971 = vmatprep.subr.bf16.mxu1 %v12970_v3 }
 0xab6   : > { %v4465_v5 = vpop.f32.mrb[33].mxu0  ;;  %12973 = vmatpush3.bf16.msra.mxu1 %v12970_v3 }
 0xab7   : > { %v12974_v48 = vpack.c.bf16 %v11650_v4, %v4465_v5 }
 0xab9   : > { %v11653_v8 = vpop.f32.mrb[34].mxu0  ;;  %12975 = vmatprep.subr.bf16.mxu1 %v12974_v48 }
 0xaba   : > { %v4475_v9 = vpop.f32.mrb[35].mxu0  ;;  %12977 = vmatpush3.bf16.msra.mxu1 %v12974_v48  ;;  %v13006_v48 = vpack.c.bf16 %v9482_v2, %v9481_v1  ;;  %v9559_v1 = vld [vmem:[%s16619_s10 + $0x70] sm:$0xff]  ;;  %v9560_v2 = vld [vmem:[%s16619_s10 + $0x78] sm:$0xff] }
 0xabb   : > { %v12978_v10 = vpack.c.bf16 %v11653_v8, %v4475_v9  ;;  %v9418_v8 = vld [vmem:[%s16618_s9 + $0x108] sm:$0xff]  ;;  %v9419_v9 = vld [vmem:[%s16618_s9 + $0x110] sm:$0xff] }
 0xabd   : > { %12979 = vmatprep.subr.bf16.mxu1 %v12978_v10 }
 0xabe   : > { %12981 = vmatpush3.bf16.msra.mxu1 %v12978_v10  ;;  %v13010_v10 = vpack.c.bf16 %v9484_v7, %v9483_v6  ;;  %v9634_v6 = vld [vmem:[%s16619_s10 + $0x88] sm:$0xff]  ;;  %v9496_v7 = vld [vmem:[%s16618_s9 + $0x218] sm:$0xff] }
 0xabf   : > { %12983 = vmatprep.subr.bf16.mxu1 %v12982_v11 }
 0xac1   : > { %11671 = vmatmul.mubr.msk.f32.vlgmr.msra.gmra.mrb[26].mxu1 %vm2267_vm1, %v4485_v14  ;;  %v9423_v14 = vld [vmem:[%s16618_s9 + $0x130] sm:$0xff] }
 0xac2   : > { %12985 = vmatpush3.bf16.msra.mxu1 %v12982_v11  ;;  %11673 = vmatprep.mubr.msk.f32.mxu1 %vm2267_vm1, %v4486_v15  ;;  %v9420_v11 = vld [vmem:[%s16618_s9 + $0x118] sm:$0xff] }
 0xac3   : > { %12987 = vmatprep.subr.bf16.mxu1 %v12986_v16  ;;  %v9424_v15 = vld [vmem:[%s16618_s9 + $0x138] sm:$0xff] }
 0xac5   : > { %11674 = vmatmul.mubr.msk.f32.gmra.mrb[28].mxu1 %vm2267_vm1, %v4487_v17  ;;  %v9426_v17 = vld [vmem:[%s16618_s9 + $0x148] sm:$0xff] }
 0xac6   : > { %11676 = vmatprep.mubr.msk.f32.mxu1 %vm2267_vm1, %v4488_v18  ;;  %12989 = vmatpush3.bf16.msra.mxu1 %v12986_v16  ;;  %v9425_v16 = vld [vmem:[%s16618_s9 + $0x140] sm:$0xff]  ;;  %v9427_v18 = vld [vmem:[%s16618_s9 + $0x150] sm:$0xff] }
 0xac9   : > { %11677 = vmatmul.mubr.msk.f32.gmra.mrb[30].mxu1 %vm2267_vm1, %v4489_v19  ;;  %v9428_v19 = vld [vmem:[%s16618_s9 + $0x158] sm:$0xff] }
 0xaca   : > { %11679 = vmatprep.mubr.msk.f32.mxu1 %vm2267_vm1, %v4490_v20  ;;  %v9429_v20 = vld [vmem:[%s16618_s9 + $0x160] sm:$0xff] }
 0xacd   : > { %11680 = vmatmul.mubr.msk.f32.gmra.mrb[32].mxu1 %vm2267_vm1, %v4491_v28  ;;  %v9430_v28 = vld [vmem:[%s16618_s9 + $0x168] sm:$0xff] }
 0xace   : > { %11682 = vmatprep.mubr.msk.f32.mxu1 %vm2267_vm1, %v4492_v21  ;;  %v9431_v21 = vld [vmem:[%s16618_s9 + $0x170] sm:$0xff] }
 0xad1   : > { %11683 = vmatmul.mubr.msk.f32.gmra.mrb[34].mxu1 %vm2267_vm1, %v4493_v29  ;;  %v9432_v29 = vld [vmem:[%s16618_s9 + $0x178] sm:$0xff] }
 0xad2   : > { %11685 = vmatprep.mubr.msk.f32.mxu1 %vm2267_vm1, %v4494_v22  ;;  %v9433_v22 = vld [vmem:[%s16618_s9 + $0x180] sm:$0xff] }
 0xad5   : > { %11686 = vmatmul.mubr.msk.f32.gmra.mrb[36].mxu1 %vm2267_vm1, %v4495_v23  ;;  %v9434_v23 = vld [vmem:[%s16618_s9 + $0x188] sm:$0xff] }
 0xad6   : > { %11688 = vmatprep.mubr.msk.f32.mxu1 %vm2267_vm1, %v4496_v24  ;;  %v9435_v24 = vld [vmem:[%s16618_s9 + $0x190] sm:$0xff] }
 0xad9   : > { %11689 = vmatmul.mubr.msk.f32.gmra.mrb[38].mxu1 %vm2267_vm1, %v4497_v25  ;;  %v9436_v25 = vld [vmem:[%s16618_s9 + $0x198] sm:$0xff] }
 0xada   : > { %11691 = vmatprep.mubr.msk.f32.mxu1 %vm2267_vm1, %v4498_v26  ;;  %v9437_v26 = vld [vmem:[%s16618_s9 + $0x1a0] sm:$0xff] }
 0xadd   : > { %11692 = vmatmul.mubr.msk.f32.gmra.mrb[40].mxu1 %vm2267_vm1, %v4499_v31  ;;  %v9438_v31 = vld [vmem:[%s16618_s9 + $0x1a8] sm:$0xff] }
 0xade   : > { %11694 = vmatprep.mubr.msk.f32.mxu1 %vm2267_vm1, %v4500_v32  ;;  %v9439_v32 = vld [vmem:[%s16618_s9 + $0x1b0] sm:$0xff] }
 0xae1   : > { %11695 = vmatmul.mubr.msk.f32.gmra.mrb[42].mxu1 %vm2267_vm1, %v4501_v33  ;;  %v9440_v33 = vld [vmem:[%s16618_s9 + $0x1b8] sm:$0xff] }
 0xae2   : > { %11697 = vmatprep.mubr.msk.f32.mxu1 %vm2267_vm1, %v4502_v34  ;;  %v9441_v34 = vld [vmem:[%s16618_s9 + $0x1c0] sm:$0xff] }
 0xae5   : > { %11698 = vmatmul.mubr.msk.f32.gmra.mrb[44].mxu1 %vm2267_vm1, %v4503_v35  ;;  %v9442_v35 = vld [vmem:[%s16618_s9 + $0x1c8] sm:$0xff] }
 0xae6   : > { %11700 = vmatprep.mubr.msk.f32.mxu1 %vm2267_vm1, %v4504_v36  ;;  %v9443_v36 = vld [vmem:[%s16618_s9 + $0x1d0] sm:$0xff] }
 0xae9   : > { %11701 = vmatmul.mubr.msk.f32.gmra.mrb[46].mxu1 %vm2267_vm1, %v4505_v37  ;;  %v9444_v37 = vld [vmem:[%s16618_s9 + $0x1d8] sm:$0xff] }
 0xaea   : > { %11703 = vmatprep.mubr.msk.f32.mxu1 %vm2267_vm1, %v4506_v38  ;;  %v9445_v38 = vld [vmem:[%s16618_s9 + $0x1e0] sm:$0xff] }
 0xaed   : > { %11704 = vmatmul.mubr.msk.f32.gmra.mrb[48].mxu1 %vm2267_vm1, %v4507_v39  ;;  %v9446_v39 = vld [vmem:[%s16618_s9 + $0x1e8] sm:$0xff] }
 0xaee   : > { %11706 = vmatprep.mubr.msk.f32.mxu1 %vm2267_vm1, %v4508_v40  ;;  %v9447_v40 = vld [vmem:[%s16618_s9 + $0x1f0] sm:$0xff] }
 0xaf1   : > { %11707 = vmatmul.mubr.msk.f32.gmra.mrb[50].mxu1 %vm2267_vm1, %v4509_v41  ;;  %v9448_v41 = vld [vmem:[%s16618_s9 + $0x1f8] sm:$0xff] }
 0xaf2   : > { %11709 = vmatprep.mubr.msk.f32.mxu1 %vm2267_vm1, %v4510_v42  ;;  %v9493_v42 = vld [vmem:[%s16618_s9 + $0x200] sm:$0xff] }
 0xaf5   : > { %11710 = vmatmul.mubr.msk.f32.gmra.mrb[52].mxu1 %vm2267_vm1, %v4511_v45 }
 0xaf6   : > { %11712 = vmatprep.mubr.msk.f32.mxu1 %vm2267_vm1, %v4512_v46 }
 0xaf9   : > { %11713 = vmatmul.mubr.msk.f32.gmra.mrb[54].mxu1 %vm2267_vm1, %v4513_v47 }
 0xafa   : > { %11715 = vmatprep.mubr.msk.f32.mxu1 %vm2267_vm1, %v4514_v49 }
 0xafd   : > { %11716 = vmatmul.mubr.msk.f32.gmra.mrb[56].mxu1 %vm2267_vm1, %v4515_v51 }
 0xafe   : > { %11726 = vmatprep.mubr.msk.f32.mxu1 %vm4354_vm2, %v14998_v27 }
 0xb01   : > { %11727 = vmatmul.mubr.msk.f32.vlgmr.msra.gmra.mrb[58].mxu1 %vm4354_vm2, %v15000_v44 }
 0xb02   : > { %11729 = vmatprep.mubr.msk.f32.mxu1 %vm4354_vm2, %v15006_v30 }
 0xb05   : > { %11730 = vmatmul.mubr.msk.f32.gmra.mrb[60].mxu1 %vm4354_vm2, %v15008_v50 }
 0xb06   : > { %11732 = vmatprep.mubr.msk.f32.mxu1 %vm4354_vm2, %v15014_v54 }
 0xb09   : > { %11733 = vmatmul.mubr.msk.f32.gmra.mrb[62].mxu1 %vm4354_vm2, %v15016_v55 }
 0xb0a   : > { %11735 = vmatprep.mubr.msk.f32.mxu1 %vm4354_vm2, %v15022_v59 }
 0xb0d   : > { %11736 = vmatmul.mubr.msk.f32.gmra.mrb[64].mxu1 %vm4354_vm2, %v15024_v60 }
 0xb0e   : > { %11754 = vmatprep.mubr.msk.f32.mxu1 %vm2267_vm1, %v9417_v52 }
 0xbd4   : > { %v11728_v53 = vpop.f32.mrb[58].mxu1 }
 0xbd5   : > { %v4940_v43 = vpop.f32.mrb[59].mxu1 }
 0xbd6   : > { %v12990_v56 = vpack.c.bf16 %v11728_v53, %v4940_v43 }
 0xbd8   : > { %v11731_v57 = vpop.f32.mrb[60].mxu1  ;;  %12991 = vmatprep.subr.bf16.mxu1 %v12990_v56 }
 0xbd9   : > { %v4950_v58 = vpop.f32.mrb[61].mxu1  ;;  %12993 = vmatpush3.bf16.msra.mxu1 %v12990_v56 }
 0xbda   : > { %v12994_v61 = vpack.c.bf16 %v11731_v57, %v4950_v58  ;;  %v9557_v57 = vld [vmem:[%s16619_s10 + $0x60] sm:$0xff]  ;;  %v9558_v58 = vld [vmem:[%s16619_s10 + $0x68] sm:$0xff] }
 0xbdc   : > { %v11734_v62 = vpop.f32.mrb[62].mxu1  ;;  %12995 = vmatprep.subr.bf16.mxu1 %v12994_v61 }
 0xbdd   : > { %v4960_v63 = vpop.f32.mrb[63].mxu1  ;;  %12997 = vmatpush3.bf16.msra.mxu1 %v12994_v61 }
 0xbde   : > { %v12998_v0 = vpack.c.bf16 %v11734_v62, %v4960_v63 }
 0xbe0   : > { %v11737_v3 = vpop.f32.mrb[64].mxu1  ;;  %12999 = vmatprep.subr.bf16.mxu1 %v12998_v0 }
 0xbe1   : > { %v4970_v4 = vpop.f32.mrb[65].mxu1  ;;  %13001 = vmatpush3.bf16.msra.mxu1 %v12998_v0  ;;  %v13030_v0 = vpack.c.bf16 %v9558_v58, %v9557_v57  ;;  %v9788_v57 = vld [vmem:[%s16619_s10 + $0xd8] sm:$0xff] }
 0xbe2   : > { %v13002_v5 = vpack.c.bf16 %v11737_v3, %v4970_v4  ;;  %v9494_v3 = vld [vmem:[%s16618_s9 + $0x208] sm:$0xff]  ;;  %v9495_v4 = vld [vmem:[%s16618_s9 + $0x210] sm:$0xff] }
 0xbe4   : > { %13003 = vmatprep.subr.bf16.mxu1 %v13002_v5 }
 0xbe5   : > { %13005 = vmatpush3.bf16.msra.mxu1 %v13002_v5  ;;  %v13034_v5 = vpack.c.bf16 %v9560_v2, %v9559_v1  ;;  %v9864_v1 = vld [vmem:[%s16619_s10 + $0xf8] sm:$0xff] }
 0xbe6   : > { %13007 = vmatprep.subr.bf16.mxu1 %v13006_v48 }
 0xbe8   : > { %11755 = vmatmul.mubr.msk.f32.vlgmr.msra.gmra.mrb[26].mxu1 %vm2267_vm1, %v9418_v8  ;;  %v9497_v8 = vld [vmem:[%s16618_s9 + $0x220] sm:$0xff] }
 0xbe9   : > { %13009 = vmatpush3.bf16.msra.mxu1 %v13006_v48  ;;  %11757 = vmatprep.mubr.msk.f32.mxu1 %vm2267_vm1, %v9419_v9  ;;  %v9633_v48 = vld [vmem:[%s16619_s10 + $0x80] sm:$0xff] }
 0xbea   : > { %13011 = vmatprep.subr.bf16.mxu1 %v13010_v10  ;;  %v15378_v9 = vpack.c.bf16 %v9634_v6, %v9633_v48  ;;  %v9939_v48 = vld [vmem:[%s16619_s10 + $0x110] sm:$0xff]  ;;  %v9940_v6 = vld [vmem:[%s16619_s10 + $0x118] sm:$0xff] }
 0xbec   : > { %11758 = vmatmul.mubr.msk.f32.gmra.mrb[28].mxu1 %vm2267_vm1, %v9420_v11  ;;  %v9499_v11 = vld [vmem:[%s16618_s9 + $0x230] sm:$0xff] }
 0xbed   : > { %11760 = vmatprep.mubr.msk.f32.mxu1 %vm2267_vm1, %v9421_v12  ;;  %13013 = vmatpush3.bf16.msra.mxu1 %v13010_v10  ;;  %v9498_v10 = vld [vmem:[%s16618_s9 + $0x228] sm:$0xff]  ;;  %v9500_v12 = vld [vmem:[%s16618_s9 + $0x238] sm:$0xff] }
 0xbf0   : > { %11761 = vmatmul.mubr.msk.f32.gmra.mrb[30].mxu1 %vm2267_vm1, %v9422_v13  ;;  %v9501_v13 = vld [vmem:[%s16618_s9 + $0x240] sm:$0xff] }
 0xbf1   : > { %11763 = vmatprep.mubr.msk.f32.mxu1 %vm2267_vm1, %v9423_v14  ;;  %v9502_v14 = vld [vmem:[%s16618_s9 + $0x248] sm:$0xff] }
 0xbf4   : > { %11764 = vmatmul.mubr.msk.f32.gmra.mrb[32].mxu1 %vm2267_vm1, %v9424_v15  ;;  %v9503_v15 = vld [vmem:[%s16618_s9 + $0x250] sm:$0xff] }
 0xbf5   : > { %11766 = vmatprep.mubr.msk.f32.mxu1 %vm2267_vm1, %v9425_v16  ;;  %v9504_v16 = vld [vmem:[%s16618_s9 + $0x258] sm:$0xff] }
 0xbf8   : > { %11767 = vmatmul.mubr.msk.f32.gmra.mrb[34].mxu1 %vm2267_vm1, %v9426_v17  ;;  %v9505_v17 = vld [vmem:[%s16618_s9 + $0x260] sm:$0xff] }
 0xbf9   : > { %11769 = vmatprep.mubr.msk.f32.mxu1 %vm2267_vm1, %v9427_v18  ;;  %v9506_v18 = vld [vmem:[%s16618_s9 + $0x268] sm:$0xff] }
 0xbfc   : > { %11770 = vmatmul.mubr.msk.f32.gmra.mrb[36].mxu1 %vm2267_vm1, %v9428_v19  ;;  %v9507_v19 = vld [vmem:[%s16618_s9 + $0x270] sm:$0xff] }
 0xbfd   : > { %11772 = vmatprep.mubr.msk.f32.mxu1 %vm2267_vm1, %v9429_v20  ;;  %v9508_v20 = vld [vmem:[%s16618_s9 + $0x278] sm:$0xff] }
 0xc00   : > { %11773 = vmatmul.mubr.msk.f32.gmra.mrb[38].mxu1 %vm2267_vm1, %v9430_v28  ;;  %v9509_v28 = vld [vmem:[%s16618_s9 + $0x280] sm:$0xff] }
 0xc01   : > { %11775 = vmatprep.mubr.msk.f32.mxu1 %vm2267_vm1, %v9431_v21  ;;  %v9510_v21 = vld [vmem:[%s16618_s9 + $0x288] sm:$0xff] }
 0xc04   : > { %11776 = vmatmul.mubr.msk.f32.gmra.mrb[40].mxu1 %vm2267_vm1, %v9432_v29  ;;  %v9511_v29 = vld [vmem:[%s16618_s9 + $0x290] sm:$0xff] }
 0xc05   : > { %11778 = vmatprep.mubr.msk.f32.mxu1 %vm2267_vm1, %v9433_v22  ;;  %v9512_v22 = vld [vmem:[%s16618_s9 + $0x298] sm:$0xff] }
 0xc08   : > { %11779 = vmatmul.mubr.msk.f32.gmra.mrb[42].mxu1 %vm2267_vm1, %v9434_v23  ;;  %v9513_v23 = vld [vmem:[%s16618_s9 + $0x2a0] sm:$0xff] }
 0xc09   : > { %11781 = vmatprep.mubr.msk.f32.mxu1 %vm2267_vm1, %v9435_v24  ;;  %v9514_v24 = vld [vmem:[%s16618_s9 + $0x2a8] sm:$0xff] }
 0xc0c   : > { %11782 = vmatmul.mubr.msk.f32.gmra.mrb[44].mxu1 %vm2267_vm1, %v9436_v25  ;;  %v9515_v25 = vld [vmem:[%s16618_s9 + $0x2b0] sm:$0xff] }
 0xc0d   : > { %11784 = vmatprep.mubr.msk.f32.mxu1 %vm2267_vm1, %v9437_v26  ;;  %v9516_v26 = vld [vmem:[%s16618_s9 + $0x2b8] sm:$0xff] }
 0xc10   : > { %11785 = vmatmul.mubr.msk.f32.gmra.mrb[46].mxu1 %vm2267_vm1, %v9438_v31  ;;  %v9517_v31 = vld [vmem:[%s16618_s9 + $0x2c0] sm:$0xff] }
 0xc11   : > { %11787 = vmatprep.mubr.msk.f32.mxu1 %vm2267_vm1, %v9439_v32  ;;  %v9518_v32 = vld [vmem:[%s16618_s9 + $0x2c8] sm:$0xff] }
 0xc14   : > { %11788 = vmatmul.mubr.msk.f32.gmra.mrb[48].mxu1 %vm2267_vm1, %v9440_v33  ;;  %v9519_v33 = vld [vmem:[%s16618_s9 + $0x2d0] sm:$0xff] }
 0xc15   : > { %11790 = vmatprep.mubr.msk.f32.mxu1 %vm2267_vm1, %v9441_v34  ;;  %v9520_v34 = vld [vmem:[%s16618_s9 + $0x2d8] sm:$0xff] }
 0xc18   : > { %11791 = vmatmul.mubr.msk.f32.gmra.mrb[50].mxu1 %vm2267_vm1, %v9442_v35  ;;  %v9521_v35 = vld [vmem:[%s16618_s9 + $0x2e0] sm:$0xff] }
 0xc19   : > { %11793 = vmatprep.mubr.msk.f32.mxu1 %vm2267_vm1, %v9443_v36  ;;  %v9522_v36 = vld [vmem:[%s16618_s9 + $0x2e8] sm:$0xff] }
 0xc1c   : > { %11794 = vmatmul.mubr.msk.f32.gmra.mrb[52].mxu1 %vm2267_vm1, %v9444_v37  ;;  %v9523_v37 = vld [vmem:[%s16618_s9 + $0x2f0] sm:$0xff] }
 0xc1d   : > { %11796 = vmatprep.mubr.msk.f32.mxu1 %vm2267_vm1, %v9445_v38  ;;  %v9524_v38 = vld [vmem:[%s16618_s9 + $0x2f8] sm:$0xff] }
 0xc20   : > { %11797 = vmatmul.mubr.msk.f32.gmra.mrb[54].mxu1 %vm2267_vm1, %v9446_v39  ;;  %v9635_v39 = vld [vmem:[%s16619_s10 + $0x90] sm:$0xff] }
 0xc21   : > { %11799 = vmatprep.mubr.msk.f32.mxu1 %vm2267_vm1, %v9447_v40  ;;  %v9636_v40 = vld [vmem:[%s16619_s10 + $0x98] sm:$0xff] }
 0xc24   : > { %11800 = vmatmul.mubr.msk.f32.gmra.mrb[56].mxu1 %vm2267_vm1, %v9448_v41  ;;  %v13058_v41 = vpack.c.bf16 %v9636_v40, %v9635_v39 }
 0xc25   : > { %11810 = vmatprep.mubr.msk.f32.mxu1 %vm4354_vm2, %v14998_v27 }
 0xc28   : > { %11811 = vmatmul.mubr.msk.f32.vlgmr.msra.gmra.mrb[66].mxu1 %vm4354_vm2, %v15000_v44 }
 0xc29   : > { %11813 = vmatprep.mubr.msk.f32.mxu1 %vm4354_vm2, %v15006_v30 }
 0xc2c   : > { %11814 = vmatmul.mubr.msk.f32.gmra.mrb[68].mxu1 %vm4354_vm2, %v15008_v50 }
 0xc2d   : > { %11816 = vmatprep.mubr.msk.f32.mxu1 %vm4354_vm2, %v15014_v54 }
 0xc30   : > { %11817 = vmatmul.mubr.msk.f32.gmra.mrb[70].mxu1 %vm4354_vm2, %v15016_v55 }
 0xc31   : > { %11819 = vmatprep.mubr.msk.f32.mxu1 %vm4354_vm2, %v15022_v59 }
 0xc34   : > { %11820 = vmatmul.mubr.msk.f32.gmra.mrb[72].mxu1 %vm4354_vm2, %v15024_v60 }
 0xc35   : > { %11838 = vmatprep.mubr.msk.f32.mxu1 %vm2267_vm1, %v9493_v42  ;;  %v9709_v42 = vld [vmem:[%s16619_s10 + $0xa0] sm:$0xff] }
 0xcfb   : > { %v11812_v45 = vpop.f32.mrb[66].mxu1 }
 0xcfc   : > { %v5436_v46 = vpop.f32.mrb[67].mxu1 }
 0xcfd   : > { %v13014_v47 = vpack.c.bf16 %v11812_v45, %v5436_v46  ;;  %v9710_v45 = vld [vmem:[%s16619_s10 + $0xa8] sm:$0xff] }
 0xcfe   : > { %v13078_v46 = vpack.c.bf16 %v9710_v45, %v9709_v42 }
 0xcff   : > { %v11815_v49 = vpop.f32.mrb[68].mxu1  ;;  %13015 = vmatprep.subr.bf16.mxu1 %v13014_v47 }
 0xd00   : > { %v5446_v51 = vpop.f32.mrb[69].mxu1  ;;  %13017 = vmatpush3.bf16.msra.mxu1 %v13014_v47  ;;  %v9711_v47 = vld [vmem:[%s16619_s10 + $0xb0] sm:$0xff] }
 0xd01   : > { %v13018_v52 = vpack.c.bf16 %v11815_v49, %v5446_v51  ;;  %v9712_v49 = vld [vmem:[%s16619_s10 + $0xb8] sm:$0xff] }
 0xd02   : > { %v13082_v51 = vpack.c.bf16 %v9712_v49, %v9711_v47 }
 0xd03   : > { %v11818_v53 = vpop.f32.mrb[70].mxu1  ;;  %13019 = vmatprep.subr.bf16.mxu1 %v13018_v52 }
 0xd04   : > { %v5456_v43 = vpop.f32.mrb[71].mxu1  ;;  %13021 = vmatpush3.bf16.msra.mxu1 %v13018_v52  ;;  %v9785_v52 = vld [vmem:[%s16619_s10 + $0xc0] sm:$0xff] }
 0xd05   : > { %v13022_v56 = vpack.c.bf16 %v11818_v53, %v5456_v43  ;;  %v9786_v53 = vld [vmem:[%s16619_s10 + $0xc8] sm:$0xff] }
 0xd06   : > { %v13102_v43 = vpack.c.bf16 %v9786_v53, %v9785_v52 }
 0xd07   : > { %v11821_v61 = vpop.f32.mrb[72].mxu1  ;;  %13023 = vmatprep.subr.bf16.mxu1 %v13022_v56 }
 0xd08   : > { %v5466_v62 = vpop.f32.mrb[73].mxu1  ;;  %13025 = vmatpush3.bf16.msra.mxu1 %v13022_v56  ;;  %v9787_v56 = vld [vmem:[%s16619_s10 + $0xd0] sm:$0xff] }
 0xd09   : > { %v13026_v63 = vpack.c.bf16 %v11821_v61, %v5466_v62  ;;  %v13106_v58 = vpack.c.bf16 %v9788_v57, %v9787_v56  ;;  %v9861_v61 = vld [vmem:[%s16619_s10 + $0xe0] sm:$0xff]  ;;  %v9862_v62 = vld [vmem:[%s16619_s10 + $0xe8] sm:$0xff] }
 0xd0b   : > { %13027 = vmatprep.subr.bf16.mxu1 %v13026_v63 }
 0xd0c   : > { %13029 = vmatpush3.bf16.msra.mxu1 %v13026_v63  ;;  %v13126_v63 = vpack.c.bf16 %v9862_v62, %v9861_v61 }
 0xd0d   : > { %13031 = vmatprep.subr.bf16.mxu1 %v13030_v0 }
 0xd0f   : > { %11839 = vmatmul.mubr.msk.f32.vlgmr.msra.gmra.mrb[26].mxu1 %vm2267_vm1, %v9494_v3  ;;  %v9937_v3 = vld [vmem:[%s16619_s10 + $0x100] sm:$0xff] }
 0xd10   : > { %13033 = vmatpush3.bf16.msra.mxu1 %v13030_v0  ;;  %11841 = vmatprep.mubr.msk.f32.mxu1 %vm2267_vm1, %v9495_v4  ;;  %v9863_v0 = vld [vmem:[%s16619_s10 + $0xf0] sm:$0xff]  ;;  %v9938_v4 = vld [vmem:[%s16619_s10 + $0x108] sm:$0xff] }
 0xd11   : > { %13035 = vmatprep.subr.bf16.mxu1 %v13034_v5  ;;  %v13130_v2 = vpack.c.bf16 %v9864_v1, %v9863_v0  ;;  %v9570_v1 = vld [vmem:[%s16618_s9 + $0x308] sm:$0xff] }
 0xd13   : > { %11842 = vmatmul.mubr.msk.f32.gmra.mrb[28].mxu1 %vm2267_vm1, %v9496_v7  ;;  %v13154_v7 = vpack.c.bf16 %v9940_v6, %v9939_v48  ;;  %v9572_v48 = vld [vmem:[%s16618_s9 + $0x318] sm:$0xff] }
 0xd14   : > { %11844 = vmatprep.mubr.msk.f32.mxu1 %vm2267_vm1, %v9497_v8  ;;  %13037 = vmatpush3.bf16.msra.mxu1 %v13034_v5  ;;  %v13150_v5 = vpack.c.bf16 %v9938_v4, %v9937_v3  ;;  %v9571_v3 = vld [vmem:[%s16618_s9 + $0x310] sm:$0xff] }
 0xd15   : > { %13055 = vmatprep.subr.bf16.mxu1 %v15378_v9 }
 0xd17   : > { %11845 = vmatmul.mubr.msk.f32.gmra.mrb[30].mxu1 %vm2267_vm1, %v9498_v10 }
 0xd18   : > { %11847 = vmatprep.mubr.msk.f32.mxu1 %vm2267_vm1, %v9499_v11 }
 0xd1b   : > { %11848 = vmatmul.mubr.msk.f32.gmra.mrb[32].mxu1 %vm2267_vm1, %v9500_v12 }
 0xd1c   : > { %11850 = vmatprep.mubr.msk.f32.mxu1 %vm2267_vm1, %v9501_v13 }
 0xd1f   : > { %11851 = vmatmul.mubr.msk.f32.gmra.mrb[34].mxu1 %vm2267_vm1, %v9502_v14 }
 0xd20   : > { %11853 = vmatprep.mubr.msk.f32.mxu1 %vm2267_vm1, %v9503_v15 }
 0xd23   : > { %11854 = vmatmul.mubr.msk.f32.gmra.mrb[36].mxu1 %vm2267_vm1, %v9504_v16 }
 0xd24   : > { %11856 = vmatprep.mubr.msk.f32.mxu1 %vm2267_vm1, %v9505_v17 }
 0xd27   : > { %11857 = vmatmul.mubr.msk.f32.gmra.mrb[38].mxu1 %vm2267_vm1, %v9506_v18 }
 0xd28   : > { %11859 = vmatprep.mubr.msk.f32.mxu1 %vm2267_vm1, %v9507_v19 }
 0xd2b   : > { %11860 = vmatmul.mubr.msk.f32.gmra.mrb[40].mxu1 %vm2267_vm1, %v9508_v20 }
 0xd2c   : > { %11862 = vmatprep.mubr.msk.f32.mxu1 %vm2267_vm1, %v9509_v28 }
 0xd2f   : > { %11863 = vmatmul.mubr.msk.f32.gmra.mrb[42].mxu1 %vm2267_vm1, %v9510_v21 }
 0xd30   : > { %11865 = vmatprep.mubr.msk.f32.mxu1 %vm2267_vm1, %v9511_v29 }
 0xd33   : > { %11866 = vmatmul.mubr.msk.f32.gmra.mrb[44].mxu1 %vm2267_vm1, %v9512_v22 }
 0xd34   : > { %11868 = vmatprep.mubr.msk.f32.mxu1 %vm2267_vm1, %v9513_v23  ;;  %v9364_v23 = vld [vmem:[%s16620_s11] ss:$0 sm:$0xff] }
 0xd37   : > { %11869 = vmatmul.mubr.msk.f32.gmra.mrb[46].mxu1 %vm2267_vm1, %v9514_v24 }
 0xd38   : > { %11871 = vmatprep.mubr.msk.f32.mxu1 %vm2267_vm1, %v9515_v25 }
 0xd3b   : > { %11872 = vmatmul.mubr.msk.f32.gmra.mrb[48].mxu1 %vm2267_vm1, %v9516_v26 }
 0xd3c   : > { %11874 = vmatprep.mubr.msk.f32.mxu1 %vm2267_vm1, %v9517_v31 }
 0xd3f   : > { %11875 = vmatmul.mubr.msk.f32.gmra.mrb[50].mxu1 %vm2267_vm1, %v9518_v32 }
 0xd40   : > { %11877 = vmatprep.mubr.msk.f32.mxu1 %vm2267_vm1, %v9519_v33 }
 0xd43   : > { %11878 = vmatmul.mubr.msk.f32.gmra.mrb[52].mxu1 %vm2267_vm1, %v9520_v34 }
 0xd44   : > { %11880 = vmatprep.mubr.msk.f32.mxu1 %vm2267_vm1, %v9521_v35 }
 0xd47   : > { %11881 = vmatmul.mubr.msk.f32.gmra.mrb[54].mxu1 %vm2267_vm1, %v9522_v36 }
 0xd48   : > { %11883 = vmatprep.mubr.msk.f32.mxu1 %vm2267_vm1, %v9523_v37 }
 0xd4b   : > { %11884 = vmatmul.mubr.msk.f32.gmra.mrb[56].mxu1 %vm2267_vm1, %v9524_v38 }
 0xd4c   : > { %11894 = vmatprep.mubr.msk.f32.mxu1 %vm4354_vm2, %v14998_v27 }
 0xd4f   : > { %11895 = vmatmul.mubr.msk.f32.vlgmr.msra.gmra.mrb[74].mxu1 %vm4354_vm2, %v15000_v44 }
 0xd50   : > { %11897 = vmatprep.mubr.msk.f32.mxu1 %vm4354_vm2, %v15006_v30  ;;  %13057 = vmatpush3.bf16.msra.mxu1 %v15378_v9 }
 0xd51   : > { %13059 = vmatprep.subr.bf16.mxu1 %v13058_v41 }
 0xd53   : > { %11898 = vmatmul.mubr.msk.f32.gmra.mrb[76].mxu1 %vm4354_vm2, %v15008_v50 }
 0xd54   : > { %11900 = vmatprep.mubr.msk.f32.mxu1 %vm4354_vm2, %v15014_v54  ;;  %13061 = vmatpush3.bf16.msra.mxu1 %v13058_v41 }
 0xd55   : > { %13079 = vmatprep.subr.bf16.mxu1 %v13078_v46 }
 0xd57   : > { %11901 = vmatmul.mubr.msk.f32.gmra.mrb[78].mxu1 %vm4354_vm2, %v15016_v55 }
 0xd58   : > { %11903 = vmatprep.mubr.msk.f32.mxu1 %vm4354_vm2, %v15022_v59 }
 0xd5b   : > { %11904 = vmatmul.mubr.msk.f32.gmra.mrb[80].mxu1 %vm4354_vm2, %v15024_v60 }
 0xd5c   : > { %11978 = vmatprep.mubr.msk.f32.mxu1 %vm4354_vm2, %v14998_v27 }
 0xd5f   : > { %11979 = vmatmul.mubr.msk.f32.vlgmr.msra.gmra.mrb[82].mxu1 %vm4354_vm2, %v15000_v44 }
 0xd60   : > { %11981 = vmatprep.mubr.msk.f32.mxu1 %vm4354_vm2, %v15006_v30  ;;  %13081 = vmatpush3.bf16.msra.mxu1 %v13078_v46 }
 0xd61   : > { %13083 = vmatprep.subr.bf16.mxu1 %v13082_v51 }
 0xd63   : > { %11982 = vmatmul.mubr.msk.f32.gmra.mrb[84].mxu1 %vm4354_vm2, %v15008_v50 }
 0xd64   : > { %11984 = vmatprep.mubr.msk.f32.mxu1 %vm4354_vm2, %v15014_v54  ;;  %13085 = vmatpush3.bf16.msra.mxu1 %v13082_v51 }
 0xd65   : > { %13103 = vmatprep.subr.bf16.mxu1 %v13102_v43 }
 0xd67   : > { %11985 = vmatmul.mubr.msk.f32.gmra.mrb[86].mxu1 %vm4354_vm2, %v15016_v55 }
 0xd68   : > { %11987 = vmatprep.mubr.msk.f32.mxu1 %vm4354_vm2, %v15022_v59 }
 0xd6b   : > { %11988 = vmatmul.mubr.msk.f32.gmra.mrb[88].mxu1 %vm4354_vm2, %v15024_v60 }
 0xd6c   : > { %12062 = vmatprep.mubr.msk.f32.mxu1 %vm4354_vm2, %v14998_v27 }
 0xd6f   : > { %12063 = vmatmul.mubr.msk.f32.vlgmr.msra.gmra.mrb[90].mxu1 %vm4354_vm2, %v15000_v44 }
 0xd70   : > { %12065 = vmatprep.mubr.msk.f32.mxu1 %vm4354_vm2, %v15006_v30  ;;  %13105 = vmatpush3.bf16.msra.mxu1 %v13102_v43 }
 0xd71   : > { %13107 = vmatprep.subr.bf16.mxu1 %v13106_v58 }
 0xd73   : > { %12066 = vmatmul.mubr.msk.f32.gmra.mrb[92].mxu1 %vm4354_vm2, %v15008_v50 }
 0xd74   : > { %12068 = vmatprep.mubr.msk.f32.mxu1 %vm4354_vm2, %v15014_v54  ;;  %13109 = vmatpush3.bf16.msra.mxu1 %v13106_v58 }
 0xd75   : > { %13127 = vmatprep.subr.bf16.mxu1 %v13126_v63 }
 0xd77   : > { %12069 = vmatmul.mubr.msk.f32.gmra.mrb[94].mxu1 %vm4354_vm2, %v15016_v55 }
 0xd78   : > { %12071 = vmatprep.mubr.msk.f32.mxu1 %vm4354_vm2, %v15022_v59 }
 0xd7b   : > { %12072 = vmatmul.mubr.msk.f32.gmra.mrb[96].mxu1 %vm4354_vm2, %v15024_v60 }
 0xd7c   : > { %12146 = vmatprep.mubr.msk.f32.mxu1 %vm4354_vm2, %v14998_v27 }
 0xd7f   : > { %12147 = vmatmul.mubr.msk.f32.vlgmr.msra.gmra.mrb[98].mxu1 %vm4354_vm2, %v15000_v44 }
 0xd80   : > { %12149 = vmatprep.mubr.msk.f32.mxu1 %vm4354_vm2, %v15006_v30  ;;  %13129 = vmatpush3.bf16.msra.mxu1 %v13126_v63 }
 0xd81   : > { %13131 = vmatprep.subr.bf16.mxu1 %v13130_v2 }
 0xd83   : > { %12150 = vmatmul.mubr.msk.f32.gmra.mrb[100].mxu1 %vm4354_vm2, %v15008_v50 }
 0xd84   : > { %12152 = vmatprep.mubr.msk.f32.mxu1 %vm4354_vm2, %v15014_v54  ;;  %13133 = vmatpush3.bf16.msra.mxu1 %v13130_v2 }
 0xd85   : > { %13151 = vmatprep.subr.bf16.mxu1 %v13150_v5 }
 0xd87   : > { %12153 = vmatmul.mubr.msk.f32.gmra.mrb[102].mxu1 %vm4354_vm2, %v15016_v55 }
 0xd88   : > { %12155 = vmatprep.mubr.msk.f32.mxu1 %vm4354_vm2, %v15022_v59 }
 0xd8b   : > { %12156 = vmatmul.mubr.msk.f32.gmra.mrb[104].mxu1 %vm4354_vm2, %v15024_v60 }
 0xd8c   : > { %12230 = vmatprep.mubr.msk.f32.mxu1 %vm4354_vm2, %v14998_v27 }
 0xd8f   : > { %12231 = vmatmul.mubr.msk.f32.vlgmr.msra.gmra.mrb[106].mxu1 %vm4354_vm2, %v15000_v44 }
 0xd90   : > { %12233 = vmatprep.mubr.msk.f32.mxu1 %vm4354_vm2, %v15006_v30  ;;  %13153 = vmatpush3.bf16.msra.mxu1 %v13150_v5 }
 0xd91   : > { %13155 = vmatprep.subr.bf16.mxu1 %v13154_v7 }
 0xd93   : > { %12234 = vmatmul.mubr.msk.f32.gmra.mrb[108].mxu1 %vm4354_vm2, %v15008_v50 }
 0xd94   : > { %12236 = vmatprep.mubr.msk.f32.mxu1 %vm4354_vm2, %v15014_v54  ;;  %13157 = vmatpush3.bf16.msra.mxu1 %v13154_v7  ;;  %v9573_v7 = vld [vmem:[%s16618_s9 + $0x320] sm:$0xff] }
 0xd97   : > { %12237 = vmatmul.mubr.msk.f32.gmra.mrb[110].mxu1 %vm4354_vm2, %v15016_v55 }
 0xd98   : > { %12239 = vmatprep.mubr.msk.f32.mxu1 %vm4354_vm2, %v15022_v59 }
 0xd9b   : > { %12240 = vmatmul.mubr.msk.f32.gmra.mrb[112].mxu1 %vm4354_vm2, %v15024_v60 }
 0xd9c   : > { %12314 = vmatprep.mubr.msk.f32.mxu1 %vm4354_vm2, %v14998_v27  ;;  %v9569_v27 = vld [vmem:[%s16618_s9 + $0x300] sm:$0xff] }
 0xd9d   : > { %11922 = vmatprep.mubr.msk.f32.mxu0 %vm2267_vm1, %v9569_v27 }
 0xd9f   : > { %12315 = vmatmul.mubr.msk.f32.vlgmr.msra.gmra.mrb[114].mxu1 %vm4354_vm2, %v15000_v44 }
 0xda0   : > { %12317 = vmatprep.mubr.msk.f32.mxu1 %vm4354_vm2, %v15006_v30 }
 0xda3   : > { %12318 = vmatmul.mubr.msk.f32.gmra.mrb[116].mxu1 %vm4354_vm2, %v15008_v50 }
 0xda4   : > { %12320 = vmatprep.mubr.msk.f32.mxu1 %vm4354_vm2, %v15014_v54 }
 0xda7   : > { %12321 = vmatmul.mubr.msk.f32.gmra.mrb[118].mxu1 %vm4354_vm2, %v15016_v55 }
 0xda8   : > { %12323 = vmatprep.mubr.msk.f32.mxu1 %vm4354_vm2, %v15022_v59 }
 0xdab   : > { %12324 = vmatmul.mubr.msk.f32.gmra.mrb[120].mxu1 %vm4354_vm2, %v15024_v60 }
 0xde2   : > { %v15646_v44 = vpop.f32.mrb[26].mxu1 }
 0xde3   : > { %v15648_v30 = vpop.f32.mrb[27].mxu1 }
 0xde6   : > { %v15650_v50 = vpop.f32.mrb[28].mxu1 }
 0xde7   : > { %v15652_v54 = vpop.f32.mrb[29].mxu1 }
 0xdea   : > { %v15654_v55 = vpop.f32.mrb[30].mxu1 }
 0xdeb   : > { %v15656_v59 = vpop.f32.mrb[31].mxu1 }
 0xdee   : > { %v15658_v8 = vpop.f32.mrb[32].mxu1 }
 0xdef   : > { %v15660_v60 = vpop.f32.mrb[33].mxu1 }
 0xdf2   : > { %v15662_v9 = vpop.f32.mrb[34].mxu1 }
 0xdf3   : > { %v15664_v10 = vpop.f32.mrb[35].mxu1 }
 0xdf6   : > { %v15666_v11 = vpop.f32.mrb[36].mxu1 }
 0xdf7   : > { %v15668_v12 = vpop.f32.mrb[37].mxu1 }
 0xdfa   : > { %v15670_v13 = vpop.f32.mrb[38].mxu1 }
 0xdfb   : > { %v15672_v14 = vpop.f32.mrb[39].mxu1 }
 0xdfe   : > { %v15674_v15 = vpop.f32.mrb[40].mxu1 }
 0xdff   : > { %v15676_v16 = vpop.f32.mrb[41].mxu1 }
 0xe02   : > { %v15678_v17 = vpop.f32.mrb[42].mxu1 }
 0xe03   : > { %v15680_v18 = vpop.f32.mrb[43].mxu1 }
 0xe06   : > { %v15682_v19 = vpop.f32.mrb[44].mxu1 }
 0xe07   : > { %v15684_v20 = vpop.f32.mrb[45].mxu1 }
 0xe0a   : > { %v15686_v28 = vpop.f32.mrb[46].mxu1 }
 0xe0b   : > { %v15688_v21 = vpop.f32.mrb[47].mxu1 }
 0xe0e   : > { %v15690_v29 = vpop.f32.mrb[48].mxu1 }
 0xe0f   : > { %v15692_v22 = vpop.f32.mrb[49].mxu1 }
 0xe12   : > { %v11876_v24 = vpop.f32.mrb[50].mxu1 }
 0xe13   : > { %v15697_v25 = vadd.f32 %v11876_v24, %v9364_v23  ;;  %v5790_v26 = vpop.f32.mrb[51].mxu1  ;;  %v9574_v24 = vld [vmem:[%s16618_s9 + $0x328] sm:$0xff] }
 0xe14   : > { %v15699_v31 = vadd.f32 %v9364_v23, %v5790_v26 }
 0xe16   : > { %v11879_v32 = vpop.f32.mrb[52].mxu1 }
 0xe17   : > { %v15701_v33 = vadd.f32 %v11879_v32, %v9364_v23  ;;  %v5800_v34 = vpop.f32.mrb[53].mxu1  ;;  %v9575_v32 = vld [vmem:[%s16618_s9 + $0x330] sm:$0xff] }
 0xe18   : > { %v15703_v35 = vadd.f32 %v9364_v23, %v5800_v34 }
 0xe1a   : > { %v11882_v36 = vpop.f32.mrb[54].mxu1 }
 0xe1b   : > { %v15705_v37 = vadd.f32 %v11882_v36, %v9364_v23  ;;  %v5810_v38 = vpop.f32.mrb[55].mxu1 }
 0xe1c   : > { %v15707_v39 = vadd.f32 %v9364_v23, %v5810_v38  ;;  %v9576_v38 = vld [vmem:[%s16618_s9 + $0x338] sm:$0xff] }
 0xe1e   : > { %v11885_v40 = vpop.f32.mrb[56].mxu1 }
 0xe1f   : > { %v15709_v41 = vadd.f32 %v11885_v40, %v9364_v23  ;;  %v5820_v42 = vpop.f32.mrb[57].mxu1 }
 0xe20   : > { %v15711_v45 = vadd.f32 %v9364_v23, %v5820_v42  ;;  %v9577_v42 = vld [vmem:[%s16618_s9 + $0x340] sm:$0xff] }
 0xe22   : > { %v11896_v46 = vpop.f32.mrb[74].mxu1 }
 0xe23   : > { %v5932_v47 = vpop.f32.mrb[75].mxu1 }
 0xe24   : > { %v13038_v49 = vpack.c.bf16 %v11896_v46, %v5932_v47 }
 0xe26   : > { %v11899_v51 = vpop.f32.mrb[76].mxu1  ;;  %13039 = vmatprep.subr.bf16.mxu0 %v13038_v49 }
 0xe27   : > { %v5942_v52 = vpop.f32.mrb[77].mxu1  ;;  %13041 = vmatpush3.bf16.msra.mxu0 %v13038_v49  ;;  %v9578_v49 = vld [vmem:[%s16618_s9 + $0x348] sm:$0xff] }
 0xe28   : > { %v13042_v53 = vpack.c.bf16 %v11899_v51, %v5942_v52  ;;  %v9579_v52 = vld [vmem:[%s16618_s9 + $0x350] sm:$0xff] }
 0xe2a   : > { %v11902_v43 = vpop.f32.mrb[78].mxu1  ;;  %13043 = vmatprep.subr.bf16.mxu0 %v13042_v53 }
 0xe2b   : > { %v5952_v56 = vpop.f32.mrb[79].mxu1  ;;  %13045 = vmatpush3.bf16.msra.mxu0 %v13042_v53 }
 0xe2c   : > { %v13046_v57 = vpack.c.bf16 %v11902_v43, %v5952_v56  ;;  %v9580_v56 = vld [vmem:[%s16618_s9 + $0x358] sm:$0xff] }
 0xe2e   : > { %v11905_v58 = vpop.f32.mrb[80].mxu1  ;;  %13047 = vmatprep.subr.bf16.mxu0 %v13046_v57 }
 0xe2f   : > { %v5962_v61 = vpop.f32.mrb[81].mxu1  ;;  %13049 = vmatpush3.bf16.msra.mxu0 %v13046_v57 }
 0xe30   : > { %v13050_v62 = vpack.c.bf16 %v11905_v58, %v5962_v61  ;;  %v9581_v58 = vld [vmem:[%s16618_s9 + $0x360] sm:$0xff] }
 0xe32   : > { %13051 = vmatprep.subr.bf16.mxu0 %v13050_v62  ;;  %v11980_v63 = vpop.f32.mrb[82].mxu1 }
 0xe33   : > { %13053 = vmatpush3.bf16.msra.mxu0 %v13050_v62  ;;  %v6428_v0 = vpop.f32.mrb[83].mxu1 }
 0xe34   : > { %v13062_v2 = vpack.c.bf16 %v11980_v63, %v6428_v0  ;;  %v9582_v63 = vld [vmem:[%s16618_s9 + $0x368] sm:$0xff] }
 0xe36   : > { %11923 = vmatmul.mubr.msk.f32.vlgmr.msra.gmra.mrb[36].mxu0 %vm2267_vm1, %v9570_v1  ;;  %v11983_v4 = vpop.f32.mrb[84].mxu1  ;;  %13063 = vmatprep.subr.bf16.mxu0 %v13062_v2  ;;  %v9583_v1 = vld [vmem:[%s16618_s9 + $0x370] sm:$0xff] }
 0xe37   : > { %v6438_v5 = vpop.f32.mrb[85].mxu1  ;;  %13065 = vmatpush3.bf16.msra.mxu0 %v13062_v2  ;;  %11925 = vmatprep.mubr.msk.f32.mxu0 %vm2267_vm1, %v9571_v3 }
 0xe38   : > { %v13066_v6 = vpack.c.bf16 %v11983_v4, %v6438_v5  ;;  %v9584_v4 = vld [vmem:[%s16618_s9 + $0x378] sm:$0xff] }
 0xe3a   : > { %11926 = vmatmul.mubr.msk.f32.gmra.mrb[38].mxu0 %vm2267_vm1, %v9572_v48  ;;  %v11986_v27 = vpop.f32.mrb[86].mxu1  ;;  %13067 = vmatprep.subr.bf16.mxu0 %v13066_v6  ;;  %v9585_v48 = vld [vmem:[%s16618_s9 + $0x380] sm:$0xff] }
 0xe3b   : > { %v6448_v23 = vpop.f32.mrb[87].mxu1  ;;  %13069 = vmatpush3.bf16.msra.mxu0 %v13066_v6  ;;  %11928 = vmatprep.mubr.msk.f32.mxu0 %vm2267_vm1, %v9573_v7 }
 0xe3c   : > { %v13070_v26 = vpack.c.bf16 %v11986_v27, %v6448_v23  ;;  %v9586_v27 = vld [vmem:[%s16618_s9 + $0x388] sm:$0xff] }
 0xe3e   : > { %11929 = vmatmul.mubr.msk.f32.gmra.mrb[40].mxu0 %vm2267_vm1, %v9574_v24  ;;  %v11989_v34 = vpop.f32.mrb[88].mxu1  ;;  %13071 = vmatprep.subr.bf16.mxu0 %v13070_v26  ;;  %v9587_v24 = vld [vmem:[%s16618_s9 + $0x390] sm:$0xff] }
 0xe3f   : > { %v6458_v36 = vpop.f32.mrb[89].mxu1  ;;  %13073 = vmatpush3.bf16.msra.mxu0 %v13070_v26  ;;  %11931 = vmatprep.mubr.msk.f32.mxu0 %vm2267_vm1, %v9575_v32 }
 0xe40   : > { %v13074_v40 = vpack.c.bf16 %v11989_v34, %v6458_v36  ;;  %v9588_v34 = vld [vmem:[%s16618_s9 + $0x398] sm:$0xff] }
 0xe42   : > { %11932 = vmatmul.mubr.msk.f32.gmra.mrb[42].mxu0 %vm2267_vm1, %v9576_v38  ;;  %13075 = vmatprep.subr.bf16.mxu0 %v13074_v40  ;;  %v12064_v46 = vpop.f32.mrb[90].mxu1  ;;  %v9589_v38 = vld [vmem:[%s16618_s9 + $0x3a0] sm:$0xff] }
 0xe43   : > { %13077 = vmatpush3.bf16.msra.mxu0 %v13074_v40  ;;  %v6924_v47 = vpop.f32.mrb[91].mxu1  ;;  %11934 = vmatprep.mubr.msk.f32.mxu0 %vm2267_vm1, %v9577_v42 }
 0xe44   : > { %v15748_v51 = vpack.c.bf16 %v12064_v46, %v6924_v47  ;;  %v9590_v46 = vld [vmem:[%s16618_s9 + $0x3a8] sm:$0xff] }
 0xe46   : > { %11935 = vmatmul.mubr.msk.f32.gmra.mrb[44].mxu0 %vm2267_vm1, %v9578_v49  ;;  %v12067_v53 = vpop.f32.mrb[92].mxu1  ;;  %13087 = vmatprep.subr.bf16.mxu0 %v15748_v51  ;;  %v9591_v49 = vld [vmem:[%s16618_s9 + $0x3b0] sm:$0xff] }
 0xe47   : > { %v6934_v43 = vpop.f32.mrb[93].mxu1  ;;  %11937 = vmatprep.mubr.msk.f32.mxu0 %vm2267_vm1, %v9579_v52 }
 0xe48   : > { %v15759_v57 = vpack.c.bf16 %v12067_v53, %v6934_v43  ;;  %v9592_v43 = vld [vmem:[%s16618_s9 + $0x3b8] sm:$0xff] }
 0xe4a   : > { %11938 = vmatmul.mubr.msk.f32.gmra.mrb[46].mxu0 %vm2267_vm1, %v9580_v56  ;;  %v12070_v61 = vpop.f32.mrb[94].mxu1 }
 0xe4b   : > { %v6944_v62 = vpop.f32.mrb[95].mxu1  ;;  %11940 = vmatprep.mubr.msk.f32.mxu0 %vm2267_vm1, %v9581_v58  ;;  %v9593_v58 = vld [vmem:[%s16618_s9 + $0x3c0] sm:$0xff] }
 0xe4c   : > { %v15769_v0 = vpack.c.bf16 %v12070_v61, %v6944_v62 }
 0xe4e   : > { %11941 = vmatmul.mubr.msk.f32.gmra.mrb[48].mxu0 %vm2267_vm1, %v9582_v63  ;;  %v12073_v2 = vpop.f32.mrb[96].mxu1  ;;  %v9594_v63 = vld [vmem:[%s16618_s9 + $0x3c8] sm:$0xff] }
 0xe4f   : > { %v6954_v3 = vpop.f32.mrb[97].mxu1  ;;  %11943 = vmatprep.mubr.msk.f32.mxu0 %vm2267_vm1, %v9583_v1 }
 0xe50   : > { %v15779_v5 = vpack.c.bf16 %v12073_v2, %v6954_v3  ;;  %v9595_v2 = vld [vmem:[%s16618_s9 + $0x3d0] sm:$0xff] }
 0xe52   : > { %11944 = vmatmul.mubr.msk.f32.gmra.mrb[50].mxu0 %vm2267_vm1, %v9584_v4  ;;  %v12148_v6 = vpop.f32.mrb[98].mxu1 }
 0xe53   : > { %v7420_v7 = vpop.f32.mrb[99].mxu1  ;;  %11946 = vmatprep.mubr.msk.f32.mxu0 %vm2267_vm1, %v9585_v48  ;;  %v9596_v48 = vld [vmem:[%s16618_s9 + $0x3d8] sm:$0xff] }
 0xe54   : > { %v15789_v23 = vpack.c.bf16 %v12148_v6, %v7420_v7  ;;  %v9597_v7 = vld [vmem:[%s16618_s9 + $0x3e0] sm:$0xff] }
 0xe56   : > { %11947 = vmatmul.mubr.msk.f32.gmra.mrb[52].mxu0 %vm2267_vm1, %v9586_v27  ;;  %v12151_v26 = vpop.f32.mrb[100].mxu1 }
 0xe57   : > { %v7430_v32 = vpop.f32.mrb[101].mxu1  ;;  %11949 = vmatprep.mubr.msk.f32.mxu0 %vm2267_vm1, %v9587_v24 }
 0xe58   : > { %v15799_v36 = vpack.c.bf16 %v12151_v26, %v7430_v32  ;;  %v9598_v26 = vld [vmem:[%s16618_s9 + $0x3e8] sm:$0xff] }
 0xe5a   : > { %11950 = vmatmul.mubr.msk.f32.gmra.mrb[54].mxu0 %vm2267_vm1, %v9588_v34  ;;  %v12154_v40 = vpop.f32.mrb[102].mxu1  ;;  %v9599_v34 = vld [vmem:[%s16618_s9 + $0x3f0] sm:$0xff] }
 0xe5b   : > { %v7440_v42 = vpop.f32.mrb[103].mxu1  ;;  %11952 = vmatprep.mubr.msk.f32.mxu0 %vm2267_vm1, %v9589_v38 }
 0xe5c   : > { %v15809_v47 = vpack.c.bf16 %v12154_v40, %v7440_v42  ;;  %v9600_v42 = vld [vmem:[%s16618_s9 + $0x3f8] sm:$0xff] }
 0xe5e   : > { %11953 = vmatmul.mubr.msk.f32.gmra.mrb[56].mxu0 %vm2267_vm1, %v9590_v46  ;;  %v12157_v52 = vpop.f32.mrb[104].mxu1 }
 0xe5f   : > { %v7450_v53 = vpop.f32.mrb[105].mxu1  ;;  %11955 = vmatprep.mubr.msk.f32.mxu0 %vm2267_vm1, %v9591_v49  ;;  %v9645_v49 = vld [vmem:[%s16618_s9 + $0x400] sm:$0xff] }
 0xe60   : > { %v15819_v56 = vpack.c.bf16 %v12157_v52, %v7450_v53 }
 0xe62   : > { %11956 = vmatmul.mubr.msk.f32.gmra.mrb[58].mxu0 %vm2267_vm1, %v9592_v43  ;;  %v12232_v61 = vpop.f32.mrb[106].mxu1  ;;  %v9646_v43 = vld [vmem:[%s16618_s9 + $0x408] sm:$0xff] }
 0xe63   : > { %v7916_v62 = vpop.f32.mrb[107].mxu1  ;;  %11958 = vmatprep.mubr.msk.f32.mxu0 %vm2267_vm1, %v9593_v58 }
 0xe64   : > { %v15829_v1 = vpack.c.bf16 %v12232_v61, %v7916_v62  ;;  %v9647_v61 = vld [vmem:[%s16618_s9 + $0x410] sm:$0xff] }
 0xe66   : > { %11959 = vmatmul.mubr.msk.f32.gmra.mrb[60].mxu0 %vm2267_vm1, %v9594_v63  ;;  %v12235_v3 = vpop.f32.mrb[108].mxu1 }
 0xe67   : > { %v7926_v4 = vpop.f32.mrb[109].mxu1  ;;  %11961 = vmatprep.mubr.msk.f32.mxu0 %vm2267_vm1, %v9595_v2  ;;  %v9648_v2 = vld [vmem:[%s16618_s9 + $0x418] sm:$0xff] }
 0xe68   : > { %v15839_v6 = vpack.c.bf16 %v12235_v3, %v7926_v4  ;;  %v9649_v4 = vld [vmem:[%s16618_s9 + $0x420] sm:$0xff] }
 0xe6a   : > { %11962 = vmatmul.mubr.msk.f32.gmra.mrb[62].mxu0 %vm2267_vm1, %v9596_v48  ;;  %v12238_v27 = vpop.f32.mrb[110].mxu1 }
 0xe6b   : > { %v7936_v24 = vpop.f32.mrb[111].mxu1  ;;  %11964 = vmatprep.mubr.msk.f32.mxu0 %vm2267_vm1, %v9597_v7  ;;  %v9650_v7 = vld [vmem:[%s16618_s9 + $0x428] sm:$0xff] }
 0xe6c   : > { %v15849_v32 = vpack.c.bf16 %v12238_v27, %v7936_v24  ;;  %v9651_v24 = vld [vmem:[%s16618_s9 + $0x430] sm:$0xff] }
 0xe6e   : > { %11965 = vmatmul.mubr.msk.f32.gmra.mrb[64].mxu0 %vm2267_vm1, %v9598_v26  ;;  %v12241_v38 = vpop.f32.mrb[112].mxu1 }
 0xe6f   : > { %v7946_v40 = vpop.f32.mrb[113].mxu1  ;;  %11967 = vmatprep.mubr.msk.f32.mxu0 %vm2267_vm1, %v9599_v34  ;;  %v9652_v34 = vld [vmem:[%s16618_s9 + $0x438] sm:$0xff] }
 0xe70   : > { %v15859_v46 = vpack.c.bf16 %v12241_v38, %v7946_v40  ;;  %v9653_v40 = vld [vmem:[%s16618_s9 + $0x440] sm:$0xff] }
 0xe72   : > { %11968 = vmatmul.mubr.msk.f32.gmra.mrb[66].mxu0 %vm2267_vm1, %v9600_v42  ;;  %v12316_v52 = vpop.f32.mrb[114].mxu1  ;;  %v9655_v42 = vld [vmem:[%s16618_s9 + $0x450] sm:$0xff] }
 0xe73   : > { %v8412_v53 = vpop.f32.mrb[115].mxu1  ;;  %12006 = vmatprep.mubr.msk.f32.mxu0 %vm2267_vm1, %v9645_v49  ;;  %v9657_v49 = vld [vmem:[%s16618_s9 + $0x460] sm:$0xff] }
 0xe74   : > { %v15869_v58 = vpack.c.bf16 %v12316_v52, %v8412_v53  ;;  %v9658_v52 = vld [vmem:[%s16618_s9 + $0x468] sm:$0xff]  ;;  %v9659_v53 = vld [vmem:[%s16618_s9 + $0x470] sm:$0xff] }
 0xe76   : > { %12007 = vmatmul.mubr.msk.f32.vlgmr.msra.gmra.mrb[36].mxu0 %vm2267_vm1, %v9646_v43  ;;  %v12319_v62 = vpop.f32.mrb[116].mxu1  ;;  %v9660_v43 = vld [vmem:[%s16618_s9 + $0x478] sm:$0xff] }
 0xe77   : > { %13089 = vmatpush3.bf16.msra.mxu0 %v15748_v51  ;;  %v8422_v63 = vpop.f32.mrb[117].mxu1  ;;  %12009 = vmatprep.mubr.msk.f32.mxu0 %vm2267_vm1, %v9647_v61  ;;  %v9661_v61 = vld [vmem:[%s16618_s9 + $0x480] sm:$0xff] }
 0xe78   : > { %13091 = vmatprep.subr.bf16.mxu0 %v15759_v57  ;;  %v15881_v3 = vpack.c.bf16 %v12319_v62, %v8422_v63  ;;  %v9662_v62 = vld [vmem:[%s16618_s9 + $0x488] sm:$0xff]  ;;  %v9663_v63 = vld [vmem:[%s16618_s9 + $0x490] sm:$0xff] }
 0xe7a   : > { %12010 = vmatmul.mubr.msk.f32.gmra.mrb[38].mxu0 %vm2267_vm1, %v9648_v2  ;;  %v12322_v48 = vpop.f32.mrb[118].mxu1  ;;  %v9664_v2 = vld [vmem:[%s16618_s9 + $0x498] sm:$0xff] }
 0xe7b   : > { %13093 = vmatpush3.bf16.msra.mxu0 %v15759_v57  ;;  %v8432_v51 = vpop.f32.mrb[119].mxu1  ;;  %12012 = vmatprep.mubr.msk.f32.mxu0 %vm2267_vm1, %v9649_v4  ;;  %v9665_v4 = vld [vmem:[%s16618_s9 + $0x4a0] sm:$0xff] }
 0xe7c   : > { %13095 = vmatprep.subr.bf16.mxu0 %v15769_v0  ;;  %v15893_v27 = vpack.c.bf16 %v12322_v48, %v8432_v51  ;;  %v9666_v48 = vld [vmem:[%s16618_s9 + $0x4a8] sm:$0xff]  ;;  %v9667_v51 = vld [vmem:[%s16618_s9 + $0x4b0] sm:$0xff] }
 0xe7e   : > { %12013 = vmatmul.mubr.msk.f32.gmra.mrb[40].mxu0 %vm2267_vm1, %v9650_v7  ;;  %v12325_v26 = vpop.f32.mrb[120].mxu1  ;;  %v9668_v7 = vld [vmem:[%s16618_s9 + $0x4b8] sm:$0xff] }
 0xe7f   : > { %13097 = vmatpush3.bf16.msra.mxu0 %v15769_v0  ;;  %v8442_v57 = vpop.f32.mrb[121].mxu1  ;;  %12015 = vmatprep.mubr.msk.f32.mxu0 %vm2267_vm1, %v9651_v24  ;;  %v9654_v0 = vld [vmem:[%s16618_s9 + $0x448] sm:$0xff]  ;;  %v9669_v24 = vld [vmem:[%s16618_s9 + $0x4c0] sm:$0xff] }
 0xe80   : > { %13099 = vmatprep.subr.bf16.mxu0 %v15779_v5  ;;  %v15905_v38 = vpack.c.bf16 %v12325_v26, %v8442_v57  ;;  %v9670_v26 = vld [vmem:[%s16618_s9 + $0x4c8] sm:$0xff]  ;;  %v9671_v57 = vld [vmem:[%s16618_s9 + $0x4d0] sm:$0xff] }
 0xe82   : > { %12016 = vmatmul.mubr.msk.f32.gmra.mrb[42].mxu0 %vm2267_vm1, %v9652_v34  ;;  %v9672_v34 = vld [vmem:[%s16618_s9 + $0x4d8] sm:$0xff] }
 0xe83   : > { %13101 = vmatpush3.bf16.msra.mxu0 %v15779_v5  ;;  %12018 = vmatprep.mubr.msk.f32.mxu0 %vm2267_vm1, %v9653_v40  ;;  %v9656_v5 = vld [vmem:[%s16618_s9 + $0x458] sm:$0xff]  ;;  %v9673_v40 = vld [vmem:[%s16618_s9 + $0x4e0] sm:$0xff] }
 0xe84   : > { %13111 = vmatprep.subr.bf16.mxu0 %v15789_v23 }
 0xe86   : > { %12019 = vmatmul.mubr.msk.f32.gmra.mrb[44].mxu0 %vm2267_vm1, %v9654_v0  ;;  %v9674_v0 = vld [vmem:[%s16618_s9 + $0x4e8] sm:$0xff] }
 0xe87   : > { %12021 = vmatprep.mubr.msk.f32.mxu0 %vm2267_vm1, %v9655_v42  ;;  %v9675_v42 = vld [vmem:[%s16618_s9 + $0x4f0] sm:$0xff] }
 0xe8a   : > { %12022 = vmatmul.mubr.msk.f32.gmra.mrb[46].mxu0 %vm2267_vm1, %v9656_v5  ;;  %v9676_v5 = vld [vmem:[%s16618_s9 + $0x4f8] sm:$0xff] }
 0xe8b   : > { %12024 = vmatprep.mubr.msk.f32.mxu0 %vm2267_vm1, %v9657_v49  ;;  %v9721_v49 = vld [vmem:[%s16618_s9 + $0x500] sm:$0xff] }
 0xe8e   : > { %12025 = vmatmul.mubr.msk.f32.gmra.mrb[48].mxu0 %vm2267_vm1, %v9658_v52  ;;  %v9722_v52 = vld [vmem:[%s16618_s9 + $0x508] sm:$0xff] }
 0xe8f   : > { %12027 = vmatprep.mubr.msk.f32.mxu0 %vm2267_vm1, %v9659_v53  ;;  %v9723_v53 = vld [vmem:[%s16618_s9 + $0x510] sm:$0xff] }
 0xe92   : > { %12028 = vmatmul.mubr.msk.f32.gmra.mrb[50].mxu0 %vm2267_vm1, %v9660_v43  ;;  %v9724_v43 = vld [vmem:[%s16618_s9 + $0x518] sm:$0xff] }
 0xe93   : > { %12030 = vmatprep.mubr.msk.f32.mxu0 %vm2267_vm1, %v9661_v61  ;;  %v9725_v61 = vld [vmem:[%s16618_s9 + $0x520] sm:$0xff] }
 0xe96   : > { %12031 = vmatmul.mubr.msk.f32.gmra.mrb[52].mxu0 %vm2267_vm1, %v9662_v62  ;;  %v9727_v62 = vld [vmem:[%s16618_s9 + $0x530] sm:$0xff] }
 0xe97   : > { %12033 = vmatprep.mubr.msk.f32.mxu0 %vm2267_vm1, %v9663_v63  ;;  %v9729_v63 = vld [vmem:[%s16618_s9 + $0x540] sm:$0xff] }
 0xe9a   : > { %12034 = vmatmul.mubr.msk.f32.gmra.mrb[54].mxu0 %vm2267_vm1, %v9664_v2  ;;  %v9731_v2 = vld [vmem:[%s16618_s9 + $0x550] sm:$0xff] }
 0xe9b   : > { %12036 = vmatprep.mubr.msk.f32.mxu0 %vm2267_vm1, %v9665_v4  ;;  %v9733_v4 = vld [vmem:[%s16618_s9 + $0x560] sm:$0xff] }
 0xe9e   : > { %12037 = vmatmul.mubr.msk.f32.gmra.mrb[56].mxu0 %vm2267_vm1, %v9666_v48  ;;  %v9734_v48 = vld [vmem:[%s16618_s9 + $0x568] sm:$0xff] }
 0xe9f   : > { %12039 = vmatprep.mubr.msk.f32.mxu0 %vm2267_vm1, %v9667_v51  ;;  %v9735_v51 = vld [vmem:[%s16618_s9 + $0x570] sm:$0xff] }
 0xea2   : > { %12040 = vmatmul.mubr.msk.f32.gmra.mrb[58].mxu0 %vm2267_vm1, %v9668_v7  ;;  %v9736_v7 = vld [vmem:[%s16618_s9 + $0x578] sm:$0xff] }
 0xea3   : > { %12042 = vmatprep.mubr.msk.f32.mxu0 %vm2267_vm1, %v9669_v24  ;;  %v9737_v24 = vld [vmem:[%s16618_s9 + $0x580] sm:$0xff] }
 0xea6   : > { %12043 = vmatmul.mubr.msk.f32.gmra.mrb[60].mxu0 %vm2267_vm1, %v9670_v26  ;;  %v9738_v26 = vld [vmem:[%s16618_s9 + $0x588] sm:$0xff] }
 0xea7   : > { %12045 = vmatprep.mubr.msk.f32.mxu0 %vm2267_vm1, %v9671_v57  ;;  %v9739_v57 = vld [vmem:[%s16618_s9 + $0x590] sm:$0xff] }
 0xeaa   : > { %12046 = vmatmul.mubr.msk.f32.gmra.mrb[62].mxu0 %vm2267_vm1, %v9672_v34  ;;  %v9740_v34 = vld [vmem:[%s16618_s9 + $0x598] sm:$0xff] }
 0xeab   : > { %12048 = vmatprep.mubr.msk.f32.mxu0 %vm2267_vm1, %v9673_v40  ;;  %v9741_v40 = vld [vmem:[%s16618_s9 + $0x5a0] sm:$0xff] }
 0xeae   : > { %12049 = vmatmul.mubr.msk.f32.gmra.mrb[64].mxu0 %vm2267_vm1, %v9674_v0  ;;  %v9742_v0 = vld [vmem:[%s16618_s9 + $0x5a8] sm:$0xff] }
 0xeaf   : > { %12051 = vmatprep.mubr.msk.f32.mxu0 %vm2267_vm1, %v9675_v42  ;;  %v9743_v42 = vld [vmem:[%s16618_s9 + $0x5b0] sm:$0xff] }
 0xeb2   : > { %12052 = vmatmul.mubr.msk.f32.gmra.mrb[66].mxu0 %vm2267_vm1, %v9676_v5  ;;  %v9744_v5 = vld [vmem:[%s16618_s9 + $0x5b8] sm:$0xff] }
 0xeb3   : > { %12090 = vmatprep.mubr.msk.f32.mxu0 %vm2267_vm1, %v9721_v49  ;;  %v9745_v49 = vld [vmem:[%s16618_s9 + $0x5c0] sm:$0xff] }
 0xeb6   : > { %12091 = vmatmul.mubr.msk.f32.vlgmr.msra.gmra.mrb[36].mxu0 %vm2267_vm1, %v9722_v52  ;;  %v9746_v52 = vld [vmem:[%s16618_s9 + $0x5c8] sm:$0xff] }
 0xeb7   : > { %13113 = vmatpush3.bf16.msra.mxu0 %v15789_v23  ;;  %12093 = vmatprep.mubr.msk.f32.mxu0 %vm2267_vm1, %v9723_v53  ;;  %v9726_v23 = vld [vmem:[%s16618_s9 + $0x528] sm:$0xff]  ;;  %v9747_v53 = vld [vmem:[%s16618_s9 + $0x5d0] sm:$0xff] }
 0xeb8   : > { %13115 = vmatprep.subr.bf16.mxu0 %v15799_v36 }
 0xeba   : > { %12094 = vmatmul.mubr.msk.f32.gmra.mrb[38].mxu0 %vm2267_vm1, %v9724_v43  ;;  %v9748_v43 = vld [vmem:[%s16618_s9 + $0x5d8] sm:$0xff] }
 0xebb   : > { %13117 = vmatpush3.bf16.msra.mxu0 %v15799_v36  ;;  %12096 = vmatprep.mubr.msk.f32.mxu0 %vm2267_vm1, %v9725_v61  ;;  %v9728_v36 = vld [vmem:[%s16618_s9 + $0x538] sm:$0xff]  ;;  %v9749_v61 = vld [vmem:[%s16618_s9 + $0x5e0] sm:$0xff] }
 0xebc   : > { %13119 = vmatprep.subr.bf16.mxu0 %v15809_v47 }
 0xebe   : > { %12097 = vmatmul.mubr.msk.f32.gmra.mrb[40].mxu0 %vm2267_vm1, %v9726_v23  ;;  %v9750_v23 = vld [vmem:[%s16618_s9 + $0x5e8] sm:$0xff] }
 0xebf   : > { %13121 = vmatpush3.bf16.msra.mxu0 %v15809_v47  ;;  %12099 = vmatprep.mubr.msk.f32.mxu0 %vm2267_vm1, %v9727_v62  ;;  %v9730_v47 = vld [vmem:[%s16618_s9 + $0x548] sm:$0xff]  ;;  %v9751_v62 = vld [vmem:[%s16618_s9 + $0x5f0] sm:$0xff] }
 0xec0   : > { %13123 = vmatprep.subr.bf16.mxu0 %v15819_v56 }
 0xec2   : > { %12100 = vmatmul.mubr.msk.f32.gmra.mrb[42].mxu0 %vm2267_vm1, %v9728_v36  ;;  %v9752_v36 = vld [vmem:[%s16618_s9 + $0x5f8] sm:$0xff] }
 0xec3   : > { %13125 = vmatpush3.bf16.msra.mxu0 %v15819_v56  ;;  %12102 = vmatprep.mubr.msk.f32.mxu0 %vm2267_vm1, %v9729_v63  ;;  %v9732_v56 = vld [vmem:[%s16618_s9 + $0x558] sm:$0xff]  ;;  %v9797_v63 = vld [vmem:[%s16618_s9 + $0x600] sm:$0xff] }
 0xec4   : > { %13135 = vmatprep.subr.bf16.mxu0 %v15829_v1 }
 0xec6   : > { %12103 = vmatmul.mubr.msk.f32.gmra.mrb[44].mxu0 %vm2267_vm1, %v9730_v47  ;;  %v9798_v47 = vld [vmem:[%s16618_s9 + $0x608] sm:$0xff] }
 0xec7   : > { %12105 = vmatprep.mubr.msk.f32.mxu0 %vm2267_vm1, %v9731_v2  ;;  %v9799_v2 = vld [vmem:[%s16618_s9 + $0x610] sm:$0xff] }
 0xeca   : > { %12106 = vmatmul.mubr.msk.f32.gmra.mrb[46].mxu0 %vm2267_vm1, %v9732_v56  ;;  %v9800_v56 = vld [vmem:[%s16618_s9 + $0x618] sm:$0xff] }
 0xecb   : > { %12108 = vmatprep.mubr.msk.f32.mxu0 %vm2267_vm1, %v9733_v4  ;;  %v9801_v4 = vld [vmem:[%s16618_s9 + $0x620] sm:$0xff] }
 0xece   : > { %12109 = vmatmul.mubr.msk.f32.gmra.mrb[48].mxu0 %vm2267_vm1, %v9734_v48  ;;  %v9803_v48 = vld [vmem:[%s16618_s9 + $0x630] sm:$0xff] }
 0xecf   : > { %12111 = vmatprep.mubr.msk.f32.mxu0 %vm2267_vm1, %v9735_v51  ;;  %v9805_v51 = vld [vmem:[%s16618_s9 + $0x640] sm:$0xff] }
 0xed2   : > { %12112 = vmatmul.mubr.msk.f32.gmra.mrb[50].mxu0 %vm2267_vm1, %v9736_v7  ;;  %v9807_v7 = vld [vmem:[%s16618_s9 + $0x650] sm:$0xff] }
 0xed3   : > { %12114 = vmatprep.mubr.msk.f32.mxu0 %vm2267_vm1, %v9737_v24  ;;  %v9809_v24 = vld [vmem:[%s16618_s9 + $0x660] sm:$0xff] }
 0xed6   : > { %12115 = vmatmul.mubr.msk.f32.gmra.mrb[52].mxu0 %vm2267_vm1, %v9738_v26  ;;  %v9810_v26 = vld [vmem:[%s16618_s9 + $0x668] sm:$0xff] }
 0xed7   : > { %12117 = vmatprep.mubr.msk.f32.mxu0 %vm2267_vm1, %v9739_v57  ;;  %v9811_v57 = vld [vmem:[%s16618_s9 + $0x670] sm:$0xff] }
 0xeda   : > { %12118 = vmatmul.mubr.msk.f32.gmra.mrb[54].mxu0 %vm2267_vm1, %v9740_v34  ;;  %v9812_v34 = vld [vmem:[%s16618_s9 + $0x678] sm:$0xff] }
 0xedb   : > { %12120 = vmatprep.mubr.msk.f32.mxu0 %vm2267_vm1, %v9741_v40  ;;  %v9813_v40 = vld [vmem:[%s16618_s9 + $0x680] sm:$0xff] }
 0xede   : > { %12121 = vmatmul.mubr.msk.f32.gmra.mrb[56].mxu0 %vm2267_vm1, %v9742_v0  ;;  %v9814_v0 = vld [vmem:[%s16618_s9 + $0x688] sm:$0xff] }
 0xedf   : > { %12123 = vmatprep.mubr.msk.f32.mxu0 %vm2267_vm1, %v9743_v42  ;;  %v9815_v42 = vld [vmem:[%s16618_s9 + $0x690] sm:$0xff] }
 0xee2   : > { %12124 = vmatmul.mubr.msk.f32.gmra.mrb[58].mxu0 %vm2267_vm1, %v9744_v5  ;;  %v9816_v5 = vld [vmem:[%s16618_s9 + $0x698] sm:$0xff] }
 0xee3   : > { %12126 = vmatprep.mubr.msk.f32.mxu0 %vm2267_vm1, %v9745_v49  ;;  %v9817_v49 = vld [vmem:[%s16618_s9 + $0x6a0] sm:$0xff] }
 0xee6   : > { %12127 = vmatmul.mubr.msk.f32.gmra.mrb[60].mxu0 %vm2267_vm1, %v9746_v52  ;;  %v9818_v52 = vld [vmem:[%s16618_s9 + $0x6a8] sm:$0xff] }
 0xee7   : > { %12129 = vmatprep.mubr.msk.f32.mxu0 %vm2267_vm1, %v9747_v53  ;;  %v9819_v53 = vld [vmem:[%s16618_s9 + $0x6b0] sm:$0xff] }
 0xeea   : > { %12130 = vmatmul.mubr.msk.f32.gmra.mrb[62].mxu0 %vm2267_vm1, %v9748_v43  ;;  %v9820_v43 = vld [vmem:[%s16618_s9 + $0x6b8] sm:$0xff] }
 0xeeb   : > { %12132 = vmatprep.mubr.msk.f32.mxu0 %vm2267_vm1, %v9749_v61  ;;  %v9821_v61 = vld [vmem:[%s16618_s9 + $0x6c0] sm:$0xff] }
 0xeee   : > { %12133 = vmatmul.mubr.msk.f32.gmra.mrb[64].mxu0 %vm2267_vm1, %v9750_v23  ;;  %v9822_v23 = vld [vmem:[%s16618_s9 + $0x6c8] sm:$0xff] }
 0xeef   : > { %12135 = vmatprep.mubr.msk.f32.mxu0 %vm2267_vm1, %v9751_v62  ;;  %v9823_v62 = vld [vmem:[%s16618_s9 + $0x6d0] sm:$0xff] }
 0xef2   : > { %12136 = vmatmul.mubr.msk.f32.gmra.mrb[66].mxu0 %vm2267_vm1, %v9752_v36  ;;  %v9824_v36 = vld [vmem:[%s16618_s9 + $0x6d8] sm:$0xff] }
 0xef3   : > { %12174 = vmatprep.mubr.msk.f32.mxu0 %vm2267_vm1, %v9797_v63  ;;  %v9825_v63 = vld [vmem:[%s16618_s9 + $0x6e0] sm:$0xff] }
 0xef6   : > { %12175 = vmatmul.mubr.msk.f32.vlgmr.msra.gmra.mrb[36].mxu0 %vm2267_vm1, %v9798_v47  ;;  %v9826_v47 = vld [vmem:[%s16618_s9 + $0x6e8] sm:$0xff] }
 0xef7   : > { %13137 = vmatpush3.bf16.msra.mxu0 %v15829_v1  ;;  %12177 = vmatprep.mubr.msk.f32.mxu0 %vm2267_vm1, %v9799_v2  ;;  %v9802_v1 = vld [vmem:[%s16618_s9 + $0x628] sm:$0xff]  ;;  %v9827_v2 = vld [vmem:[%s16618_s9 + $0x6f0] sm:$0xff] }
 0xef8   : > { %13139 = vmatprep.subr.bf16.mxu0 %v15839_v6 }
 0xefa   : > { %12178 = vmatmul.mubr.msk.f32.gmra.mrb[38].mxu0 %vm2267_vm1, %v9800_v56  ;;  %v9828_v56 = vld [vmem:[%s16618_s9 + $0x6f8] sm:$0xff] }
 0xefb   : > { %13141 = vmatpush3.bf16.msra.mxu0 %v15839_v6  ;;  %12180 = vmatprep.mubr.msk.f32.mxu0 %vm2267_vm1, %v9801_v4  ;;  %v9804_v6 = vld [vmem:[%s16618_s9 + $0x638] sm:$0xff]  ;;  %v9873_v4 = vld [vmem:[%s16618_s9 + $0x700] sm:$0xff] }
 0xefc   : > { %13143 = vmatprep.subr.bf16.mxu0 %v15849_v32 }
 0xefe   : > { %12181 = vmatmul.mubr.msk.f32.gmra.mrb[40].mxu0 %vm2267_vm1, %v9802_v1  ;;  %v9874_v1 = vld [vmem:[%s16618_s9 + $0x708] sm:$0xff] }
 0xeff   : > { %13145 = vmatpush3.bf16.msra.mxu0 %v15849_v32  ;;  %12183 = vmatprep.mubr.msk.f32.mxu0 %vm2267_vm1, %v9803_v48  ;;  %v9806_v32 = vld [vmem:[%s16618_s9 + $0x648] sm:$0xff]  ;;  %v9875_v48 = vld [vmem:[%s16618_s9 + $0x710] sm:$0xff] }
 0xf00   : > { %13147 = vmatprep.subr.bf16.mxu0 %v15859_v46 }
 0xf02   : > { %12184 = vmatmul.mubr.msk.f32.gmra.mrb[42].mxu0 %vm2267_vm1, %v9804_v6  ;;  %v9876_v6 = vld [vmem:[%s16618_s9 + $0x718] sm:$0xff] }
 0xf03   : > { %13149 = vmatpush3.bf16.msra.mxu0 %v15859_v46  ;;  %12186 = vmatprep.mubr.msk.f32.mxu0 %vm2267_vm1, %v9805_v51  ;;  %v9808_v46 = vld [vmem:[%s16618_s9 + $0x658] sm:$0xff]  ;;  %v9877_v51 = vld [vmem:[%s16618_s9 + $0x720] sm:$0xff] }
 0xf04   : > { %13159 = vmatprep.subr.bf16.mxu0 %v15869_v58 }
 0xf06   : > { %12187 = vmatmul.mubr.msk.f32.gmra.mrb[44].mxu0 %vm2267_vm1, %v9806_v32  ;;  %v9879_v32 = vld [vmem:[%s16618_s9 + $0x730] sm:$0xff] }
 0xf07   : > { %12189 = vmatprep.mubr.msk.f32.mxu0 %vm2267_vm1, %v9807_v7  ;;  %v9881_v7 = vld [vmem:[%s16618_s9 + $0x740] sm:$0xff] }
 0xf0a   : > { %12190 = vmatmul.mubr.msk.f32.gmra.mrb[46].mxu0 %vm2267_vm1, %v9808_v46  ;;  %v9883_v46 = vld [vmem:[%s16618_s9 + $0x750] sm:$0xff] }
 0xf0b   : > { %12192 = vmatprep.mubr.msk.f32.mxu0 %vm2267_vm1, %v9809_v24  ;;  %v9884_v24 = vld [vmem:[%s16618_s9 + $0x758] sm:$0xff] }
 0xf0e   : > { %12193 = vmatmul.mubr.msk.f32.gmra.mrb[48].mxu0 %vm2267_vm1, %v9810_v26  ;;  %v9886_v26 = vld [vmem:[%s16618_s9 + $0x768] sm:$0xff] }
 0xf0f   : > { %12195 = vmatprep.mubr.msk.f32.mxu0 %vm2267_vm1, %v9811_v57  ;;  %v9887_v57 = vld [vmem:[%s16618_s9 + $0x770] sm:$0xff] }
 0xf12   : > { %12196 = vmatmul.mubr.msk.f32.gmra.mrb[50].mxu0 %vm2267_vm1, %v9812_v34  ;;  %v9888_v34 = vld [vmem:[%s16618_s9 + $0x778] sm:$0xff] }
 0xf13   : > { %12198 = vmatprep.mubr.msk.f32.mxu0 %vm2267_vm1, %v9813_v40  ;;  %v9889_v40 = vld [vmem:[%s16618_s9 + $0x780] sm:$0xff] }
 0xf16   : > { %12199 = vmatmul.mubr.msk.f32.gmra.mrb[52].mxu0 %vm2267_vm1, %v9814_v0  ;;  %v9890_v0 = vld [vmem:[%s16618_s9 + $0x788] sm:$0xff] }
 0xf17   : > { %12201 = vmatprep.mubr.msk.f32.mxu0 %vm2267_vm1, %v9815_v42  ;;  %v9891_v42 = vld [vmem:[%s16618_s9 + $0x790] sm:$0xff] }
 0xf1a   : > { %12202 = vmatmul.mubr.msk.f32.gmra.mrb[54].mxu0 %vm2267_vm1, %v9816_v5  ;;  %v9892_v5 = vld [vmem:[%s16618_s9 + $0x798] sm:$0xff] }
 0xf1b   : > { %12204 = vmatprep.mubr.msk.f32.mxu0 %vm2267_vm1, %v9817_v49  ;;  %v9893_v49 = vld [vmem:[%s16618_s9 + $0x7a0] sm:$0xff] }
 0xf1e   : > { %12205 = vmatmul.mubr.msk.f32.gmra.mrb[56].mxu0 %vm2267_vm1, %v9818_v52  ;;  %v9894_v52 = vld [vmem:[%s16618_s9 + $0x7a8] sm:$0xff] }
 0xf1f   : > { %12207 = vmatprep.mubr.msk.f32.mxu0 %vm2267_vm1, %v9819_v53  ;;  %v9895_v53 = vld [vmem:[%s16618_s9 + $0x7b0] sm:$0xff] }
 0xf22   : > { %12208 = vmatmul.mubr.msk.f32.gmra.mrb[58].mxu0 %vm2267_vm1, %v9820_v43  ;;  %v9896_v43 = vld [vmem:[%s16618_s9 + $0x7b8] sm:$0xff] }
 0xf23   : > { %12210 = vmatprep.mubr.msk.f32.mxu0 %vm2267_vm1, %v9821_v61  ;;  %v9897_v61 = vld [vmem:[%s16618_s9 + $0x7c0] sm:$0xff] }
 0xf26   : > { %12211 = vmatmul.mubr.msk.f32.gmra.mrb[60].mxu0 %vm2267_vm1, %v9822_v23  ;;  %v9898_v23 = vld [vmem:[%s16618_s9 + $0x7c8] sm:$0xff] }
 0xf27   : > { %12213 = vmatprep.mubr.msk.f32.mxu0 %vm2267_vm1, %v9823_v62  ;;  %v9899_v62 = vld [vmem:[%s16618_s9 + $0x7d0] sm:$0xff] }
 0xf2a   : > { %12214 = vmatmul.mubr.msk.f32.gmra.mrb[62].mxu0 %vm2267_vm1, %v9824_v36  ;;  %v9900_v36 = vld [vmem:[%s16618_s9 + $0x7d8] sm:$0xff] }
 0xf2b   : > { %12216 = vmatprep.mubr.msk.f32.mxu0 %vm2267_vm1, %v9825_v63  ;;  %v9901_v63 = vld [vmem:[%s16618_s9 + $0x7e0] sm:$0xff] }
 0xf2e   : > { %12217 = vmatmul.mubr.msk.f32.gmra.mrb[64].mxu0 %vm2267_vm1, %v9826_v47  ;;  %v9902_v47 = vld [vmem:[%s16618_s9 + $0x7e8] sm:$0xff] }
 0xf2f   : > { %12219 = vmatprep.mubr.msk.f32.mxu0 %vm2267_vm1, %v9827_v2  ;;  %v9903_v2 = vld [vmem:[%s16618_s9 + $0x7f0] sm:$0xff] }
 0xf32   : > { %12220 = vmatmul.mubr.msk.f32.gmra.mrb[66].mxu0 %vm2267_vm1, %v9828_v56  ;;  %v9904_v56 = vld [vmem:[%s16618_s9 + $0x7f8] sm:$0xff] }
 0xf33   : > { %12258 = vmatprep.mubr.msk.f32.mxu0 %vm2267_vm1, %v9873_v4  ;;  %v9949_v4 = vld [vmem:[%s16618_s9 + $0x800] sm:$0xff] }
 0xf36   : > { %12259 = vmatmul.mubr.msk.f32.vlgmr.msra.gmra.mrb[36].mxu0 %vm2267_vm1, %v9874_v1  ;;  %v9950_v1 = vld [vmem:[%s16618_s9 + $0x808] sm:$0xff] }
 0xf37   : > { %13161 = vmatpush3.bf16.msra.mxu0 %v15869_v58  ;;  %12261 = vmatprep.mubr.msk.f32.mxu0 %vm2267_vm1, %v9875_v48  ;;  %v9878_v58 = vld [vmem:[%s16618_s9 + $0x728] sm:$0xff]  ;;  %v9951_v48 = vld [vmem:[%s16618_s9 + $0x810] sm:$0xff] }
 0xf38   : > { %13163 = vmatprep.subr.bf16.mxu0 %v15881_v3 }
 0xf3a   : > { %12262 = vmatmul.mubr.msk.f32.gmra.mrb[38].mxu0 %vm2267_vm1, %v9876_v6  ;;  %v9952_v6 = vld [vmem:[%s16618_s9 + $0x818] sm:$0xff] }
 0xf3b   : > { %13165 = vmatpush3.bf16.msra.mxu0 %v15881_v3  ;;  %12264 = vmatprep.mubr.msk.f32.mxu0 %vm2267_vm1, %v9877_v51  ;;  %v9880_v3 = vld [vmem:[%s16618_s9 + $0x738] sm:$0xff]  ;;  %v9953_v51 = vld [vmem:[%s16618_s9 + $0x820] sm:$0xff] }
 0xf3c   : > { %13167 = vmatprep.subr.bf16.mxu0 %v15893_v27 }
 0xf3e   : > { %12265 = vmatmul.mubr.msk.f32.gmra.mrb[40].mxu0 %vm2267_vm1, %v9878_v58  ;;  %v9954_v58 = vld [vmem:[%s16618_s9 + $0x828] sm:$0xff] }
 0xf3f   : > { %13169 = vmatpush3.bf16.msra.mxu0 %v15893_v27  ;;  %12267 = vmatprep.mubr.msk.f32.mxu0 %vm2267_vm1, %v9879_v32  ;;  %v9882_v27 = vld [vmem:[%s16618_s9 + $0x748] sm:$0xff]  ;;  %v9955_v32 = vld [vmem:[%s16618_s9 + $0x830] sm:$0xff] }
 0xf40   : > { %13171 = vmatprep.subr.bf16.mxu0 %v15905_v38 }
 0xf42   : > { %12268 = vmatmul.mubr.msk.f32.gmra.mrb[42].mxu0 %vm2267_vm1, %v9880_v3  ;;  %v9956_v3 = vld [vmem:[%s16618_s9 + $0x838] sm:$0xff] }
 0xf43   : > { %13173 = vmatpush3.bf16.msra.mxu0 %v15905_v38  ;;  %12270 = vmatprep.mubr.msk.f32.mxu0 %vm2267_vm1, %v9881_v7  ;;  %v9885_v38 = vld [vmem:[%s16618_s9 + $0x760] sm:$0xff] }
 0xf44   : > { %v9957_v7 = vld [vmem:[%s16618_s9 + $0x840] sm:$0xff] }
 0xf46   : > { %12271 = vmatmul.mubr.msk.f32.gmra.mrb[44].mxu0 %vm2267_vm1, %v9882_v27  ;;  %v9958_v27 = vld [vmem:[%s16618_s9 + $0x848] sm:$0xff] }
 0xf47   : > { %12273 = vmatprep.mubr.msk.f32.mxu0 %vm2267_vm1, %v9883_v46  ;;  %v9959_v46 = vld [vmem:[%s16618_s9 + $0x850] sm:$0xff] }
 0xf4a   : > { %12274 = vmatmul.mubr.msk.f32.gmra.mrb[46].mxu0 %vm2267_vm1, %v9884_v24  ;;  %v9960_v24 = vld [vmem:[%s16618_s9 + $0x858] sm:$0xff] }
 0xf4b   : > { %12276 = vmatprep.mubr.msk.f32.mxu0 %vm2267_vm1, %v9885_v38  ;;  %v9961_v38 = vld [vmem:[%s16618_s9 + $0x860] sm:$0xff] }
 0xf4e   : > { %12277 = vmatmul.mubr.msk.f32.gmra.mrb[48].mxu0 %vm2267_vm1, %v9886_v26  ;;  %v9962_v26 = vld [vmem:[%s16618_s9 + $0x868] sm:$0xff] }
 0xf4f   : > { %12279 = vmatprep.mubr.msk.f32.mxu0 %vm2267_vm1, %v9887_v57  ;;  %v9963_v57 = vld [vmem:[%s16618_s9 + $0x870] sm:$0xff] }
 0xf52   : > { %12280 = vmatmul.mubr.msk.f32.gmra.mrb[50].mxu0 %vm2267_vm1, %v9888_v34  ;;  %v9964_v34 = vld [vmem:[%s16618_s9 + $0x878] sm:$0xff] }
 0xf53   : > { %12282 = vmatprep.mubr.msk.f32.mxu0 %vm2267_vm1, %v9889_v40  ;;  %v9965_v40 = vld [vmem:[%s16618_s9 + $0x880] sm:$0xff] }
 0xf56   : > { %12283 = vmatmul.mubr.msk.f32.gmra.mrb[52].mxu0 %vm2267_vm1, %v9890_v0  ;;  %v9966_v0 = vld [vmem:[%s16618_s9 + $0x888] sm:$0xff] }
 0xf57   : > { %12285 = vmatprep.mubr.msk.f32.mxu0 %vm2267_vm1, %v9891_v42  ;;  %v9967_v42 = vld [vmem:[%s16618_s9 + $0x890] sm:$0xff] }
 0xf5a   : > { %12286 = vmatmul.mubr.msk.f32.gmra.mrb[54].mxu0 %vm2267_vm1, %v9892_v5  ;;  %v9968_v5 = vld [vmem:[%s16618_s9 + $0x898] sm:$0xff] }
 0xf5b   : > { %12288 = vmatprep.mubr.msk.f32.mxu0 %vm2267_vm1, %v9893_v49  ;;  %v9969_v49 = vld [vmem:[%s16618_s9 + $0x8a0] sm:$0xff] }
 0xf5e   : > { %12289 = vmatmul.mubr.msk.f32.gmra.mrb[56].mxu0 %vm2267_vm1, %v9894_v52  ;;  %v9970_v52 = vld [vmem:[%s16618_s9 + $0x8a8] sm:$0xff] }
 0xf5f   : > { %12291 = vmatprep.mubr.msk.f32.mxu0 %vm2267_vm1, %v9895_v53  ;;  %v9971_v53 = vld [vmem:[%s16618_s9 + $0x8b0] sm:$0xff] }
 0xf62   : > { %12292 = vmatmul.mubr.msk.f32.gmra.mrb[58].mxu0 %vm2267_vm1, %v9896_v43  ;;  %v9972_v43 = vld [vmem:[%s16618_s9 + $0x8b8] sm:$0xff] }
 0xf63   : > { %12294 = vmatprep.mubr.msk.f32.mxu0 %vm2267_vm1, %v9897_v61  ;;  %v9973_v61 = vld [vmem:[%s16618_s9 + $0x8c0] sm:$0xff] }
 0xf66   : > { %12295 = vmatmul.mubr.msk.f32.gmra.mrb[60].mxu0 %vm2267_vm1, %v9898_v23  ;;  %v9974_v23 = vld [vmem:[%s16618_s9 + $0x8c8] sm:$0xff] }
 0xf67   : > { %12297 = vmatprep.mubr.msk.f32.mxu0 %vm2267_vm1, %v9899_v62  ;;  %v9975_v62 = vld [vmem:[%s16618_s9 + $0x8d0] sm:$0xff] }
 0xf6a   : > { %12298 = vmatmul.mubr.msk.f32.gmra.mrb[62].mxu0 %vm2267_vm1, %v9900_v36  ;;  %v9976_v36 = vld [vmem:[%s16618_s9 + $0x8d8] sm:$0xff] }
 0xf6b   : > { %12300 = vmatprep.mubr.msk.f32.mxu0 %vm2267_vm1, %v9901_v63  ;;  %v9977_v63 = vld [vmem:[%s16618_s9 + $0x8e0] sm:$0xff] }
 0xf6e   : > { %12301 = vmatmul.mubr.msk.f32.gmra.mrb[64].mxu0 %vm2267_vm1, %v9902_v47  ;;  %v9978_v47 = vld [vmem:[%s16618_s9 + $0x8e8] sm:$0xff] }
 0xf6f   : > { %12303 = vmatprep.mubr.msk.f32.mxu0 %vm2267_vm1, %v9903_v2  ;;  %v9979_v2 = vld [vmem:[%s16618_s9 + $0x8f0] sm:$0xff] }
 0xf72   : > { %12304 = vmatmul.mubr.msk.f32.gmra.mrb[66].mxu0 %vm2267_vm1, %v9904_v56  ;;  %v9980_v56 = vld [vmem:[%s16618_s9 + $0x8f8] sm:$0xff] }
 0xf73   : > { %12342 = vmatprep.mubr.msk.f32.mxu0 %vm2267_vm1, %v9949_v4  ;;  %v16544_v4 = vld [vmem:[%s16620_s11] ss:$0 sm:$0xff] }
 0xf76   : > { %12343 = vmatmul.mubr.msk.f32.vlgmr.msra.gmra.mrb[36].mxu0 %vm2267_vm1, %v9950_v1  ;;  %v13184_v1 = vadd.f32 %v16544_v4, %v15646_v44  ;;  %v13192_v44 = vadd.f32 %v16544_v4, %v15654_v55  ;;  %v13200_v55 = vadd.f32 %v16544_v4, %v15662_v9  ;;  %v13208_v9 = vadd.f32 %v16544_v4, %v15670_v13 }
 0xf77   : > { %12345 = vmatprep.mubr.msk.f32.mxu0 %vm2267_vm1, %v9951_v48  ;;  %v13186_v48 = vadd.f32 %v16544_v4, %v15648_v30  ;;  %v13194_v30 = vadd.f32 %v16544_v4, %v15656_v59  ;;  %v13202_v59 = vadd.f32 %v16544_v4, %v15664_v10  ;;  %v13210_v10 = vadd.f32 %v16544_v4, %v15672_v14 }
 0xf78   : > { %v13216_v13 = vadd.f32 %v16544_v4, %v15678_v17  ;;  %v13218_v14 = vadd.f32 %v16544_v4, %v15680_v18  ;;  %v13224_v18 = vadd.f32 %v16544_v4, %v15686_v28 }
 0xf7a   : > { %12346 = vmatmul.mubr.msk.f32.gmra.mrb[38].mxu0 %vm2267_vm1, %v9952_v6 }
 0xf7b   : > { %12348 = vmatprep.mubr.msk.f32.mxu0 %vm2267_vm1, %v9953_v51 }
 0xf7e   : > { %12349 = vmatmul.mubr.msk.f32.gmra.mrb[40].mxu0 %vm2267_vm1, %v9954_v58 }
 0xf7f   : > { %12351 = vmatprep.mubr.msk.f32.mxu0 %vm2267_vm1, %v9955_v32 }
 0xf82   : > { %12352 = vmatmul.mubr.msk.f32.gmra.mrb[42].mxu0 %vm2267_vm1, %v9956_v3  ;;  %v13188_v3 = vadd.f32 %v16544_v4, %v15650_v50  ;;  %v13196_v50 = vadd.f32 %v16544_v4, %v15658_v8  ;;  %v13204_v8 = vadd.f32 %v16544_v4, %v15666_v11  ;;  %v13212_v11 = vadd.f32 %v16544_v4, %v15674_v15 }
 0xf83   : > { %12354 = vmatprep.mubr.msk.f32.mxu0 %vm2267_vm1, %v9957_v7  ;;  %v13190_v7 = vadd.f32 %v16544_v4, %v15652_v54  ;;  %v13198_v54 = vadd.f32 %v16544_v4, %v15660_v60  ;;  %v13206_v60 = vadd.f32 %v16544_v4, %v15668_v12  ;;  %v13214_v12 = vadd.f32 %v16544_v4, %v15676_v16 }
 0xf84   : > { %v13220_v15 = vadd.f32 %v16544_v4, %v15682_v19  ;;  %v13222_v16 = vadd.f32 %v16544_v4, %v15684_v20  ;;  %v13228_v20 = vadd.f32 %v16544_v4, %v15690_v29 }
 0xf86   : > { %12355 = vmatmul.mubr.msk.f32.gmra.mrb[44].mxu0 %vm2267_vm1, %v9958_v27 }
 0xf87   : > { %12357 = vmatprep.mubr.msk.f32.mxu0 %vm2267_vm1, %v9959_v46 }
 0xf8a   : > { %12358 = vmatmul.mubr.msk.f32.gmra.mrb[46].mxu0 %vm2267_vm1, %v9960_v24 }
 0xf8b   : > { %12360 = vmatprep.mubr.msk.f32.mxu0 %vm2267_vm1, %v9961_v38 }
 0xf8e   : > { %12361 = vmatmul.mubr.msk.f32.gmra.mrb[48].mxu0 %vm2267_vm1, %v9962_v26 }
 0xf8f   : > { %12363 = vmatprep.mubr.msk.f32.mxu0 %vm2267_vm1, %v9963_v57 }
 0xf92   : > { %12364 = vmatmul.mubr.msk.f32.gmra.mrb[50].mxu0 %vm2267_vm1, %v9964_v34 }
 0xf93   : > { %12366 = vmatprep.mubr.msk.f32.mxu0 %vm2267_vm1, %v9965_v40 }
 0xf96   : > { %12367 = vmatmul.mubr.msk.f32.gmra.mrb[52].mxu0 %vm2267_vm1, %v9966_v0 }
 0xf97   : > { %12369 = vmatprep.mubr.msk.f32.mxu0 %vm2267_vm1, %v9967_v42 }
 0xf9a   : > { %12370 = vmatmul.mubr.msk.f32.gmra.mrb[54].mxu0 %vm2267_vm1, %v9968_v5 }
 0xf9b   : > { %12372 = vmatprep.mubr.msk.f32.mxu0 %vm2267_vm1, %v9969_v49 }
 0xf9e   : > { %12373 = vmatmul.mubr.msk.f32.gmra.mrb[56].mxu0 %vm2267_vm1, %v9970_v52 }
 0xf9f   : > { %12375 = vmatprep.mubr.msk.f32.mxu0 %vm2267_vm1, %v9971_v53 }
 0xfa2   : > { %12376 = vmatmul.mubr.msk.f32.gmra.mrb[58].mxu0 %vm2267_vm1, %v9972_v43 }
 0xfa3   : > { %12378 = vmatprep.mubr.msk.f32.mxu0 %vm2267_vm1, %v9973_v61 }
 0xfa6   : > { %12379 = vmatmul.mubr.msk.f32.gmra.mrb[60].mxu0 %vm2267_vm1, %v9974_v23 }
 0xfa7   : > { %12381 = vmatprep.mubr.msk.f32.mxu0 %vm2267_vm1, %v9975_v62 }
 0xfaa   : > { %12382 = vmatmul.mubr.msk.f32.gmra.mrb[62].mxu0 %vm2267_vm1, %v9976_v36 }
 0xfab   : > { %12384 = vmatprep.mubr.msk.f32.mxu0 %vm2267_vm1, %v9977_v63 }
 0xfae   : > { %12385 = vmatmul.mubr.msk.f32.gmra.mrb[64].mxu0 %vm2267_vm1, %v9978_v47 }
 0xfaf   : > { %12387 = vmatprep.mubr.msk.f32.mxu0 %vm2267_vm1, %v9979_v2 }
 0xfb2   : > { %12388 = vmatmul.mubr.msk.f32.gmra.mrb[66].mxu0 %vm2267_vm1, %v9980_v56 }
0x1049   : > { %v12344_v6 = vpop.f32.mrb[36].mxu0 }
0x104a   : > { %v13185_v51 = vadd.f32 %v13184_v1, %v12344_v6  ;;  %v8646_v58 = vpop.f32.mrb[37].mxu0 }
0x104b   : > { %v13187_v32 = vadd.f32 %v13186_v48, %v8646_v58 }
0x104d   : > { %8837 = vxpose.xlu0.b32.start [1/16] (narrow) %v13187_v32, 8  ;;  %v12347_v27 = vpop.f32.mrb[38].mxu0 }
0x104e   : > { %v13189_v46 = vadd.f32 %v13188_v3, %v12347_v27  ;;  %v8656_v24 = vpop.f32.mrb[39].mxu0 }
0x104f   : > { %v13191_v38 = vadd.f32 %v13190_v7, %v8656_v24 }
0x1051   : > { %8838 = vxpose.xlu0.b32.cont [2/16] (narrow) %v13185_v51, 8  ;;  %v12350_v26 = vpop.f32.mrb[40].mxu0 }
0x1052   : > { %v13193_v57 = vadd.f32 %v13192_v44, %v12350_v26  ;;  %v8666_v34 = vpop.f32.mrb[41].mxu0  ;;  %v13226_v44 = vadd.f32 %v16544_v4, %v15688_v21 }
0x1053   : > { %v13195_v40 = vadd.f32 %v13194_v30, %v8666_v34  ;;  %v13230_v34 = vadd.f32 %v16544_v4, %v15692_v22 }
0x1055   : > { %8839 = vxpose.xlu0.b32.cont [3/16] (narrow) %v13191_v38, 8  ;;  %v12353_v0 = vpop.f32.mrb[42].mxu0 }
0x1056   : > { %v13197_v42 = vadd.f32 %v13196_v50, %v12353_v0  ;;  %v8676_v5 = vpop.f32.mrb[43].mxu0 }
0x1057   : > { %v13199_v49 = vadd.f32 %v13198_v54, %v8676_v5 }
0x1059   : > { %8840 = vxpose.xlu0.b32.cont [4/16] (narrow) %v13189_v46, 8  ;;  %v12356_v52 = vpop.f32.mrb[44].mxu0 }
0x105a   : > { %v13201_v53 = vadd.f32 %v13200_v55, %v12356_v52  ;;  %v8686_v43 = vpop.f32.mrb[45].mxu0 }
0x105b   : > { %v13203_v61 = vadd.f32 %v13202_v59, %v8686_v43 }
0x105d   : > { %8841 = vxpose.xlu0.b32.cont [5/16] (narrow) %v13195_v40, 8  ;;  %v12359_v23 = vpop.f32.mrb[46].mxu0 }
0x105e   : > { %v13205_v62 = vadd.f32 %v13204_v8, %v12359_v23  ;;  %v8696_v36 = vpop.f32.mrb[47].mxu0 }
0x105f   : > { %v13207_v63 = vadd.f32 %v13206_v60, %v8696_v36 }
0x1061   : > { %8842 = vxpose.xlu0.b32.cont [6/16] (narrow) %v13193_v57, 8  ;;  %v12362_v47 = vpop.f32.mrb[48].mxu0 }
0x1062   : > { %v13209_v2 = vadd.f32 %v13208_v9, %v12362_v47  ;;  %v8706_v56 = vpop.f32.mrb[49].mxu0 }
0x1063   : > { %v13211_v1 = vadd.f32 %v13210_v10, %v8706_v56 }
0x1065   : > { %8843 = vxpose.xlu0.b32.cont [7/16] (narrow) %v13199_v49, 8  ;;  %v12365_v48 = vpop.f32.mrb[50].mxu0 }
0x1066   : > { %v13213_v6 = vadd.f32 %v13212_v11, %v12365_v48  ;;  %v8716_v51 = vpop.f32.mrb[51].mxu0 }
0x1067   : > { %v13215_v58 = vadd.f32 %v13214_v12, %v8716_v51 }
0x1069   : > { %8844 = vxpose.xlu0.b32.cont [8/16] (narrow) %v13197_v42, 8  ;;  %v12368_v32 = vpop.f32.mrb[52].mxu0 }
0x106a   : > { %v13217_v3 = vadd.f32 %v13216_v13, %v12368_v32  ;;  %v8726_v7 = vpop.f32.mrb[53].mxu0 }
0x106b   : > { %v13219_v27 = vadd.f32 %v13218_v14, %v8726_v7 }
0x106d   : > { %8845 = vxpose.xlu0.b32.cont [9/16] (narrow) %v13203_v61, 8  ;;  %8869 = vxpose.xlu1.b32.start [1/16] (narrow) %v13219_v27, 8  ;;  %v12371_v46 = vpop.f32.mrb[54].mxu0 }
0x106e   : > { %v13221_v24 = vadd.f32 %v13220_v15, %v12371_v46  ;;  %v8736_v38 = vpop.f32.mrb[55].mxu0 }
0x106f   : > { %v13223_v17 = vadd.f32 %v13222_v16, %v8736_v38 }
0x1071   : > { %8846 = vxpose.xlu0.b32.cont [10/16] (narrow) %v13201_v53, 8  ;;  %8870 = vxpose.xlu1.b32.cont [2/16] (narrow) %v13217_v3, 8  ;;  %v12374_v30 = vpop.f32.mrb[56].mxu0 }
0x1072   : > { %v13225_v26 = vadd.f32 %v13224_v18, %v12374_v30  ;;  %v8746_v19 = vpop.f32.mrb[57].mxu0 }
0x1073   : > { %v13227_v57 = vadd.f32 %v13226_v44, %v8746_v19 }
0x1075   : > { %8847 = vxpose.xlu0.b32.cont [11/16] (narrow) %v13207_v63, 8  ;;  %8871 = vxpose.xlu1.b32.cont [3/16] (narrow) %v13223_v17, 8  ;;  %v12377_v40 = vpop.f32.mrb[58].mxu0 }
0x1076   : > { %v13229_v50 = vadd.f32 %v13228_v20, %v12377_v40  ;;  %v8756_v28 = vpop.f32.mrb[59].mxu0 }
0x1077   : > { %v13231_v54 = vadd.f32 %v13230_v34, %v8756_v28 }
0x1079   : > { %8848 = vxpose.xlu0.b32.cont [12/16] (narrow) %v13205_v62, 8  ;;  %8872 = vxpose.xlu1.b32.cont [4/16] (narrow) %v13221_v24, 8  ;;  %v12380_v21 = vpop.f32.mrb[60].mxu0 }
0x107a   : > { %v13233_v0 = vadd.f32 %v15697_v25, %v12380_v21  ;;  %v8766_v42 = vpop.f32.mrb[61].mxu0 }
0x107b   : > { %v13235_v5 = vadd.f32 %v15699_v31, %v8766_v42 }
0x107d   : > { %8849 = vxpose.xlu0.b32.cont [13/16] (narrow) %v13211_v1, 8  ;;  %8873 = vxpose.xlu1.b32.cont [5/16] (narrow) %v13227_v57, 8  ;;  %v12383_v29 = vpop.f32.mrb[62].mxu0 }
0x107e   : > { %v13237_v49 = vadd.f32 %v15701_v33, %v12383_v29  ;;  %v8776_v22 = vpop.f32.mrb[63].mxu0 }
0x107f   : > { %v13239_v4 = vadd.f32 %v15703_v35, %v8776_v22 }
0x1081   : > { %8850 = vxpose.xlu0.b32.cont [14/16] (narrow) %v13209_v2, 8  ;;  %8874 = vxpose.xlu1.b32.cont [6/16] (narrow) %v13225_v26, 8  ;;  %v12386_v55 = vpop.f32.mrb[64].mxu0 }
0x1082   : > { %v13241_v59 = vadd.f32 %v15705_v37, %v12386_v55  ;;  %v8786_v52 = vpop.f32.mrb[65].mxu0 }
0x1083   : > { %v13243_v53 = vadd.f32 %v15707_v39, %v8786_v52 }
0x1085   : > { %8851 = vxpose.xlu0.b32.cont [15/16] (narrow) %v13215_v58, 8  ;;  %8875 = vxpose.xlu1.b32.cont [7/16] (narrow) %v13231_v54, 8  ;;  %v12389_v25 = vpop.f32.mrb[66].mxu0 }
0x1086   : > { %v13245_v31 = vadd.f32 %v15709_v41, %v12389_v25  ;;  %v8796_v43 = vpop.f32.mrb[67].mxu0 }
0x1087   : > { %v13247_v61 = vadd.f32 %v15711_v45, %v8796_v43 }
0x1089   : > { %8852 = vxpose.xlu0.b32.end [16/16] (narrow) %v13213_v6, 8  ;;  %8876 = vxpose.xlu1.b32.cont [8/16] (narrow) %v13229_v50, 8 }
0x108d   : > { %8877 = vxpose.xlu1.b32.cont [9/16] (narrow) %v13235_v5, 8 }
0x1091   : > { %8878 = vxpose.xlu1.b32.cont [10/16] (narrow) %v13233_v0, 8 }
0x1095   : > { %8879 = vxpose.xlu1.b32.cont [11/16] (narrow) %v13239_v4, 8 }
0x1099   : > { %8880 = vxpose.xlu1.b32.cont [12/16] (narrow) %v13237_v49, 8 }
0x109d   : > { %8881 = vxpose.xlu1.b32.cont [13/16] (narrow) %v13243_v53, 8 }
0x10a1   : > { %8882 = vxpose.xlu1.b32.cont [14/16] (narrow) %v13241_v59, 8 }
0x10a5   : > { %8883 = vxpose.xlu1.b32.cont [15/16] (narrow) %v13247_v61, 8 }
0x10a9   : > { %8884 = vxpose.xlu1.b32.end [16/16] (narrow) %v13245_v31, 8 }
0x10cd   : > { %v8853_v33 = vpop.trf.xlu0 }
0x10ce   : > { %v10013_v35 = vmul.f32 -1.442695, %v8853_v33 }
0x10d0   : > { %13560 = vpow2.f32 %v10013_v35 }
0x10da   : > { %v13561_v41 = vpop.eup %13560 }
0x10db   : > { %v8907_v8 = vadd.f32 1.0, %v13561_v41 }
0x10ed   : > { %v8885_v37 = vpop.trf.xlu1 }
0x10ee   : > { %v10014_v39 = vmul.f32 -1.442695, %v8885_v37 }
0x10f0   : > { %13562 = vpow2.f32 %v10014_v39 }
0x10f1   : > { %13564 = vrcp.f32 %v8907_v8 }
0x10fa   : > { %v13563_v45 = vpop.eup %13562 }
0x10fb   : > { %v8908_v60 = vadd.f32 1.0, %v13563_v45  ;;  %v13565_v23 = vpop.eup %13564 }
0x10fd   : > { %13566 = vrcp.f32 %v8908_v60 }
0x1107   : > { %v13567_v62 = vpop.eup %13566 }
0x1108   : > { %v8915_v36 = vcombine.low %v13565_v23, %v13567_v62 }
0x110a   : > { %8917 = vst [vmem:[%s413_s27] sm:$0x77] %v8915_v36 }
0x110b PF: > { %s22_s21 = sadd.s32 1, %s13575_s21  }
0x110c   : > { %p19_p4 = scmp.ge.s32.totalorder %s22_s21, 4  }
0x110e   :  { %21 = sbr.rel (!%p19_p4) target bundleno = 1 (0x1), region = 146 }

</bundles_post_ra>
